<compile_context>
chip_gen: v5e
topology: v5e:2x2
jax: 0.10.0
libtpu: 0.0.40
codegen_flags: <defaults>
</compile_context>

<pallas_src>
import functools

import jax
import jax.numpy as jnp
from jax.experimental import pallas as pl
from jax.experimental.pallas import tpu as pltpu

KSIZE = 7
PAD = 3


def _spatial_attn_kernel(w_ref, b_ref, pos_ref, x_ref, o_ref,
                         sum_ref, max_ref, *, C, H, W):
    # w_ref:   (2*7*7,) f32 SMEM, flattened in (in_ch, kh, kw) order
    # b_ref:   (1,)     f32 SMEM
    # pos_ref: (2, H*W) i32 VMEM -- row / col index of every flattened pixel
    # x_ref:   (NB, CB, H*W) input block (lane-dense spatial axis)
    # o_ref:   (NB, 1, H*W) output block
    # sum_ref / max_ref: (NB, H*W) f32 running channel-sum / channel-max
    ci = pl.program_id(1)
    nc = pl.num_programs(1)

    @pl.when(ci == 0)
    def _init():
        sum_ref[...] = jnp.zeros_like(sum_ref)
        max_ref[...] = jnp.full_like(max_ref, -jnp.inf)

    xb = x_ref[...].astype(jnp.float32)                 # (NB, CB, HW)
    sum_ref[...] += jnp.sum(xb, axis=1)
    max_ref[...] = jnp.maximum(max_ref[...], jnp.max(xb, axis=1))

    @pl.when(ci == nc - 1)
    def _finalize():
        hw = H * W
        avg = sum_ref[...] * (1.0 / C)                  # (NB, HW) lane-dense
        mx = max_ref[...]                               # (NB, HW)
        pos = pos_ref[...]
        hpos = pos[0:1, :]                              # (1, HW)
        wpos = pos[1:2, :]

        acc = jnp.full(avg.shape, b_ref[0], dtype=jnp.float32)
        # 7x7 conv (2 -> 1 channel), padding=3: each tap is a static XLU lane
        # rotation of the flattened maps plus a border-validity mask (VPU).
        for dh in range(-PAD, PAD + 1):
            row_ok = (hpos + dh >= 0) & (hpos + dh < H)
            for dw in range(-PAD, PAD + 1):
                ok = row_ok & (wpos + dw >= 0) & (wpos + dw < W)
                shift = (-(dh * W + dw)) % hw
                ra = pltpu.roll(avg, shift=shift, axis=1) if shift else avg
                rm = pltpu.roll(mx, shift=shift, axis=1) if shift else mx
                wa = w_ref[(dh + PAD) * KSIZE + (dw + PAD)]
                wm = w_ref[KSIZE * KSIZE + (dh + PAD) * KSIZE + (dw + PAD)]
                acc = acc + jnp.where(ok, wa * ra + wm * rm, 0.0)

        o_ref[...] = jax.nn.sigmoid(acc)[:, None, :].astype(o_ref.dtype)


def _pick_channel_block(C):
    # Stream C over the grid for large channel counts so VMEM stays flat.
    # Blocks are multiples of 8 (sublane tiling) and exact divisors of C.
    for cand in (256, 128, 64, 32, 16, 8):
        if C > cand and C % cand == 0:
            return cand
    return C  # small (or awkwardly factored) C: single pass over channels


def _pick_batch_block(N, cb, hw):
    if N <= 2:
        return 1  # keep >=2 grid steps so v7x megacore has work for both TCs
    nb = max(d for d in (8, 4, 2, 1) if N % d == 0)
    # Keep the double-buffered input block well inside scoped VMEM
    # (16 MiB v5e / 32 MiB v6e+v7x defaults; 64 MiB physical on v7x).
    while nb > 1 and nb * cb * hw * 4 > (4 << 20):
        nb //= 2
    return nb


def spatial_attention(x, weight, bias):
    """x: (N, C, H, W); weight: (1, 2, 7, 7); bias: (1,) -> (N, 1, H, W) f32."""
    N, C, H, W = x.shape
    hw = H * W
    cb = _pick_channel_block(C)
    nb = _pick_batch_block(N, cb, hw)

    x_flat = x.reshape(N, C, hw)                          # lane-dense spatial axis
    w_flat = weight.reshape(-1).astype(jnp.float32)       # (98,), (in_ch, kh, kw)
    b = bias.reshape(1).astype(jnp.float32)

    # Row / column index of every flattened pixel (conv border masks).
    hpos = jnp.repeat(jnp.arange(H, dtype=jnp.int32), W)
    wpos = jnp.tile(jnp.arange(W, dtype=jnp.int32), H)
    pos = jnp.stack([hpos, wpos], axis=0)                 # (2, HW) int32

    kernel = functools.partial(_spatial_attn_kernel, C=C, H=H, W=W)

    out = pl.pallas_call(
        kernel,
        out_shape=jax.ShapeDtypeStruct((N, 1, hw), jnp.float32),
        grid_spec=pltpu.PrefetchScalarGridSpec(
            num_scalar_prefetch=0,
            grid=(N // nb, C // cb),
            in_specs=[
                pl.BlockSpec(memory_space=pltpu.MemorySpace.SMEM),    # conv weights
                pl.BlockSpec(memory_space=pltpu.MemorySpace.SMEM),    # conv bias
                pl.BlockSpec((2, hw), lambda n, c: (0, 0)),           # pixel pos
                pl.BlockSpec((nb, cb, hw), lambda n, c: (n, c, 0)),   # x block
            ],
            out_specs=pl.BlockSpec((nb, 1, hw), lambda n, c: (n, 0, 0)),
            scratch_shapes=[
                pltpu.VMEM((nb, hw), jnp.float32),   # running channel sum
                pltpu.VMEM((nb, hw), jnp.float32),   # running channel max
            ],
        ),
        compiler_params=pltpu.CompilerParams(
            dimension_semantics=("parallel", "arbitrary")),
    )(w_flat, b, pos, x_flat)

    return out.reshape(N, 1, H, W)


def _reference(x, weight, bias):
    avg = jnp.mean(x, axis=1, keepdims=True)
    mx = jnp.max(x, axis=1, keepdims=True)
    out = jnp.concatenate([avg, mx], axis=1)
    conv = jax.lax.conv_general_dilated(
        out, weight, window_strides=(1, 1), padding=((PAD, PAD), (PAD, PAD)),
        dimension_numbers=("NCHW", "OIHW", "NCHW"),
        precision=jax.lax.Precision.HIGHEST)
    return jax.nn.sigmoid(conv + bias.reshape(1, 1, 1, 1))


if __name__ == "__main__":
    N, C, H, W = 2, 4, 16, 16
    key = jax.random.PRNGKey(0)
    kx, kw, kb = jax.random.split(key, 3)

    x = jax.random.normal(kx, (N, C, H, W), dtype=jnp.float32)
    # Deterministic synthetic conv parameters (same shapes as nn.Conv2d(2, 1, 7)).
    weight = jax.random.normal(kw, (1, 2, KSIZE, KSIZE), dtype=jnp.float32) * 0.1
    bias = jax.random.normal(kb, (1,), dtype=jnp.float32) * 0.1

    out = spatial_attention(x, weight, bias)
    out = jax.block_until_ready(out)

    ref = _reference(x, weight, bias)
    assert out.shape == (N, 1, H, W)
    assert jnp.allclose(out, ref, atol=1e-5, rtol=1e-5), "mismatch vs JAX reference"
    print("KERNEL_OK")
</pallas_src>

<mosaic_0001>
module attributes {stable_mosaic.version = 11 : i64} {
  func.func @_spatial_attn_kernel(%arg0: i32, %arg1: i32, %arg2: memref<98xf32, #tpu.memory_space<smem>>, %arg3: memref<1xf32, #tpu.memory_space<smem>>, %arg4: memref<2x256xi32, #tpu.memory_space<vmem>>, %arg5: memref<1x4x256xf32, #tpu.memory_space<vmem>>, %arg6: memref<1x1x256xf32, #tpu.memory_space<vmem>>, %arg7: memref<1x256xf32, #tpu.memory_space<vmem>>, %arg8: memref<1x256xf32, #tpu.memory_space<vmem>>) attributes {dimension_semantics = [#tpu.dimension_semantics<parallel>, #tpu.dimension_semantics<arbitrary>], iteration_bounds = array<i64: 2, 1>, scalar_prefetch = 0 : i64, scratch_operands = 2 : i64, tpu.core_type = #tpu.core_type<tc>, window_params = [{transform_indices = @transform_0, window_bounds = array<i64: 98>}, {transform_indices = @transform_1, window_bounds = array<i64: 1>}, {pipeline_mode = #tpu.pipeline_mode<synchronous>, transform_indices = @transform_2, window_bounds = array<i64: 2, 256>}, {transform_indices = @transform_3, window_bounds = array<i64: 1, 4, 256>}, {transform_indices = @transform_4, window_bounds = array<i64: 1, 1, 256>}]} {
    %c0_i32 = arith.constant 0 : i32
    %0 = arith.cmpi eq, %arg1, %c0_i32 : i32
    %1 = arith.extui %0 : i1 to i32
    %c0_i32_0 = arith.constant 0 : i32
    %2 = arith.cmpi ne, %1, %c0_i32_0 : i32
    scf.if %2 {
      %cst_14 = arith.constant 0.000000e+00 : f32
      %15 = vector.broadcast %cst_14 : f32 to vector<1x256xf32>
      %c0_15 = arith.constant 0 : index
      %c0_16 = arith.constant 0 : index
      %16 = vector.load %arg7[%c0_15, %c0_16] : memref<1x256xf32, #tpu.memory_space<vmem>>, vector<1x256xf32>
      tpu.vector_store %arg7[%c0_15, %c0_16], %15 {strides = array<i32>} : memref<1x256xf32, #tpu.memory_space<vmem>>, vector<1x256xf32>,
      %cst_17 = arith.constant 0xFF800000 : f32
      %17 = vector.broadcast %cst_17 : f32 to vector<1x256xf32>
      %c0_18 = arith.constant 0 : index
      %c0_19 = arith.constant 0 : index
      %18 = vector.load %arg8[%c0_18, %c0_19] : memref<1x256xf32, #tpu.memory_space<vmem>>, vector<1x256xf32>
      tpu.vector_store %arg8[%c0_18, %c0_19], %17 {strides = array<i32>} : memref<1x256xf32, #tpu.memory_space<vmem>>, vector<1x256xf32>,
    } else {
    }
    %c0 = arith.constant 0 : index
    %c0_1 = arith.constant 0 : index
    %c0_2 = arith.constant 0 : index
    %3 = vector.load %arg5[%c0, %c0_1, %c0_2] : memref<1x4x256xf32, #tpu.memory_space<vmem>>, vector<1x4x256xf32>
    %c0_3 = arith.constant 0 : index
    %c0_4 = arith.constant 0 : index
    %4 = vector.load %arg7[%c0_3, %c0_4] : memref<1x256xf32, #tpu.memory_space<vmem>>, vector<1x256xf32>
    %cst = arith.constant dense<0.000000e+00> : vector<1x256xf32>
    %5 = vector.multi_reduction <add>, %3, %cst [1] : vector<1x4x256xf32> to vector<1x256xf32>
    %6 = arith.addf %4, %5 : vector<1x256xf32>
    %c0_5 = arith.constant 0 : index
    %c0_6 = arith.constant 0 : index
    %7 = vector.load %arg7[%c0_5, %c0_6] : memref<1x256xf32, #tpu.memory_space<vmem>>, vector<1x256xf32>
    tpu.vector_store %arg7[%c0_5, %c0_6], %6 {strides = array<i32>} : memref<1x256xf32, #tpu.memory_space<vmem>>, vector<1x256xf32>,
    %c0_7 = arith.constant 0 : index
    %c0_8 = arith.constant 0 : index
    %8 = vector.load %arg8[%c0_7, %c0_8] : memref<1x256xf32, #tpu.memory_space<vmem>>, vector<1x256xf32>
    %cst_9 = arith.constant dense<0xFF800000> : vector<1x256xf32>
    %9 = vector.multi_reduction <maximumf>, %3, %cst_9 [1] : vector<1x4x256xf32> to vector<1x256xf32>
    %10 = arith.maximumf %8, %9 : vector<1x256xf32>
    %c0_10 = arith.constant 0 : index
    %c0_11 = arith.constant 0 : index
    %11 = vector.load %arg8[%c0_10, %c0_11] : memref<1x256xf32, #tpu.memory_space<vmem>>, vector<1x256xf32>
    tpu.vector_store %arg8[%c0_10, %c0_11], %10 {strides = array<i32>} : memref<1x256xf32, #tpu.memory_space<vmem>>, vector<1x256xf32>,
    %c0_i32_12 = arith.constant 0 : i32
    %12 = arith.cmpi eq, %arg1, %c0_i32_12 : i32
    %13 = arith.extui %12 : i1 to i32
    %c0_i32_13 = arith.constant 0 : i32
    %14 = arith.cmpi ne, %13, %c0_i32_13 : i32
    scf.if %14 {
      %c0_14 = arith.constant 0 : index
      %c0_15 = arith.constant 0 : index
      %15 = vector.load %arg7[%c0_14, %c0_15] : memref<1x256xf32, #tpu.memory_space<vmem>>, vector<1x256xf32>
      %cst_16 = arith.constant 2.500000e-01 : f32
      %16 = vector.broadcast %cst_16 : f32 to vector<1x256xf32>
      %17 = arith.mulf %15, %16 : vector<1x256xf32>
      %c0_17 = arith.constant 0 : index
      %c0_18 = arith.constant 0 : index
      %18 = vector.load %arg8[%c0_17, %c0_18] : memref<1x256xf32, #tpu.memory_space<vmem>>, vector<1x256xf32>
      %c0_19 = arith.constant 0 : index
      %c0_20 = arith.constant 0 : index
      %19 = vector.load %arg4[%c0_19, %c0_20] : memref<2x256xi32, #tpu.memory_space<vmem>>, vector<2x256xi32>
      %20 = vector.extract_strided_slice %19 {offsets = [0, 0], sizes = [1, 256], strides = [1, 1]} : vector<2x256xi32> to vector<1x256xi32>
      %21 = vector.extract_strided_slice %19 {offsets = [1, 0], sizes = [1, 256], strides = [1, 1]} : vector<2x256xi32> to vector<1x256xi32>
      %c0_21 = arith.constant 0 : index
      %22 = memref.load %arg3[%c0_21] : memref<1xf32, #tpu.memory_space<smem>>
      %23 = vector.broadcast %22 : f32 to vector<1x256xf32>
      %c-3_i32 = arith.constant -3 : i32
      %24 = vector.broadcast %c-3_i32 : i32 to vector<1x256xi32>
      %25 = arith.addi %20, %24 : vector<1x256xi32>
      %c0_i32_22 = arith.constant 0 : i32
      %26 = vector.broadcast %c0_i32_22 : i32 to vector<1x256xi32>
      %27 = arith.cmpi sge, %25, %26 : vector<1x256xi32>
      %c-3_i32_23 = arith.constant -3 : i32
      %28 = vector.broadcast %c-3_i32_23 : i32 to vector<1x256xi32>
      %29 = arith.addi %20, %28 : vector<1x256xi32>
      %c16_i32 = arith.constant 16 : i32
      %30 = vector.broadcast %c16_i32 : i32 to vector<1x256xi32>
      %31 = arith.cmpi slt, %29, %30 : vector<1x256xi32>
      %32 = arith.andi %27, %31 : vector<1x256xi1>
      %c-3_i32_24 = arith.constant -3 : i32
      %33 = vector.broadcast %c-3_i32_24 : i32 to vector<1x256xi32>
      %34 = arith.addi %21, %33 : vector<1x256xi32>
      %c0_i32_25 = arith.constant 0 : i32
      %35 = vector.broadcast %c0_i32_25 : i32 to vector<1x256xi32>
      %36 = arith.cmpi sge, %34, %35 : vector<1x256xi32>
      %37 = arith.andi %32, %36 : vector<1x256xi1>
      %c-3_i32_26 = arith.constant -3 : i32
      %38 = vector.broadcast %c-3_i32_26 : i32 to vector<1x256xi32>
      %39 = arith.addi %21, %38 : vector<1x256xi32>
      %c16_i32_27 = arith.constant 16 : i32
      %40 = vector.broadcast %c16_i32_27 : i32 to vector<1x256xi32>
      %41 = arith.cmpi slt, %39, %40 : vector<1x256xi32>
      %42 = arith.andi %37, %41 : vector<1x256xi1>
      %c51_i32 = arith.constant 51 : i32
      %43 = tpu.dynamic_rotate %17 by %c51_i32 dim 1 : vector<1x256xf32>, i32 -> vector<1x256xf32>
      %c51_i32_28 = arith.constant 51 : i32
      %44 = tpu.dynamic_rotate %18 by %c51_i32_28 dim 1 : vector<1x256xf32>, i32 -> vector<1x256xf32>
      %c0_29 = arith.constant 0 : index
      %45 = memref.load %arg2[%c0_29] : memref<98xf32, #tpu.memory_space<smem>>
      %c49 = arith.constant 49 : index
      %46 = memref.load %arg2[%c49] : memref<98xf32, #tpu.memory_space<smem>>
      %47 = vector.broadcast %45 : f32 to vector<1x256xf32>
      %48 = arith.mulf %47, %43 : vector<1x256xf32>
      %49 = vector.broadcast %46 : f32 to vector<1x256xf32>
      %50 = arith.mulf %49, %44 : vector<1x256xf32>
      %51 = arith.addf %48, %50 : vector<1x256xf32>
      %cst_30 = arith.constant 0.000000e+00 : f32
      %52 = vector.broadcast %cst_30 : f32 to vector<1x256xf32>
      %53 = arith.select %42, %51, %52 : vector<1x256xi1>, vector<1x256xf32>
      %54 = arith.addf %23, %53 : vector<1x256xf32>
      %c-2_i32 = arith.constant -2 : i32
      %55 = vector.broadcast %c-2_i32 : i32 to vector<1x256xi32>
      %56 = arith.addi %21, %55 : vector<1x256xi32>
      %c0_i32_31 = arith.constant 0 : i32
      %57 = vector.broadcast %c0_i32_31 : i32 to vector<1x256xi32>
      %58 = arith.cmpi sge, %56, %57 : vector<1x256xi32>
      %59 = arith.andi %32, %58 : vector<1x256xi1>
      %c-2_i32_32 = arith.constant -2 : i32
      %60 = vector.broadcast %c-2_i32_32 : i32 to vector<1x256xi32>
      %61 = arith.addi %21, %60 : vector<1x256xi32>
      %c16_i32_33 = arith.constant 16 : i32
      %62 = vector.broadcast %c16_i32_33 : i32 to vector<1x256xi32>
      %63 = arith.cmpi slt, %61, %62 : vector<1x256xi32>
      %64 = arith.andi %59, %63 : vector<1x256xi1>
      %c50_i32 = arith.constant 50 : i32
      %65 = tpu.dynamic_rotate %17 by %c50_i32 dim 1 : vector<1x256xf32>, i32 -> vector<1x256xf32>
      %c50_i32_34 = arith.constant 50 : i32
      %66 = tpu.dynamic_rotate %18 by %c50_i32_34 dim 1 : vector<1x256xf32>, i32 -> vector<1x256xf32>
      %c1 = arith.constant 1 : index
      %67 = memref.load %arg2[%c1] : memref<98xf32, #tpu.memory_space<smem>>
      %c50 = arith.constant 50 : index
      %68 = memref.load %arg2[%c50] : memref<98xf32, #tpu.memory_space<smem>>
      %69 = vector.broadcast %67 : f32 to vector<1x256xf32>
      %70 = arith.mulf %69, %65 : vector<1x256xf32>
      %71 = vector.broadcast %68 : f32 to vector<1x256xf32>
      %72 = arith.mulf %71, %66 : vector<1x256xf32>
      %73 = arith.addf %70, %72 : vector<1x256xf32>
      %cst_35 = arith.constant 0.000000e+00 : f32
      %74 = vector.broadcast %cst_35 : f32 to vector<1x256xf32>
      %75 = arith.select %64, %73, %74 : vector<1x256xi1>, vector<1x256xf32>
      %76 = arith.addf %54, %75 : vector<1x256xf32>
      %c-1_i32 = arith.constant -1 : i32
      %77 = vector.broadcast %c-1_i32 : i32 to vector<1x256xi32>
      %78 = arith.addi %21, %77 : vector<1x256xi32>
      %c0_i32_36 = arith.constant 0 : i32
      %79 = vector.broadcast %c0_i32_36 : i32 to vector<1x256xi32>
      %80 = arith.cmpi sge, %78, %79 : vector<1x256xi32>
      %81 = arith.andi %32, %80 : vector<1x256xi1>
      %c-1_i32_37 = arith.constant -1 : i32
      %82 = vector.broadcast %c-1_i32_37 : i32 to vector<1x256xi32>
      %83 = arith.addi %21, %82 : vector<1x256xi32>
      %c16_i32_38 = arith.constant 16 : i32
      %84 = vector.broadcast %c16_i32_38 : i32 to vector<1x256xi32>
      %85 = arith.cmpi slt, %83, %84 : vector<1x256xi32>
      %86 = arith.andi %81, %85 : vector<1x256xi1>
      %c49_i32 = arith.constant 49 : i32
      %87 = tpu.dynamic_rotate %17 by %c49_i32 dim 1 : vector<1x256xf32>, i32 -> vector<1x256xf32>
      %c49_i32_39 = arith.constant 49 : i32
      %88 = tpu.dynamic_rotate %18 by %c49_i32_39 dim 1 : vector<1x256xf32>, i32 -> vector<1x256xf32>
      %c2 = arith.constant 2 : index
      %89 = memref.load %arg2[%c2] : memref<98xf32, #tpu.memory_space<smem>>
      %c51 = arith.constant 51 : index
      %90 = memref.load %arg2[%c51] : memref<98xf32, #tpu.memory_space<smem>>
      %91 = vector.broadcast %89 : f32 to vector<1x256xf32>
      %92 = arith.mulf %91, %87 : vector<1x256xf32>
      %93 = vector.broadcast %90 : f32 to vector<1x256xf32>
      %94 = arith.mulf %93, %88 : vector<1x256xf32>
      %95 = arith.addf %92, %94 : vector<1x256xf32>
      %cst_40 = arith.constant 0.000000e+00 : f32
      %96 = vector.broadcast %cst_40 : f32 to vector<1x256xf32>
      %97 = arith.select %86, %95, %96 : vector<1x256xi1>, vector<1x256xf32>
      %98 = arith.addf %76, %97 : vector<1x256xf32>
      %c0_i32_41 = arith.constant 0 : i32
      %99 = vector.broadcast %c0_i32_41 : i32 to vector<1x256xi32>
      %100 = arith.addi %21, %99 : vector<1x256xi32>
      %c0_i32_42 = arith.constant 0 : i32
      %101 = vector.broadcast %c0_i32_42 : i32 to vector<1x256xi32>
      %102 = arith.cmpi sge, %100, %101 : vector<1x256xi32>
      %103 = arith.andi %32, %102 : vector<1x256xi1>
      %c0_i32_43 = arith.constant 0 : i32
      %104 = vector.broadcast %c0_i32_43 : i32 to vector<1x256xi32>
      %105 = arith.addi %21, %104 : vector<1x256xi32>
      %c16_i32_44 = arith.constant 16 : i32
      %106 = vector.broadcast %c16_i32_44 : i32 to vector<1x256xi32>
      %107 = arith.cmpi slt, %105, %106 : vector<1x256xi32>
      %108 = arith.andi %103, %107 : vector<1x256xi1>
      %c48_i32 = arith.constant 48 : i32
      %109 = tpu.dynamic_rotate %17 by %c48_i32 dim 1 : vector<1x256xf32>, i32 -> vector<1x256xf32>
      %c48_i32_45 = arith.constant 48 : i32
      %110 = tpu.dynamic_rotate %18 by %c48_i32_45 dim 1 : vector<1x256xf32>, i32 -> vector<1x256xf32>
      %c3 = arith.constant 3 : index
      %111 = memref.load %arg2[%c3] : memref<98xf32, #tpu.memory_space<smem>>
      %c52 = arith.constant 52 : index
      %112 = memref.load %arg2[%c52] : memref<98xf32, #tpu.memory_space<smem>>
      %113 = vector.broadcast %111 : f32 to vector<1x256xf32>
      %114 = arith.mulf %113, %109 : vector<1x256xf32>
      %115 = vector.broadcast %112 : f32 to vector<1x256xf32>
      %116 = arith.mulf %115, %110 : vector<1x256xf32>
      %117 = arith.addf %114, %116 : vector<1x256xf32>
      %cst_46 = arith.constant 0.000000e+00 : f32
      %118 = vector.broadcast %cst_46 : f32 to vector<1x256xf32>
      %119 = arith.select %108, %117, %118 : vector<1x256xi1>, vector<1x256xf32>
      %120 = arith.addf %98, %119 : vector<1x256xf32>
      %c1_i32 = arith.constant 1 : i32
      %121 = vector.broadcast %c1_i32 : i32 to vector<1x256xi32>
      %122 = arith.addi %21, %121 : vector<1x256xi32>
      %c0_i32_47 = arith.constant 0 : i32
      %123 = vector.broadcast %c0_i32_47 : i32 to vector<1x256xi32>
      %124 = arith.cmpi sge, %122, %123 : vector<1x256xi32>
      %125 = arith.andi %32, %124 : vector<1x256xi1>
      %c1_i32_48 = arith.constant 1 : i32
      %126 = vector.broadcast %c1_i32_48 : i32 to vector<1x256xi32>
      %127 = arith.addi %21, %126 : vector<1x256xi32>
      %c16_i32_49 = arith.constant 16 : i32
      %128 = vector.broadcast %c16_i32_49 : i32 to vector<1x256xi32>
      %129 = arith.cmpi slt, %127, %128 : vector<1x256xi32>
      %130 = arith.andi %125, %129 : vector<1x256xi1>
      %c47_i32 = arith.constant 47 : i32
      %131 = tpu.dynamic_rotate %17 by %c47_i32 dim 1 : vector<1x256xf32>, i32 -> vector<1x256xf32>
      %c47_i32_50 = arith.constant 47 : i32
      %132 = tpu.dynamic_rotate %18 by %c47_i32_50 dim 1 : vector<1x256xf32>, i32 -> vector<1x256xf32>
      %c4 = arith.constant 4 : index
      %133 = memref.load %arg2[%c4] : memref<98xf32, #tpu.memory_space<smem>>
      %c53 = arith.constant 53 : index
      %134 = memref.load %arg2[%c53] : memref<98xf32, #tpu.memory_space<smem>>
      %135 = vector.broadcast %133 : f32 to vector<1x256xf32>
      %136 = arith.mulf %135, %131 : vector<1x256xf32>
      %137 = vector.broadcast %134 : f32 to vector<1x256xf32>
      %138 = arith.mulf %137, %132 : vector<1x256xf32>
      %139 = arith.addf %136, %138 : vector<1x256xf32>
      %cst_51 = arith.constant 0.000000e+00 : f32
      %140 = vector.broadcast %cst_51 : f32 to vector<1x256xf32>
      %141 = arith.select %130, %139, %140 : vector<1x256xi1>, vector<1x256xf32>
      %142 = arith.addf %120, %141 : vector<1x256xf32>
      %c2_i32 = arith.constant 2 : i32
      %143 = vector.broadcast %c2_i32 : i32 to vector<1x256xi32>
      %144 = arith.addi %21, %143 : vector<1x256xi32>
      %c0_i32_52 = arith.constant 0 : i32
      %145 = vector.broadcast %c0_i32_52 : i32 to vector<1x256xi32>
      %146 = arith.cmpi sge, %144, %145 : vector<1x256xi32>
      %147 = arith.andi %32, %146 : vector<1x256xi1>
      %c2_i32_53 = arith.constant 2 : i32
      %148 = vector.broadcast %c2_i32_53 : i32 to vector<1x256xi32>
      %149 = arith.addi %21, %148 : vector<1x256xi32>
      %c16_i32_54 = arith.constant 16 : i32
      %150 = vector.broadcast %c16_i32_54 : i32 to vector<1x256xi32>
      %151 = arith.cmpi slt, %149, %150 : vector<1x256xi32>
      %152 = arith.andi %147, %151 : vector<1x256xi1>
      %c46_i32 = arith.constant 46 : i32
      %153 = tpu.dynamic_rotate %17 by %c46_i32 dim 1 : vector<1x256xf32>, i32 -> vector<1x256xf32>
      %c46_i32_55 = arith.constant 46 : i32
      %154 = tpu.dynamic_rotate %18 by %c46_i32_55 dim 1 : vector<1x256xf32>, i32 -> vector<1x256xf32>
      %c5 = arith.constant 5 : index
      %155 = memref.load %arg2[%c5] : memref<98xf32, #tpu.memory_space<smem>>
      %c54 = arith.constant 54 : index
      %156 = memref.load %arg2[%c54] : memref<98xf32, #tpu.memory_space<smem>>
      %157 = vector.broadcast %155 : f32 to vector<1x256xf32>
      %158 = arith.mulf %157, %153 : vector<1x256xf32>
      %159 = vector.broadcast %156 : f32 to vector<1x256xf32>
      %160 = arith.mulf %159, %154 : vector<1x256xf32>
      %161 = arith.addf %158, %160 : vector<1x256xf32>
      %cst_56 = arith.constant 0.000000e+00 : f32
      %162 = vector.broadcast %cst_56 : f32 to vector<1x256xf32>
      %163 = arith.select %152, %161, %162 : vector<1x256xi1>, vector<1x256xf32>
      %164 = arith.addf %142, %163 : vector<1x256xf32>
      %c3_i32 = arith.constant 3 : i32
      %165 = vector.broadcast %c3_i32 : i32 to vector<1x256xi32>
      %166 = arith.addi %21, %165 : vector<1x256xi32>
      %c0_i32_57 = arith.constant 0 : i32
      %167 = vector.broadcast %c0_i32_57 : i32 to vector<1x256xi32>
      %168 = arith.cmpi sge, %166, %167 : vector<1x256xi32>
      %169 = arith.andi %32, %168 : vector<1x256xi1>
      %c3_i32_58 = arith.constant 3 : i32
      %170 = vector.broadcast %c3_i32_58 : i32 to vector<1x256xi32>
      %171 = arith.addi %21, %170 : vector<1x256xi32>
      %c16_i32_59 = arith.constant 16 : i32
      %172 = vector.broadcast %c16_i32_59 : i32 to vector<1x256xi32>
      %173 = arith.cmpi slt, %171, %172 : vector<1x256xi32>
      %174 = arith.andi %169, %173 : vector<1x256xi1>
      %c45_i32 = arith.constant 45 : i32
      %175 = tpu.dynamic_rotate %17 by %c45_i32 dim 1 : vector<1x256xf32>, i32 -> vector<1x256xf32>
      %c45_i32_60 = arith.constant 45 : i32
      %176 = tpu.dynamic_rotate %18 by %c45_i32_60 dim 1 : vector<1x256xf32>, i32 -> vector<1x256xf32>
      %c6 = arith.constant 6 : index
      %177 = memref.load %arg2[%c6] : memref<98xf32, #tpu.memory_space<smem>>
      %c55 = arith.constant 55 : index
      %178 = memref.load %arg2[%c55] : memref<98xf32, #tpu.memory_space<smem>>
      %179 = vector.broadcast %177 : f32 to vector<1x256xf32>
      %180 = arith.mulf %179, %175 : vector<1x256xf32>
      %181 = vector.broadcast %178 : f32 to vector<1x256xf32>
      %182 = arith.mulf %181, %176 : vector<1x256xf32>
      %183 = arith.addf %180, %182 : vector<1x256xf32>
      %cst_61 = arith.constant 0.000000e+00 : f32
      %184 = vector.broadcast %cst_61 : f32 to vector<1x256xf32>
      %185 = arith.select %174, %183, %184 : vector<1x256xi1>, vector<1x256xf32>
      %186 = arith.addf %164, %185 : vector<1x256xf32>
      %c-2_i32_62 = arith.constant -2 : i32
      %187 = vector.broadcast %c-2_i32_62 : i32 to vector<1x256xi32>
      %188 = arith.addi %20, %187 : vector<1x256xi32>
      %c0_i32_63 = arith.constant 0 : i32
      %189 = vector.broadcast %c0_i32_63 : i32 to vector<1x256xi32>
      %190 = arith.cmpi sge, %188, %189 : vector<1x256xi32>
      %c-2_i32_64 = arith.constant -2 : i32
      %191 = vector.broadcast %c-2_i32_64 : i32 to vector<1x256xi32>
      %192 = arith.addi %20, %191 : vector<1x256xi32>
      %c16_i32_65 = arith.constant 16 : i32
      %193 = vector.broadcast %c16_i32_65 : i32 to vector<1x256xi32>
      %194 = arith.cmpi slt, %192, %193 : vector<1x256xi32>
      %195 = arith.andi %190, %194 : vector<1x256xi1>
      %c-3_i32_66 = arith.constant -3 : i32
      %196 = vector.broadcast %c-3_i32_66 : i32 to vector<1x256xi32>
      %197 = arith.addi %21, %196 : vector<1x256xi32>
      %c0_i32_67 = arith.constant 0 : i32
      %198 = vector.broadcast %c0_i32_67 : i32 to vector<1x256xi32>
      %199 = arith.cmpi sge, %197, %198 : vector<1x256xi32>
      %200 = arith.andi %195, %199 : vector<1x256xi1>
      %c-3_i32_68 = arith.constant -3 : i32
      %201 = vector.broadcast %c-3_i32_68 : i32 to vector<1x256xi32>
      %202 = arith.addi %21, %201 : vector<1x256xi32>
      %c16_i32_69 = arith.constant 16 : i32
      %203 = vector.broadcast %c16_i32_69 : i32 to vector<1x256xi32>
      %204 = arith.cmpi slt, %202, %203 : vector<1x256xi32>
      %205 = arith.andi %200, %204 : vector<1x256xi1>
      %c35_i32 = arith.constant 35 : i32
      %206 = tpu.dynamic_rotate %17 by %c35_i32 dim 1 : vector<1x256xf32>, i32 -> vector<1x256xf32>
      %c35_i32_70 = arith.constant 35 : i32
      %207 = tpu.dynamic_rotate %18 by %c35_i32_70 dim 1 : vector<1x256xf32>, i32 -> vector<1x256xf32>
      %c7 = arith.constant 7 : index
      %208 = memref.load %arg2[%c7] : memref<98xf32, #tpu.memory_space<smem>>
      %c56 = arith.constant 56 : index
      %209 = memref.load %arg2[%c56] : memref<98xf32, #tpu.memory_space<smem>>
      %210 = vector.broadcast %208 : f32 to vector<1x256xf32>
      %211 = arith.mulf %210, %206 : vector<1x256xf32>
      %212 = vector.broadcast %209 : f32 to vector<1x256xf32>
      %213 = arith.mulf %212, %207 : vector<1x256xf32>
      %214 = arith.addf %211, %213 : vector<1x256xf32>
      %cst_71 = arith.constant 0.000000e+00 : f32
      %215 = vector.broadcast %cst_71 : f32 to vector<1x256xf32>
      %216 = arith.select %205, %214, %215 : vector<1x256xi1>, vector<1x256xf32>
      %217 = arith.addf %186, %216 : vector<1x256xf32>
      %c-2_i32_72 = arith.constant -2 : i32
      %218 = vector.broadcast %c-2_i32_72 : i32 to vector<1x256xi32>
      %219 = arith.addi %21, %218 : vector<1x256xi32>
      %c0_i32_73 = arith.constant 0 : i32
      %220 = vector.broadcast %c0_i32_73 : i32 to vector<1x256xi32>
      %221 = arith.cmpi sge, %219, %220 : vector<1x256xi32>
      %222 = arith.andi %195, %221 : vector<1x256xi1>
      %c-2_i32_74 = arith.constant -2 : i32
      %223 = vector.broadcast %c-2_i32_74 : i32 to vector<1x256xi32>
      %224 = arith.addi %21, %223 : vector<1x256xi32>
      %c16_i32_75 = arith.constant 16 : i32
      %225 = vector.broadcast %c16_i32_75 : i32 to vector<1x256xi32>
      %226 = arith.cmpi slt, %224, %225 : vector<1x256xi32>
      %227 = arith.andi %222, %226 : vector<1x256xi1>
      %c34_i32 = arith.constant 34 : i32
      %228 = tpu.dynamic_rotate %17 by %c34_i32 dim 1 : vector<1x256xf32>, i32 -> vector<1x256xf32>
      %c34_i32_76 = arith.constant 34 : i32
      %229 = tpu.dynamic_rotate %18 by %c34_i32_76 dim 1 : vector<1x256xf32>, i32 -> vector<1x256xf32>
      %c8 = arith.constant 8 : index
      %230 = memref.load %arg2[%c8] : memref<98xf32, #tpu.memory_space<smem>>
      %c57 = arith.constant 57 : index
      %231 = memref.load %arg2[%c57] : memref<98xf32, #tpu.memory_space<smem>>
      %232 = vector.broadcast %230 : f32 to vector<1x256xf32>
      %233 = arith.mulf %232, %228 : vector<1x256xf32>
      %234 = vector.broadcast %231 : f32 to vector<1x256xf32>
      %235 = arith.mulf %234, %229 : vector<1x256xf32>
      %236 = arith.addf %233, %235 : vector<1x256xf32>
      %cst_77 = arith.constant 0.000000e+00 : f32
      %237 = vector.broadcast %cst_77 : f32 to vector<1x256xf32>
      %238 = arith.select %227, %236, %237 : vector<1x256xi1>, vector<1x256xf32>
      %239 = arith.addf %217, %238 : vector<1x256xf32>
      %c-1_i32_78 = arith.constant -1 : i32
      %240 = vector.broadcast %c-1_i32_78 : i32 to vector<1x256xi32>
      %241 = arith.addi %21, %240 : vector<1x256xi32>
      %c0_i32_79 = arith.constant 0 : i32
      %242 = vector.broadcast %c0_i32_79 : i32 to vector<1x256xi32>
      %243 = arith.cmpi sge, %241, %242 : vector<1x256xi32>
      %244 = arith.andi %195, %243 : vector<1x256xi1>
      %c-1_i32_80 = arith.constant -1 : i32
      %245 = vector.broadcast %c-1_i32_80 : i32 to vector<1x256xi32>
      %246 = arith.addi %21, %245 : vector<1x256xi32>
      %c16_i32_81 = arith.constant 16 : i32
      %247 = vector.broadcast %c16_i32_81 : i32 to vector<1x256xi32>
      %248 = arith.cmpi slt, %246, %247 : vector<1x256xi32>
      %249 = arith.andi %244, %248 : vector<1x256xi1>
      %c33_i32 = arith.constant 33 : i32
      %250 = tpu.dynamic_rotate %17 by %c33_i32 dim 1 : vector<1x256xf32>, i32 -> vector<1x256xf32>
      %c33_i32_82 = arith.constant 33 : i32
      %251 = tpu.dynamic_rotate %18 by %c33_i32_82 dim 1 : vector<1x256xf32>, i32 -> vector<1x256xf32>
      %c9 = arith.constant 9 : index
      %252 = memref.load %arg2[%c9] : memref<98xf32, #tpu.memory_space<smem>>
      %c58 = arith.constant 58 : index
      %253 = memref.load %arg2[%c58] : memref<98xf32, #tpu.memory_space<smem>>
      %254 = vector.broadcast %252 : f32 to vector<1x256xf32>
      %255 = arith.mulf %254, %250 : vector<1x256xf32>
      %256 = vector.broadcast %253 : f32 to vector<1x256xf32>
      %257 = arith.mulf %256, %251 : vector<1x256xf32>
      %258 = arith.addf %255, %257 : vector<1x256xf32>
      %cst_83 = arith.constant 0.000000e+00 : f32
      %259 = vector.broadcast %cst_83 : f32 to vector<1x256xf32>
      %260 = arith.select %249, %258, %259 : vector<1x256xi1>, vector<1x256xf32>
      %261 = arith.addf %239, %260 : vector<1x256xf32>
      %c0_i32_84 = arith.constant 0 : i32
      %262 = vector.broadcast %c0_i32_84 : i32 to vector<1x256xi32>
      %263 = arith.addi %21, %262 : vector<1x256xi32>
      %c0_i32_85 = arith.constant 0 : i32
      %264 = vector.broadcast %c0_i32_85 : i32 to vector<1x256xi32>
      %265 = arith.cmpi sge, %263, %264 : vector<1x256xi32>
      %266 = arith.andi %195, %265 : vector<1x256xi1>
      %c0_i32_86 = arith.constant 0 : i32
      %267 = vector.broadcast %c0_i32_86 : i32 to vector<1x256xi32>
      %268 = arith.addi %21, %267 : vector<1x256xi32>
      %c16_i32_87 = arith.constant 16 : i32
      %269 = vector.broadcast %c16_i32_87 : i32 to vector<1x256xi32>
      %270 = arith.cmpi slt, %268, %269 : vector<1x256xi32>
      %271 = arith.andi %266, %270 : vector<1x256xi1>
      %c32_i32 = arith.constant 32 : i32
      %272 = tpu.dynamic_rotate %17 by %c32_i32 dim 1 : vector<1x256xf32>, i32 -> vector<1x256xf32>
      %c32_i32_88 = arith.constant 32 : i32
      %273 = tpu.dynamic_rotate %18 by %c32_i32_88 dim 1 : vector<1x256xf32>, i32 -> vector<1x256xf32>
      %c10 = arith.constant 10 : index
      %274 = memref.load %arg2[%c10] : memref<98xf32, #tpu.memory_space<smem>>
      %c59 = arith.constant 59 : index
      %275 = memref.load %arg2[%c59] : memref<98xf32, #tpu.memory_space<smem>>
      %276 = vector.broadcast %274 : f32 to vector<1x256xf32>
      %277 = arith.mulf %276, %272 : vector<1x256xf32>
      %278 = vector.broadcast %275 : f32 to vector<1x256xf32>
      %279 = arith.mulf %278, %273 : vector<1x256xf32>
      %280 = arith.addf %277, %279 : vector<1x256xf32>
      %cst_89 = arith.constant 0.000000e+00 : f32
      %281 = vector.broadcast %cst_89 : f32 to vector<1x256xf32>
      %282 = arith.select %271, %280, %281 : vector<1x256xi1>, vector<1x256xf32>
      %283 = arith.addf %261, %282 : vector<1x256xf32>
      %c1_i32_90 = arith.constant 1 : i32
      %284 = vector.broadcast %c1_i32_90 : i32 to vector<1x256xi32>
      %285 = arith.addi %21, %284 : vector<1x256xi32>
      %c0_i32_91 = arith.constant 0 : i32
      %286 = vector.broadcast %c0_i32_91 : i32 to vector<1x256xi32>
      %287 = arith.cmpi sge, %285, %286 : vector<1x256xi32>
      %288 = arith.andi %195, %287 : vector<1x256xi1>
      %c1_i32_92 = arith.constant 1 : i32
      %289 = vector.broadcast %c1_i32_92 : i32 to vector<1x256xi32>
      %290 = arith.addi %21, %289 : vector<1x256xi32>
      %c16_i32_93 = arith.constant 16 : i32
      %291 = vector.broadcast %c16_i32_93 : i32 to vector<1x256xi32>
      %292 = arith.cmpi slt, %290, %291 : vector<1x256xi32>
      %293 = arith.andi %288, %292 : vector<1x256xi1>
      %c31_i32 = arith.constant 31 : i32
      %294 = tpu.dynamic_rotate %17 by %c31_i32 dim 1 : vector<1x256xf32>, i32 -> vector<1x256xf32>
      %c31_i32_94 = arith.constant 31 : i32
      %295 = tpu.dynamic_rotate %18 by %c31_i32_94 dim 1 : vector<1x256xf32>, i32 -> vector<1x256xf32>
      %c11 = arith.constant 11 : index
      %296 = memref.load %arg2[%c11] : memref<98xf32, #tpu.memory_space<smem>>
      %c60 = arith.constant 60 : index
      %297 = memref.load %arg2[%c60] : memref<98xf32, #tpu.memory_space<smem>>
      %298 = vector.broadcast %296 : f32 to vector<1x256xf32>
      %299 = arith.mulf %298, %294 : vector<1x256xf32>
      %300 = vector.broadcast %297 : f32 to vector<1x256xf32>
      %301 = arith.mulf %300, %295 : vector<1x256xf32>
      %302 = arith.addf %299, %301 : vector<1x256xf32>
      %cst_95 = arith.constant 0.000000e+00 : f32
      %303 = vector.broadcast %cst_95 : f32 to vector<1x256xf32>
      %304 = arith.select %293, %302, %303 : vector<1x256xi1>, vector<1x256xf32>
      %305 = arith.addf %283, %304 : vector<1x256xf32>
      %c2_i32_96 = arith.constant 2 : i32
      %306 = vector.broadcast %c2_i32_96 : i32 to vector<1x256xi32>
      %307 = arith.addi %21, %306 : vector<1x256xi32>
      %c0_i32_97 = arith.constant 0 : i32
      %308 = vector.broadcast %c0_i32_97 : i32 to vector<1x256xi32>
      %309 = arith.cmpi sge, %307, %308 : vector<1x256xi32>
      %310 = arith.andi %195, %309 : vector<1x256xi1>
      %c2_i32_98 = arith.constant 2 : i32
      %311 = vector.broadcast %c2_i32_98 : i32 to vector<1x256xi32>
      %312 = arith.addi %21, %311 : vector<1x256xi32>
      %c16_i32_99 = arith.constant 16 : i32
      %313 = vector.broadcast %c16_i32_99 : i32 to vector<1x256xi32>
      %314 = arith.cmpi slt, %312, %313 : vector<1x256xi32>
      %315 = arith.andi %310, %314 : vector<1x256xi1>
      %c30_i32 = arith.constant 30 : i32
      %316 = tpu.dynamic_rotate %17 by %c30_i32 dim 1 : vector<1x256xf32>, i32 -> vector<1x256xf32>
      %c30_i32_100 = arith.constant 30 : i32
      %317 = tpu.dynamic_rotate %18 by %c30_i32_100 dim 1 : vector<1x256xf32>, i32 -> vector<1x256xf32>
      %c12 = arith.constant 12 : index
      %318 = memref.load %arg2[%c12] : memref<98xf32, #tpu.memory_space<smem>>
      %c61 = arith.constant 61 : index
      %319 = memref.load %arg2[%c61] : memref<98xf32, #tpu.memory_space<smem>>
      %320 = vector.broadcast %318 : f32 to vector<1x256xf32>
      %321 = arith.mulf %320, %316 : vector<1x256xf32>
      %322 = vector.broadcast %319 : f32 to vector<1x256xf32>
      %323 = arith.mulf %322, %317 : vector<1x256xf32>
      %324 = arith.addf %321, %323 : vector<1x256xf32>
      %cst_101 = arith.constant 0.000000e+00 : f32
      %325 = vector.broadcast %cst_101 : f32 to vector<1x256xf32>
      %326 = arith.select %315, %324, %325 : vector<1x256xi1>, vector<1x256xf32>
      %327 = arith.addf %305, %326 : vector<1x256xf32>
      %c3_i32_102 = arith.constant 3 : i32
      %328 = vector.broadcast %c3_i32_102 : i32 to vector<1x256xi32>
      %329 = arith.addi %21, %328 : vector<1x256xi32>
      %c0_i32_103 = arith.constant 0 : i32
      %330 = vector.broadcast %c0_i32_103 : i32 to vector<1x256xi32>
      %331 = arith.cmpi sge, %329, %330 : vector<1x256xi32>
      %332 = arith.andi %195, %331 : vector<1x256xi1>
      %c3_i32_104 = arith.constant 3 : i32
      %333 = vector.broadcast %c3_i32_104 : i32 to vector<1x256xi32>
      %334 = arith.addi %21, %333 : vector<1x256xi32>
      %c16_i32_105 = arith.constant 16 : i32
      %335 = vector.broadcast %c16_i32_105 : i32 to vector<1x256xi32>
      %336 = arith.cmpi slt, %334, %335 : vector<1x256xi32>
      %337 = arith.andi %332, %336 : vector<1x256xi1>
      %c29_i32 = arith.constant 29 : i32
      %338 = tpu.dynamic_rotate %17 by %c29_i32 dim 1 : vector<1x256xf32>, i32 -> vector<1x256xf32>
      %c29_i32_106 = arith.constant 29 : i32
      %339 = tpu.dynamic_rotate %18 by %c29_i32_106 dim 1 : vector<1x256xf32>, i32 -> vector<1x256xf32>
      %c13 = arith.constant 13 : index
      %340 = memref.load %arg2[%c13] : memref<98xf32, #tpu.memory_space<smem>>
      %c62 = arith.constant 62 : index
      %341 = memref.load %arg2[%c62] : memref<98xf32, #tpu.memory_space<smem>>
      %342 = vector.broadcast %340 : f32 to vector<1x256xf32>
      %343 = arith.mulf %342, %338 : vector<1x256xf32>
      %344 = vector.broadcast %341 : f32 to vector<1x256xf32>
      %345 = arith.mulf %344, %339 : vector<1x256xf32>
      %346 = arith.addf %343, %345 : vector<1x256xf32>
      %cst_107 = arith.constant 0.000000e+00 : f32
      %347 = vector.broadcast %cst_107 : f32 to vector<1x256xf32>
      %348 = arith.select %337, %346, %347 : vector<1x256xi1>, vector<1x256xf32>
      %349 = arith.addf %327, %348 : vector<1x256xf32>
      %c-1_i32_108 = arith.constant -1 : i32
      %350 = vector.broadcast %c-1_i32_108 : i32 to vector<1x256xi32>
      %351 = arith.addi %20, %350 : vector<1x256xi32>
      %c0_i32_109 = arith.constant 0 : i32
      %352 = vector.broadcast %c0_i32_109 : i32 to vector<1x256xi32>
      %353 = arith.cmpi sge, %351, %352 : vector<1x256xi32>
      %c-1_i32_110 = arith.constant -1 : i32
      %354 = vector.broadcast %c-1_i32_110 : i32 to vector<1x256xi32>
      %355 = arith.addi %20, %354 : vector<1x256xi32>
      %c16_i32_111 = arith.constant 16 : i32
      %356 = vector.broadcast %c16_i32_111 : i32 to vector<1x256xi32>
      %357 = arith.cmpi slt, %355, %356 : vector<1x256xi32>
      %358 = arith.andi %353, %357 : vector<1x256xi1>
      %c-3_i32_112 = arith.constant -3 : i32
      %359 = vector.broadcast %c-3_i32_112 : i32 to vector<1x256xi32>
      %360 = arith.addi %21, %359 : vector<1x256xi32>
      %c0_i32_113 = arith.constant 0 : i32
      %361 = vector.broadcast %c0_i32_113 : i32 to vector<1x256xi32>
      %362 = arith.cmpi sge, %360, %361 : vector<1x256xi32>
      %363 = arith.andi %358, %362 : vector<1x256xi1>
      %c-3_i32_114 = arith.constant -3 : i32
      %364 = vector.broadcast %c-3_i32_114 : i32 to vector<1x256xi32>
      %365 = arith.addi %21, %364 : vector<1x256xi32>
      %c16_i32_115 = arith.constant 16 : i32
      %366 = vector.broadcast %c16_i32_115 : i32 to vector<1x256xi32>
      %367 = arith.cmpi slt, %365, %366 : vector<1x256xi32>
      %368 = arith.andi %363, %367 : vector<1x256xi1>
      %c19_i32 = arith.constant 19 : i32
      %369 = tpu.dynamic_rotate %17 by %c19_i32 dim 1 : vector<1x256xf32>, i32 -> vector<1x256xf32>
      %c19_i32_116 = arith.constant 19 : i32
      %370 = tpu.dynamic_rotate %18 by %c19_i32_116 dim 1 : vector<1x256xf32>, i32 -> vector<1x256xf32>
      %c14 = arith.constant 14 : index
      %371 = memref.load %arg2[%c14] : memref<98xf32, #tpu.memory_space<smem>>
      %c63 = arith.constant 63 : index
      %372 = memref.load %arg2[%c63] : memref<98xf32, #tpu.memory_space<smem>>
      %373 = vector.broadcast %371 : f32 to vector<1x256xf32>
      %374 = arith.mulf %373, %369 : vector<1x256xf32>
      %375 = vector.broadcast %372 : f32 to vector<1x256xf32>
      %376 = arith.mulf %375, %370 : vector<1x256xf32>
      %377 = arith.addf %374, %376 : vector<1x256xf32>
      %cst_117 = arith.constant 0.000000e+00 : f32
      %378 = vector.broadcast %cst_117 : f32 to vector<1x256xf32>
      %379 = arith.select %368, %377, %378 : vector<1x256xi1>, vector<1x256xf32>
      %380 = arith.addf %349, %379 : vector<1x256xf32>
      %c-2_i32_118 = arith.constant -2 : i32
      %381 = vector.broadcast %c-2_i32_118 : i32 to vector<1x256xi32>
      %382 = arith.addi %21, %381 : vector<1x256xi32>
      %c0_i32_119 = arith.constant 0 : i32
      %383 = vector.broadcast %c0_i32_119 : i32 to vector<1x256xi32>
      %384 = arith.cmpi sge, %382, %383 : vector<1x256xi32>
      %385 = arith.andi %358, %384 : vector<1x256xi1>
      %c-2_i32_120 = arith.constant -2 : i32
      %386 = vector.broadcast %c-2_i32_120 : i32 to vector<1x256xi32>
      %387 = arith.addi %21, %386 : vector<1x256xi32>
      %c16_i32_121 = arith.constant 16 : i32
      %388 = vector.broadcast %c16_i32_121 : i32 to vector<1x256xi32>
      %389 = arith.cmpi slt, %387, %388 : vector<1x256xi32>
      %390 = arith.andi %385, %389 : vector<1x256xi1>
      %c18_i32 = arith.constant 18 : i32
      %391 = tpu.dynamic_rotate %17 by %c18_i32 dim 1 : vector<1x256xf32>, i32 -> vector<1x256xf32>
      %c18_i32_122 = arith.constant 18 : i32
      %392 = tpu.dynamic_rotate %18 by %c18_i32_122 dim 1 : vector<1x256xf32>, i32 -> vector<1x256xf32>
      %c15 = arith.constant 15 : index
      %393 = memref.load %arg2[%c15] : memref<98xf32, #tpu.memory_space<smem>>
      %c64 = arith.constant 64 : index
      %394 = memref.load %arg2[%c64] : memref<98xf32, #tpu.memory_space<smem>>
      %395 = vector.broadcast %393 : f32 to vector<1x256xf32>
      %396 = arith.mulf %395, %391 : vector<1x256xf32>
      %397 = vector.broadcast %394 : f32 to vector<1x256xf32>
      %398 = arith.mulf %397, %392 : vector<1x256xf32>
      %399 = arith.addf %396, %398 : vector<1x256xf32>
      %cst_123 = arith.constant 0.000000e+00 : f32
      %400 = vector.broadcast %cst_123 : f32 to vector<1x256xf32>
      %401 = arith.select %390, %399, %400 : vector<1x256xi1>, vector<1x256xf32>
      %402 = arith.addf %380, %401 : vector<1x256xf32>
      %c-1_i32_124 = arith.constant -1 : i32
      %403 = vector.broadcast %c-1_i32_124 : i32 to vector<1x256xi32>
      %404 = arith.addi %21, %403 : vector<1x256xi32>
      %c0_i32_125 = arith.constant 0 : i32
      %405 = vector.broadcast %c0_i32_125 : i32 to vector<1x256xi32>
      %406 = arith.cmpi sge, %404, %405 : vector<1x256xi32>
      %407 = arith.andi %358, %406 : vector<1x256xi1>
      %c-1_i32_126 = arith.constant -1 : i32
      %408 = vector.broadcast %c-1_i32_126 : i32 to vector<1x256xi32>
      %409 = arith.addi %21, %408 : vector<1x256xi32>
      %c16_i32_127 = arith.constant 16 : i32
      %410 = vector.broadcast %c16_i32_127 : i32 to vector<1x256xi32>
      %411 = arith.cmpi slt, %409, %410 : vector<1x256xi32>
      %412 = arith.andi %407, %411 : vector<1x256xi1>
      %c17_i32 = arith.constant 17 : i32
      %413 = tpu.dynamic_rotate %17 by %c17_i32 dim 1 : vector<1x256xf32>, i32 -> vector<1x256xf32>
      %c17_i32_128 = arith.constant 17 : i32
      %414 = tpu.dynamic_rotate %18 by %c17_i32_128 dim 1 : vector<1x256xf32>, i32 -> vector<1x256xf32>
      %c16 = arith.constant 16 : index
      %415 = memref.load %arg2[%c16] : memref<98xf32, #tpu.memory_space<smem>>
      %c65 = arith.constant 65 : index
      %416 = memref.load %arg2[%c65] : memref<98xf32, #tpu.memory_space<smem>>
      %417 = vector.broadcast %415 : f32 to vector<1x256xf32>
      %418 = arith.mulf %417, %413 : vector<1x256xf32>
      %419 = vector.broadcast %416 : f32 to vector<1x256xf32>
      %420 = arith.mulf %419, %414 : vector<1x256xf32>
      %421 = arith.addf %418, %420 : vector<1x256xf32>
      %cst_129 = arith.constant 0.000000e+00 : f32
      %422 = vector.broadcast %cst_129 : f32 to vector<1x256xf32>
      %423 = arith.select %412, %421, %422 : vector<1x256xi1>, vector<1x256xf32>
      %424 = arith.addf %402, %423 : vector<1x256xf32>
      %c0_i32_130 = arith.constant 0 : i32
      %425 = vector.broadcast %c0_i32_130 : i32 to vector<1x256xi32>
      %426 = arith.addi %21, %425 : vector<1x256xi32>
      %c0_i32_131 = arith.constant 0 : i32
      %427 = vector.broadcast %c0_i32_131 : i32 to vector<1x256xi32>
      %428 = arith.cmpi sge, %426, %427 : vector<1x256xi32>
      %429 = arith.andi %358, %428 : vector<1x256xi1>
      %c0_i32_132 = arith.constant 0 : i32
      %430 = vector.broadcast %c0_i32_132 : i32 to vector<1x256xi32>
      %431 = arith.addi %21, %430 : vector<1x256xi32>
      %c16_i32_133 = arith.constant 16 : i32
      %432 = vector.broadcast %c16_i32_133 : i32 to vector<1x256xi32>
      %433 = arith.cmpi slt, %431, %432 : vector<1x256xi32>
      %434 = arith.andi %429, %433 : vector<1x256xi1>
      %c16_i32_134 = arith.constant 16 : i32
      %435 = tpu.dynamic_rotate %17 by %c16_i32_134 dim 1 : vector<1x256xf32>, i32 -> vector<1x256xf32>
      %c16_i32_135 = arith.constant 16 : i32
      %436 = tpu.dynamic_rotate %18 by %c16_i32_135 dim 1 : vector<1x256xf32>, i32 -> vector<1x256xf32>
      %c17 = arith.constant 17 : index
      %437 = memref.load %arg2[%c17] : memref<98xf32, #tpu.memory_space<smem>>
      %c66 = arith.constant 66 : index
      %438 = memref.load %arg2[%c66] : memref<98xf32, #tpu.memory_space<smem>>
      %439 = vector.broadcast %437 : f32 to vector<1x256xf32>
      %440 = arith.mulf %439, %435 : vector<1x256xf32>
      %441 = vector.broadcast %438 : f32 to vector<1x256xf32>
      %442 = arith.mulf %441, %436 : vector<1x256xf32>
      %443 = arith.addf %440, %442 : vector<1x256xf32>
      %cst_136 = arith.constant 0.000000e+00 : f32
      %444 = vector.broadcast %cst_136 : f32 to vector<1x256xf32>
      %445 = arith.select %434, %443, %444 : vector<1x256xi1>, vector<1x256xf32>
      %446 = arith.addf %424, %445 : vector<1x256xf32>
      %c1_i32_137 = arith.constant 1 : i32
      %447 = vector.broadcast %c1_i32_137 : i32 to vector<1x256xi32>
      %448 = arith.addi %21, %447 : vector<1x256xi32>
      %c0_i32_138 = arith.constant 0 : i32
      %449 = vector.broadcast %c0_i32_138 : i32 to vector<1x256xi32>
      %450 = arith.cmpi sge, %448, %449 : vector<1x256xi32>
      %451 = arith.andi %358, %450 : vector<1x256xi1>
      %c1_i32_139 = arith.constant 1 : i32
      %452 = vector.broadcast %c1_i32_139 : i32 to vector<1x256xi32>
      %453 = arith.addi %21, %452 : vector<1x256xi32>
      %c16_i32_140 = arith.constant 16 : i32
      %454 = vector.broadcast %c16_i32_140 : i32 to vector<1x256xi32>
      %455 = arith.cmpi slt, %453, %454 : vector<1x256xi32>
      %456 = arith.andi %451, %455 : vector<1x256xi1>
      %c15_i32 = arith.constant 15 : i32
      %457 = tpu.dynamic_rotate %17 by %c15_i32 dim 1 : vector<1x256xf32>, i32 -> vector<1x256xf32>
      %c15_i32_141 = arith.constant 15 : i32
      %458 = tpu.dynamic_rotate %18 by %c15_i32_141 dim 1 : vector<1x256xf32>, i32 -> vector<1x256xf32>
      %c18 = arith.constant 18 : index
      %459 = memref.load %arg2[%c18] : memref<98xf32, #tpu.memory_space<smem>>
      %c67 = arith.constant 67 : index
      %460 = memref.load %arg2[%c67] : memref<98xf32, #tpu.memory_space<smem>>
      %461 = vector.broadcast %459 : f32 to vector<1x256xf32>
      %462 = arith.mulf %461, %457 : vector<1x256xf32>
      %463 = vector.broadcast %460 : f32 to vector<1x256xf32>
      %464 = arith.mulf %463, %458 : vector<1x256xf32>
      %465 = arith.addf %462, %464 : vector<1x256xf32>
      %cst_142 = arith.constant 0.000000e+00 : f32
      %466 = vector.broadcast %cst_142 : f32 to vector<1x256xf32>
      %467 = arith.select %456, %465, %466 : vector<1x256xi1>, vector<1x256xf32>
      %468 = arith.addf %446, %467 : vector<1x256xf32>
      %c2_i32_143 = arith.constant 2 : i32
      %469 = vector.broadcast %c2_i32_143 : i32 to vector<1x256xi32>
      %470 = arith.addi %21, %469 : vector<1x256xi32>
      %c0_i32_144 = arith.constant 0 : i32
      %471 = vector.broadcast %c0_i32_144 : i32 to vector<1x256xi32>
      %472 = arith.cmpi sge, %470, %471 : vector<1x256xi32>
      %473 = arith.andi %358, %472 : vector<1x256xi1>
      %c2_i32_145 = arith.constant 2 : i32
      %474 = vector.broadcast %c2_i32_145 : i32 to vector<1x256xi32>
      %475 = arith.addi %21, %474 : vector<1x256xi32>
      %c16_i32_146 = arith.constant 16 : i32
      %476 = vector.broadcast %c16_i32_146 : i32 to vector<1x256xi32>
      %477 = arith.cmpi slt, %475, %476 : vector<1x256xi32>
      %478 = arith.andi %473, %477 : vector<1x256xi1>
      %c14_i32 = arith.constant 14 : i32
      %479 = tpu.dynamic_rotate %17 by %c14_i32 dim 1 : vector<1x256xf32>, i32 -> vector<1x256xf32>
      %c14_i32_147 = arith.constant 14 : i32
      %480 = tpu.dynamic_rotate %18 by %c14_i32_147 dim 1 : vector<1x256xf32>, i32 -> vector<1x256xf32>
      %c19 = arith.constant 19 : index
      %481 = memref.load %arg2[%c19] : memref<98xf32, #tpu.memory_space<smem>>
      %c68 = arith.constant 68 : index
      %482 = memref.load %arg2[%c68] : memref<98xf32, #tpu.memory_space<smem>>
      %483 = vector.broadcast %481 : f32 to vector<1x256xf32>
      %484 = arith.mulf %483, %479 : vector<1x256xf32>
      %485 = vector.broadcast %482 : f32 to vector<1x256xf32>
      %486 = arith.mulf %485, %480 : vector<1x256xf32>
      %487 = arith.addf %484, %486 : vector<1x256xf32>
      %cst_148 = arith.constant 0.000000e+00 : f32
      %488 = vector.broadcast %cst_148 : f32 to vector<1x256xf32>
      %489 = arith.select %478, %487, %488 : vector<1x256xi1>, vector<1x256xf32>
      %490 = arith.addf %468, %489 : vector<1x256xf32>
      %c3_i32_149 = arith.constant 3 : i32
      %491 = vector.broadcast %c3_i32_149 : i32 to vector<1x256xi32>
      %492 = arith.addi %21, %491 : vector<1x256xi32>
      %c0_i32_150 = arith.constant 0 : i32
      %493 = vector.broadcast %c0_i32_150 : i32 to vector<1x256xi32>
      %494 = arith.cmpi sge, %492, %493 : vector<1x256xi32>
      %495 = arith.andi %358, %494 : vector<1x256xi1>
      %c3_i32_151 = arith.constant 3 : i32
      %496 = vector.broadcast %c3_i32_151 : i32 to vector<1x256xi32>
      %497 = arith.addi %21, %496 : vector<1x256xi32>
      %c16_i32_152 = arith.constant 16 : i32
      %498 = vector.broadcast %c16_i32_152 : i32 to vector<1x256xi32>
      %499 = arith.cmpi slt, %497, %498 : vector<1x256xi32>
      %500 = arith.andi %495, %499 : vector<1x256xi1>
      %c13_i32 = arith.constant 13 : i32
      %501 = tpu.dynamic_rotate %17 by %c13_i32 dim 1 : vector<1x256xf32>, i32 -> vector<1x256xf32>
      %c13_i32_153 = arith.constant 13 : i32
      %502 = tpu.dynamic_rotate %18 by %c13_i32_153 dim 1 : vector<1x256xf32>, i32 -> vector<1x256xf32>
      %c20 = arith.constant 20 : index
      %503 = memref.load %arg2[%c20] : memref<98xf32, #tpu.memory_space<smem>>
      %c69 = arith.constant 69 : index
      %504 = memref.load %arg2[%c69] : memref<98xf32, #tpu.memory_space<smem>>
      %505 = vector.broadcast %503 : f32 to vector<1x256xf32>
      %506 = arith.mulf %505, %501 : vector<1x256xf32>
      %507 = vector.broadcast %504 : f32 to vector<1x256xf32>
      %508 = arith.mulf %507, %502 : vector<1x256xf32>
      %509 = arith.addf %506, %508 : vector<1x256xf32>
      %cst_154 = arith.constant 0.000000e+00 : f32
      %510 = vector.broadcast %cst_154 : f32 to vector<1x256xf32>
      %511 = arith.select %500, %509, %510 : vector<1x256xi1>, vector<1x256xf32>
      %512 = arith.addf %490, %511 : vector<1x256xf32>
      %c0_i32_155 = arith.constant 0 : i32
      %513 = vector.broadcast %c0_i32_155 : i32 to vector<1x256xi32>
      %514 = arith.addi %20, %513 : vector<1x256xi32>
      %c0_i32_156 = arith.constant 0 : i32
      %515 = vector.broadcast %c0_i32_156 : i32 to vector<1x256xi32>
      %516 = arith.cmpi sge, %514, %515 : vector<1x256xi32>
      %c0_i32_157 = arith.constant 0 : i32
      %517 = vector.broadcast %c0_i32_157 : i32 to vector<1x256xi32>
      %518 = arith.addi %20, %517 : vector<1x256xi32>
      %c16_i32_158 = arith.constant 16 : i32
      %519 = vector.broadcast %c16_i32_158 : i32 to vector<1x256xi32>
      %520 = arith.cmpi slt, %518, %519 : vector<1x256xi32>
      %521 = arith.andi %516, %520 : vector<1x256xi1>
      %c-3_i32_159 = arith.constant -3 : i32
      %522 = vector.broadcast %c-3_i32_159 : i32 to vector<1x256xi32>
      %523 = arith.addi %21, %522 : vector<1x256xi32>
      %c0_i32_160 = arith.constant 0 : i32
      %524 = vector.broadcast %c0_i32_160 : i32 to vector<1x256xi32>
      %525 = arith.cmpi sge, %523, %524 : vector<1x256xi32>
      %526 = arith.andi %521, %525 : vector<1x256xi1>
      %c-3_i32_161 = arith.constant -3 : i32
      %527 = vector.broadcast %c-3_i32_161 : i32 to vector<1x256xi32>
      %528 = arith.addi %21, %527 : vector<1x256xi32>
      %c16_i32_162 = arith.constant 16 : i32
      %529 = vector.broadcast %c16_i32_162 : i32 to vector<1x256xi32>
      %530 = arith.cmpi slt, %528, %529 : vector<1x256xi32>
      %531 = arith.andi %526, %530 : vector<1x256xi1>
      %c3_i32_163 = arith.constant 3 : i32
      %532 = tpu.dynamic_rotate %17 by %c3_i32_163 dim 1 : vector<1x256xf32>, i32 -> vector<1x256xf32>
      %c3_i32_164 = arith.constant 3 : i32
      %533 = tpu.dynamic_rotate %18 by %c3_i32_164 dim 1 : vector<1x256xf32>, i32 -> vector<1x256xf32>
      %c21 = arith.constant 21 : index
      %534 = memref.load %arg2[%c21] : memref<98xf32, #tpu.memory_space<smem>>
      %c70 = arith.constant 70 : index
      %535 = memref.load %arg2[%c70] : memref<98xf32, #tpu.memory_space<smem>>
      %536 = vector.broadcast %534 : f32 to vector<1x256xf32>
      %537 = arith.mulf %536, %532 : vector<1x256xf32>
      %538 = vector.broadcast %535 : f32 to vector<1x256xf32>
      %539 = arith.mulf %538, %533 : vector<1x256xf32>
      %540 = arith.addf %537, %539 : vector<1x256xf32>
      %cst_165 = arith.constant 0.000000e+00 : f32
      %541 = vector.broadcast %cst_165 : f32 to vector<1x256xf32>
      %542 = arith.select %531, %540, %541 : vector<1x256xi1>, vector<1x256xf32>
      %543 = arith.addf %512, %542 : vector<1x256xf32>
      %c-2_i32_166 = arith.constant -2 : i32
      %544 = vector.broadcast %c-2_i32_166 : i32 to vector<1x256xi32>
      %545 = arith.addi %21, %544 : vector<1x256xi32>
      %c0_i32_167 = arith.constant 0 : i32
      %546 = vector.broadcast %c0_i32_167 : i32 to vector<1x256xi32>
      %547 = arith.cmpi sge, %545, %546 : vector<1x256xi32>
      %548 = arith.andi %521, %547 : vector<1x256xi1>
      %c-2_i32_168 = arith.constant -2 : i32
      %549 = vector.broadcast %c-2_i32_168 : i32 to vector<1x256xi32>
      %550 = arith.addi %21, %549 : vector<1x256xi32>
      %c16_i32_169 = arith.constant 16 : i32
      %551 = vector.broadcast %c16_i32_169 : i32 to vector<1x256xi32>
      %552 = arith.cmpi slt, %550, %551 : vector<1x256xi32>
      %553 = arith.andi %548, %552 : vector<1x256xi1>
      %c2_i32_170 = arith.constant 2 : i32
      %554 = tpu.dynamic_rotate %17 by %c2_i32_170 dim 1 : vector<1x256xf32>, i32 -> vector<1x256xf32>
      %c2_i32_171 = arith.constant 2 : i32
      %555 = tpu.dynamic_rotate %18 by %c2_i32_171 dim 1 : vector<1x256xf32>, i32 -> vector<1x256xf32>
      %c22 = arith.constant 22 : index
      %556 = memref.load %arg2[%c22] : memref<98xf32, #tpu.memory_space<smem>>
      %c71 = arith.constant 71 : index
      %557 = memref.load %arg2[%c71] : memref<98xf32, #tpu.memory_space<smem>>
      %558 = vector.broadcast %556 : f32 to vector<1x256xf32>
      %559 = arith.mulf %558, %554 : vector<1x256xf32>
      %560 = vector.broadcast %557 : f32 to vector<1x256xf32>
      %561 = arith.mulf %560, %555 : vector<1x256xf32>
      %562 = arith.addf %559, %561 : vector<1x256xf32>
      %cst_172 = arith.constant 0.000000e+00 : f32
      %563 = vector.broadcast %cst_172 : f32 to vector<1x256xf32>
      %564 = arith.select %553, %562, %563 : vector<1x256xi1>, vector<1x256xf32>
      %565 = arith.addf %543, %564 : vector<1x256xf32>
      %c-1_i32_173 = arith.constant -1 : i32
      %566 = vector.broadcast %c-1_i32_173 : i32 to vector<1x256xi32>
      %567 = arith.addi %21, %566 : vector<1x256xi32>
      %c0_i32_174 = arith.constant 0 : i32
      %568 = vector.broadcast %c0_i32_174 : i32 to vector<1x256xi32>
      %569 = arith.cmpi sge, %567, %568 : vector<1x256xi32>
      %570 = arith.andi %521, %569 : vector<1x256xi1>
      %c-1_i32_175 = arith.constant -1 : i32
      %571 = vector.broadcast %c-1_i32_175 : i32 to vector<1x256xi32>
      %572 = arith.addi %21, %571 : vector<1x256xi32>
      %c16_i32_176 = arith.constant 16 : i32
      %573 = vector.broadcast %c16_i32_176 : i32 to vector<1x256xi32>
      %574 = arith.cmpi slt, %572, %573 : vector<1x256xi32>
      %575 = arith.andi %570, %574 : vector<1x256xi1>
      %c1_i32_177 = arith.constant 1 : i32
      %576 = tpu.dynamic_rotate %17 by %c1_i32_177 dim 1 : vector<1x256xf32>, i32 -> vector<1x256xf32>
      %c1_i32_178 = arith.constant 1 : i32
      %577 = tpu.dynamic_rotate %18 by %c1_i32_178 dim 1 : vector<1x256xf32>, i32 -> vector<1x256xf32>
      %c23 = arith.constant 23 : index
      %578 = memref.load %arg2[%c23] : memref<98xf32, #tpu.memory_space<smem>>
      %c72 = arith.constant 72 : index
      %579 = memref.load %arg2[%c72] : memref<98xf32, #tpu.memory_space<smem>>
      %580 = vector.broadcast %578 : f32 to vector<1x256xf32>
      %581 = arith.mulf %580, %576 : vector<1x256xf32>
      %582 = vector.broadcast %579 : f32 to vector<1x256xf32>
      %583 = arith.mulf %582, %577 : vector<1x256xf32>
      %584 = arith.addf %581, %583 : vector<1x256xf32>
      %cst_179 = arith.constant 0.000000e+00 : f32
      %585 = vector.broadcast %cst_179 : f32 to vector<1x256xf32>
      %586 = arith.select %575, %584, %585 : vector<1x256xi1>, vector<1x256xf32>
      %587 = arith.addf %565, %586 : vector<1x256xf32>
      %c0_i32_180 = arith.constant 0 : i32
      %588 = vector.broadcast %c0_i32_180 : i32 to vector<1x256xi32>
      %589 = arith.addi %21, %588 : vector<1x256xi32>
      %c0_i32_181 = arith.constant 0 : i32
      %590 = vector.broadcast %c0_i32_181 : i32 to vector<1x256xi32>
      %591 = arith.cmpi sge, %589, %590 : vector<1x256xi32>
      %592 = arith.andi %521, %591 : vector<1x256xi1>
      %c0_i32_182 = arith.constant 0 : i32
      %593 = vector.broadcast %c0_i32_182 : i32 to vector<1x256xi32>
      %594 = arith.addi %21, %593 : vector<1x256xi32>
      %c16_i32_183 = arith.constant 16 : i32
      %595 = vector.broadcast %c16_i32_183 : i32 to vector<1x256xi32>
      %596 = arith.cmpi slt, %594, %595 : vector<1x256xi32>
      %597 = arith.andi %592, %596 : vector<1x256xi1>
      %c24 = arith.constant 24 : index
      %598 = memref.load %arg2[%c24] : memref<98xf32, #tpu.memory_space<smem>>
      %c73 = arith.constant 73 : index
      %599 = memref.load %arg2[%c73] : memref<98xf32, #tpu.memory_space<smem>>
      %600 = vector.broadcast %598 : f32 to vector<1x256xf32>
      %601 = arith.mulf %600, %17 : vector<1x256xf32>
      %602 = vector.broadcast %599 : f32 to vector<1x256xf32>
      %603 = arith.mulf %602, %18 : vector<1x256xf32>
      %604 = arith.addf %601, %603 : vector<1x256xf32>
      %cst_184 = arith.constant 0.000000e+00 : f32
      %605 = vector.broadcast %cst_184 : f32 to vector<1x256xf32>
      %606 = arith.select %597, %604, %605 : vector<1x256xi1>, vector<1x256xf32>
      %607 = arith.addf %587, %606 : vector<1x256xf32>
      %c1_i32_185 = arith.constant 1 : i32
      %608 = vector.broadcast %c1_i32_185 : i32 to vector<1x256xi32>
      %609 = arith.addi %21, %608 : vector<1x256xi32>
      %c0_i32_186 = arith.constant 0 : i32
      %610 = vector.broadcast %c0_i32_186 : i32 to vector<1x256xi32>
      %611 = arith.cmpi sge, %609, %610 : vector<1x256xi32>
      %612 = arith.andi %521, %611 : vector<1x256xi1>
      %c1_i32_187 = arith.constant 1 : i32
      %613 = vector.broadcast %c1_i32_187 : i32 to vector<1x256xi32>
      %614 = arith.addi %21, %613 : vector<1x256xi32>
      %c16_i32_188 = arith.constant 16 : i32
      %615 = vector.broadcast %c16_i32_188 : i32 to vector<1x256xi32>
      %616 = arith.cmpi slt, %614, %615 : vector<1x256xi32>
      %617 = arith.andi %612, %616 : vector<1x256xi1>
      %c255_i32 = arith.constant 255 : i32
      %618 = tpu.dynamic_rotate %17 by %c255_i32 dim 1 : vector<1x256xf32>, i32 -> vector<1x256xf32>
      %c255_i32_189 = arith.constant 255 : i32
      %619 = tpu.dynamic_rotate %18 by %c255_i32_189 dim 1 : vector<1x256xf32>, i32 -> vector<1x256xf32>
      %c25 = arith.constant 25 : index
      %620 = memref.load %arg2[%c25] : memref<98xf32, #tpu.memory_space<smem>>
      %c74 = arith.constant 74 : index
      %621 = memref.load %arg2[%c74] : memref<98xf32, #tpu.memory_space<smem>>
      %622 = vector.broadcast %620 : f32 to vector<1x256xf32>
      %623 = arith.mulf %622, %618 : vector<1x256xf32>
      %624 = vector.broadcast %621 : f32 to vector<1x256xf32>
      %625 = arith.mulf %624, %619 : vector<1x256xf32>
      %626 = arith.addf %623, %625 : vector<1x256xf32>
      %cst_190 = arith.constant 0.000000e+00 : f32
      %627 = vector.broadcast %cst_190 : f32 to vector<1x256xf32>
      %628 = arith.select %617, %626, %627 : vector<1x256xi1>, vector<1x256xf32>
      %629 = arith.addf %607, %628 : vector<1x256xf32>
      %c2_i32_191 = arith.constant 2 : i32
      %630 = vector.broadcast %c2_i32_191 : i32 to vector<1x256xi32>
      %631 = arith.addi %21, %630 : vector<1x256xi32>
      %c0_i32_192 = arith.constant 0 : i32
      %632 = vector.broadcast %c0_i32_192 : i32 to vector<1x256xi32>
      %633 = arith.cmpi sge, %631, %632 : vector<1x256xi32>
      %634 = arith.andi %521, %633 : vector<1x256xi1>
      %c2_i32_193 = arith.constant 2 : i32
      %635 = vector.broadcast %c2_i32_193 : i32 to vector<1x256xi32>
      %636 = arith.addi %21, %635 : vector<1x256xi32>
      %c16_i32_194 = arith.constant 16 : i32
      %637 = vector.broadcast %c16_i32_194 : i32 to vector<1x256xi32>
      %638 = arith.cmpi slt, %636, %637 : vector<1x256xi32>
      %639 = arith.andi %634, %638 : vector<1x256xi1>
      %c254_i32 = arith.constant 254 : i32
      %640 = tpu.dynamic_rotate %17 by %c254_i32 dim 1 : vector<1x256xf32>, i32 -> vector<1x256xf32>
      %c254_i32_195 = arith.constant 254 : i32
      %641 = tpu.dynamic_rotate %18 by %c254_i32_195 dim 1 : vector<1x256xf32>, i32 -> vector<1x256xf32>
      %c26 = arith.constant 26 : index
      %642 = memref.load %arg2[%c26] : memref<98xf32, #tpu.memory_space<smem>>
      %c75 = arith.constant 75 : index
      %643 = memref.load %arg2[%c75] : memref<98xf32, #tpu.memory_space<smem>>
      %644 = vector.broadcast %642 : f32 to vector<1x256xf32>
      %645 = arith.mulf %644, %640 : vector<1x256xf32>
      %646 = vector.broadcast %643 : f32 to vector<1x256xf32>
      %647 = arith.mulf %646, %641 : vector<1x256xf32>
      %648 = arith.addf %645, %647 : vector<1x256xf32>
      %cst_196 = arith.constant 0.000000e+00 : f32
      %649 = vector.broadcast %cst_196 : f32 to vector<1x256xf32>
      %650 = arith.select %639, %648, %649 : vector<1x256xi1>, vector<1x256xf32>
      %651 = arith.addf %629, %650 : vector<1x256xf32>
      %c3_i32_197 = arith.constant 3 : i32
      %652 = vector.broadcast %c3_i32_197 : i32 to vector<1x256xi32>
      %653 = arith.addi %21, %652 : vector<1x256xi32>
      %c0_i32_198 = arith.constant 0 : i32
      %654 = vector.broadcast %c0_i32_198 : i32 to vector<1x256xi32>
      %655 = arith.cmpi sge, %653, %654 : vector<1x256xi32>
      %656 = arith.andi %521, %655 : vector<1x256xi1>
      %c3_i32_199 = arith.constant 3 : i32
      %657 = vector.broadcast %c3_i32_199 : i32 to vector<1x256xi32>
      %658 = arith.addi %21, %657 : vector<1x256xi32>
      %c16_i32_200 = arith.constant 16 : i32
      %659 = vector.broadcast %c16_i32_200 : i32 to vector<1x256xi32>
      %660 = arith.cmpi slt, %658, %659 : vector<1x256xi32>
      %661 = arith.andi %656, %660 : vector<1x256xi1>
      %c253_i32 = arith.constant 253 : i32
      %662 = tpu.dynamic_rotate %17 by %c253_i32 dim 1 : vector<1x256xf32>, i32 -> vector<1x256xf32>
      %c253_i32_201 = arith.constant 253 : i32
      %663 = tpu.dynamic_rotate %18 by %c253_i32_201 dim 1 : vector<1x256xf32>, i32 -> vector<1x256xf32>
      %c27 = arith.constant 27 : index
      %664 = memref.load %arg2[%c27] : memref<98xf32, #tpu.memory_space<smem>>
      %c76 = arith.constant 76 : index
      %665 = memref.load %arg2[%c76] : memref<98xf32, #tpu.memory_space<smem>>
      %666 = vector.broadcast %664 : f32 to vector<1x256xf32>
      %667 = arith.mulf %666, %662 : vector<1x256xf32>
      %668 = vector.broadcast %665 : f32 to vector<1x256xf32>
      %669 = arith.mulf %668, %663 : vector<1x256xf32>
      %670 = arith.addf %667, %669 : vector<1x256xf32>
      %cst_202 = arith.constant 0.000000e+00 : f32
      %671 = vector.broadcast %cst_202 : f32 to vector<1x256xf32>
      %672 = arith.select %661, %670, %671 : vector<1x256xi1>, vector<1x256xf32>
      %673 = arith.addf %651, %672 : vector<1x256xf32>
      %c1_i32_203 = arith.constant 1 : i32
      %674 = vector.broadcast %c1_i32_203 : i32 to vector<1x256xi32>
      %675 = arith.addi %20, %674 : vector<1x256xi32>
      %c0_i32_204 = arith.constant 0 : i32
      %676 = vector.broadcast %c0_i32_204 : i32 to vector<1x256xi32>
      %677 = arith.cmpi sge, %675, %676 : vector<1x256xi32>
      %c1_i32_205 = arith.constant 1 : i32
      %678 = vector.broadcast %c1_i32_205 : i32 to vector<1x256xi32>
      %679 = arith.addi %20, %678 : vector<1x256xi32>
      %c16_i32_206 = arith.constant 16 : i32
      %680 = vector.broadcast %c16_i32_206 : i32 to vector<1x256xi32>
      %681 = arith.cmpi slt, %679, %680 : vector<1x256xi32>
      %682 = arith.andi %677, %681 : vector<1x256xi1>
      %c-3_i32_207 = arith.constant -3 : i32
      %683 = vector.broadcast %c-3_i32_207 : i32 to vector<1x256xi32>
      %684 = arith.addi %21, %683 : vector<1x256xi32>
      %c0_i32_208 = arith.constant 0 : i32
      %685 = vector.broadcast %c0_i32_208 : i32 to vector<1x256xi32>
      %686 = arith.cmpi sge, %684, %685 : vector<1x256xi32>
      %687 = arith.andi %682, %686 : vector<1x256xi1>
      %c-3_i32_209 = arith.constant -3 : i32
      %688 = vector.broadcast %c-3_i32_209 : i32 to vector<1x256xi32>
      %689 = arith.addi %21, %688 : vector<1x256xi32>
      %c16_i32_210 = arith.constant 16 : i32
      %690 = vector.broadcast %c16_i32_210 : i32 to vector<1x256xi32>
      %691 = arith.cmpi slt, %689, %690 : vector<1x256xi32>
      %692 = arith.andi %687, %691 : vector<1x256xi1>
      %c243_i32 = arith.constant 243 : i32
      %693 = tpu.dynamic_rotate %17 by %c243_i32 dim 1 : vector<1x256xf32>, i32 -> vector<1x256xf32>
      %c243_i32_211 = arith.constant 243 : i32
      %694 = tpu.dynamic_rotate %18 by %c243_i32_211 dim 1 : vector<1x256xf32>, i32 -> vector<1x256xf32>
      %c28 = arith.constant 28 : index
      %695 = memref.load %arg2[%c28] : memref<98xf32, #tpu.memory_space<smem>>
      %c77 = arith.constant 77 : index
      %696 = memref.load %arg2[%c77] : memref<98xf32, #tpu.memory_space<smem>>
      %697 = vector.broadcast %695 : f32 to vector<1x256xf32>
      %698 = arith.mulf %697, %693 : vector<1x256xf32>
      %699 = vector.broadcast %696 : f32 to vector<1x256xf32>
      %700 = arith.mulf %699, %694 : vector<1x256xf32>
      %701 = arith.addf %698, %700 : vector<1x256xf32>
      %cst_212 = arith.constant 0.000000e+00 : f32
      %702 = vector.broadcast %cst_212 : f32 to vector<1x256xf32>
      %703 = arith.select %692, %701, %702 : vector<1x256xi1>, vector<1x256xf32>
      %704 = arith.addf %673, %703 : vector<1x256xf32>
      %c-2_i32_213 = arith.constant -2 : i32
      %705 = vector.broadcast %c-2_i32_213 : i32 to vector<1x256xi32>
      %706 = arith.addi %21, %705 : vector<1x256xi32>
      %c0_i32_214 = arith.constant 0 : i32
      %707 = vector.broadcast %c0_i32_214 : i32 to vector<1x256xi32>
      %708 = arith.cmpi sge, %706, %707 : vector<1x256xi32>
      %709 = arith.andi %682, %708 : vector<1x256xi1>
      %c-2_i32_215 = arith.constant -2 : i32
      %710 = vector.broadcast %c-2_i32_215 : i32 to vector<1x256xi32>
      %711 = arith.addi %21, %710 : vector<1x256xi32>
      %c16_i32_216 = arith.constant 16 : i32
      %712 = vector.broadcast %c16_i32_216 : i32 to vector<1x256xi32>
      %713 = arith.cmpi slt, %711, %712 : vector<1x256xi32>
      %714 = arith.andi %709, %713 : vector<1x256xi1>
      %c242_i32 = arith.constant 242 : i32
      %715 = tpu.dynamic_rotate %17 by %c242_i32 dim 1 : vector<1x256xf32>, i32 -> vector<1x256xf32>
      %c242_i32_217 = arith.constant 242 : i32
      %716 = tpu.dynamic_rotate %18 by %c242_i32_217 dim 1 : vector<1x256xf32>, i32 -> vector<1x256xf32>
      %c29 = arith.constant 29 : index
      %717 = memref.load %arg2[%c29] : memref<98xf32, #tpu.memory_space<smem>>
      %c78 = arith.constant 78 : index
      %718 = memref.load %arg2[%c78] : memref<98xf32, #tpu.memory_space<smem>>
      %719 = vector.broadcast %717 : f32 to vector<1x256xf32>
      %720 = arith.mulf %719, %715 : vector<1x256xf32>
      %721 = vector.broadcast %718 : f32 to vector<1x256xf32>
      %722 = arith.mulf %721, %716 : vector<1x256xf32>
      %723 = arith.addf %720, %722 : vector<1x256xf32>
      %cst_218 = arith.constant 0.000000e+00 : f32
      %724 = vector.broadcast %cst_218 : f32 to vector<1x256xf32>
      %725 = arith.select %714, %723, %724 : vector<1x256xi1>, vector<1x256xf32>
      %726 = arith.addf %704, %725 : vector<1x256xf32>
      %c-1_i32_219 = arith.constant -1 : i32
      %727 = vector.broadcast %c-1_i32_219 : i32 to vector<1x256xi32>
      %728 = arith.addi %21, %727 : vector<1x256xi32>
      %c0_i32_220 = arith.constant 0 : i32
      %729 = vector.broadcast %c0_i32_220 : i32 to vector<1x256xi32>
      %730 = arith.cmpi sge, %728, %729 : vector<1x256xi32>
      %731 = arith.andi %682, %730 : vector<1x256xi1>
      %c-1_i32_221 = arith.constant -1 : i32
      %732 = vector.broadcast %c-1_i32_221 : i32 to vector<1x256xi32>
      %733 = arith.addi %21, %732 : vector<1x256xi32>
      %c16_i32_222 = arith.constant 16 : i32
      %734 = vector.broadcast %c16_i32_222 : i32 to vector<1x256xi32>
      %735 = arith.cmpi slt, %733, %734 : vector<1x256xi32>
      %736 = arith.andi %731, %735 : vector<1x256xi1>
      %c241_i32 = arith.constant 241 : i32
      %737 = tpu.dynamic_rotate %17 by %c241_i32 dim 1 : vector<1x256xf32>, i32 -> vector<1x256xf32>
      %c241_i32_223 = arith.constant 241 : i32
      %738 = tpu.dynamic_rotate %18 by %c241_i32_223 dim 1 : vector<1x256xf32>, i32 -> vector<1x256xf32>
      %c30 = arith.constant 30 : index
      %739 = memref.load %arg2[%c30] : memref<98xf32, #tpu.memory_space<smem>>
      %c79 = arith.constant 79 : index
      %740 = memref.load %arg2[%c79] : memref<98xf32, #tpu.memory_space<smem>>
      %741 = vector.broadcast %739 : f32 to vector<1x256xf32>
      %742 = arith.mulf %741, %737 : vector<1x256xf32>
      %743 = vector.broadcast %740 : f32 to vector<1x256xf32>
      %744 = arith.mulf %743, %738 : vector<1x256xf32>
      %745 = arith.addf %742, %744 : vector<1x256xf32>
      %cst_224 = arith.constant 0.000000e+00 : f32
      %746 = vector.broadcast %cst_224 : f32 to vector<1x256xf32>
      %747 = arith.select %736, %745, %746 : vector<1x256xi1>, vector<1x256xf32>
      %748 = arith.addf %726, %747 : vector<1x256xf32>
      %c0_i32_225 = arith.constant 0 : i32
      %749 = vector.broadcast %c0_i32_225 : i32 to vector<1x256xi32>
      %750 = arith.addi %21, %749 : vector<1x256xi32>
      %c0_i32_226 = arith.constant 0 : i32
      %751 = vector.broadcast %c0_i32_226 : i32 to vector<1x256xi32>
      %752 = arith.cmpi sge, %750, %751 : vector<1x256xi32>
      %753 = arith.andi %682, %752 : vector<1x256xi1>
      %c0_i32_227 = arith.constant 0 : i32
      %754 = vector.broadcast %c0_i32_227 : i32 to vector<1x256xi32>
      %755 = arith.addi %21, %754 : vector<1x256xi32>
      %c16_i32_228 = arith.constant 16 : i32
      %756 = vector.broadcast %c16_i32_228 : i32 to vector<1x256xi32>
      %757 = arith.cmpi slt, %755, %756 : vector<1x256xi32>
      %758 = arith.andi %753, %757 : vector<1x256xi1>
      %c240_i32 = arith.constant 240 : i32
      %759 = tpu.dynamic_rotate %17 by %c240_i32 dim 1 : vector<1x256xf32>, i32 -> vector<1x256xf32>
      %c240_i32_229 = arith.constant 240 : i32
      %760 = tpu.dynamic_rotate %18 by %c240_i32_229 dim 1 : vector<1x256xf32>, i32 -> vector<1x256xf32>
      %c31 = arith.constant 31 : index
      %761 = memref.load %arg2[%c31] : memref<98xf32, #tpu.memory_space<smem>>
      %c80 = arith.constant 80 : index
      %762 = memref.load %arg2[%c80] : memref<98xf32, #tpu.memory_space<smem>>
      %763 = vector.broadcast %761 : f32 to vector<1x256xf32>
      %764 = arith.mulf %763, %759 : vector<1x256xf32>
      %765 = vector.broadcast %762 : f32 to vector<1x256xf32>
      %766 = arith.mulf %765, %760 : vector<1x256xf32>
      %767 = arith.addf %764, %766 : vector<1x256xf32>
      %cst_230 = arith.constant 0.000000e+00 : f32
      %768 = vector.broadcast %cst_230 : f32 to vector<1x256xf32>
      %769 = arith.select %758, %767, %768 : vector<1x256xi1>, vector<1x256xf32>
      %770 = arith.addf %748, %769 : vector<1x256xf32>
      %c1_i32_231 = arith.constant 1 : i32
      %771 = vector.broadcast %c1_i32_231 : i32 to vector<1x256xi32>
      %772 = arith.addi %21, %771 : vector<1x256xi32>
      %c0_i32_232 = arith.constant 0 : i32
      %773 = vector.broadcast %c0_i32_232 : i32 to vector<1x256xi32>
      %774 = arith.cmpi sge, %772, %773 : vector<1x256xi32>
      %775 = arith.andi %682, %774 : vector<1x256xi1>
      %c1_i32_233 = arith.constant 1 : i32
      %776 = vector.broadcast %c1_i32_233 : i32 to vector<1x256xi32>
      %777 = arith.addi %21, %776 : vector<1x256xi32>
      %c16_i32_234 = arith.constant 16 : i32
      %778 = vector.broadcast %c16_i32_234 : i32 to vector<1x256xi32>
      %779 = arith.cmpi slt, %777, %778 : vector<1x256xi32>
      %780 = arith.andi %775, %779 : vector<1x256xi1>
      %c239_i32 = arith.constant 239 : i32
      %781 = tpu.dynamic_rotate %17 by %c239_i32 dim 1 : vector<1x256xf32>, i32 -> vector<1x256xf32>
      %c239_i32_235 = arith.constant 239 : i32
      %782 = tpu.dynamic_rotate %18 by %c239_i32_235 dim 1 : vector<1x256xf32>, i32 -> vector<1x256xf32>
      %c32 = arith.constant 32 : index
      %783 = memref.load %arg2[%c32] : memref<98xf32, #tpu.memory_space<smem>>
      %c81 = arith.constant 81 : index
      %784 = memref.load %arg2[%c81] : memref<98xf32, #tpu.memory_space<smem>>
      %785 = vector.broadcast %783 : f32 to vector<1x256xf32>
      %786 = arith.mulf %785, %781 : vector<1x256xf32>
      %787 = vector.broadcast %784 : f32 to vector<1x256xf32>
      %788 = arith.mulf %787, %782 : vector<1x256xf32>
      %789 = arith.addf %786, %788 : vector<1x256xf32>
      %cst_236 = arith.constant 0.000000e+00 : f32
      %790 = vector.broadcast %cst_236 : f32 to vector<1x256xf32>
      %791 = arith.select %780, %789, %790 : vector<1x256xi1>, vector<1x256xf32>
      %792 = arith.addf %770, %791 : vector<1x256xf32>
      %c2_i32_237 = arith.constant 2 : i32
      %793 = vector.broadcast %c2_i32_237 : i32 to vector<1x256xi32>
      %794 = arith.addi %21, %793 : vector<1x256xi32>
      %c0_i32_238 = arith.constant 0 : i32
      %795 = vector.broadcast %c0_i32_238 : i32 to vector<1x256xi32>
      %796 = arith.cmpi sge, %794, %795 : vector<1x256xi32>
      %797 = arith.andi %682, %796 : vector<1x256xi1>
      %c2_i32_239 = arith.constant 2 : i32
      %798 = vector.broadcast %c2_i32_239 : i32 to vector<1x256xi32>
      %799 = arith.addi %21, %798 : vector<1x256xi32>
      %c16_i32_240 = arith.constant 16 : i32
      %800 = vector.broadcast %c16_i32_240 : i32 to vector<1x256xi32>
      %801 = arith.cmpi slt, %799, %800 : vector<1x256xi32>
      %802 = arith.andi %797, %801 : vector<1x256xi1>
      %c238_i32 = arith.constant 238 : i32
      %803 = tpu.dynamic_rotate %17 by %c238_i32 dim 1 : vector<1x256xf32>, i32 -> vector<1x256xf32>
      %c238_i32_241 = arith.constant 238 : i32
      %804 = tpu.dynamic_rotate %18 by %c238_i32_241 dim 1 : vector<1x256xf32>, i32 -> vector<1x256xf32>
      %c33 = arith.constant 33 : index
      %805 = memref.load %arg2[%c33] : memref<98xf32, #tpu.memory_space<smem>>
      %c82 = arith.constant 82 : index
      %806 = memref.load %arg2[%c82] : memref<98xf32, #tpu.memory_space<smem>>
      %807 = vector.broadcast %805 : f32 to vector<1x256xf32>
      %808 = arith.mulf %807, %803 : vector<1x256xf32>
      %809 = vector.broadcast %806 : f32 to vector<1x256xf32>
      %810 = arith.mulf %809, %804 : vector<1x256xf32>
      %811 = arith.addf %808, %810 : vector<1x256xf32>
      %cst_242 = arith.constant 0.000000e+00 : f32
      %812 = vector.broadcast %cst_242 : f32 to vector<1x256xf32>
      %813 = arith.select %802, %811, %812 : vector<1x256xi1>, vector<1x256xf32>
      %814 = arith.addf %792, %813 : vector<1x256xf32>
      %c3_i32_243 = arith.constant 3 : i32
      %815 = vector.broadcast %c3_i32_243 : i32 to vector<1x256xi32>
      %816 = arith.addi %21, %815 : vector<1x256xi32>
      %c0_i32_244 = arith.constant 0 : i32
      %817 = vector.broadcast %c0_i32_244 : i32 to vector<1x256xi32>
      %818 = arith.cmpi sge, %816, %817 : vector<1x256xi32>
      %819 = arith.andi %682, %818 : vector<1x256xi1>
      %c3_i32_245 = arith.constant 3 : i32
      %820 = vector.broadcast %c3_i32_245 : i32 to vector<1x256xi32>
      %821 = arith.addi %21, %820 : vector<1x256xi32>
      %c16_i32_246 = arith.constant 16 : i32
      %822 = vector.broadcast %c16_i32_246 : i32 to vector<1x256xi32>
      %823 = arith.cmpi slt, %821, %822 : vector<1x256xi32>
      %824 = arith.andi %819, %823 : vector<1x256xi1>
      %c237_i32 = arith.constant 237 : i32
      %825 = tpu.dynamic_rotate %17 by %c237_i32 dim 1 : vector<1x256xf32>, i32 -> vector<1x256xf32>
      %c237_i32_247 = arith.constant 237 : i32
      %826 = tpu.dynamic_rotate %18 by %c237_i32_247 dim 1 : vector<1x256xf32>, i32 -> vector<1x256xf32>
      %c34 = arith.constant 34 : index
      %827 = memref.load %arg2[%c34] : memref<98xf32, #tpu.memory_space<smem>>
      %c83 = arith.constant 83 : index
      %828 = memref.load %arg2[%c83] : memref<98xf32, #tpu.memory_space<smem>>
      %829 = vector.broadcast %827 : f32 to vector<1x256xf32>
      %830 = arith.mulf %829, %825 : vector<1x256xf32>
      %831 = vector.broadcast %828 : f32 to vector<1x256xf32>
      %832 = arith.mulf %831, %826 : vector<1x256xf32>
      %833 = arith.addf %830, %832 : vector<1x256xf32>
      %cst_248 = arith.constant 0.000000e+00 : f32
      %834 = vector.broadcast %cst_248 : f32 to vector<1x256xf32>
      %835 = arith.select %824, %833, %834 : vector<1x256xi1>, vector<1x256xf32>
      %836 = arith.addf %814, %835 : vector<1x256xf32>
      %c2_i32_249 = arith.constant 2 : i32
      %837 = vector.broadcast %c2_i32_249 : i32 to vector<1x256xi32>
      %838 = arith.addi %20, %837 : vector<1x256xi32>
      %c0_i32_250 = arith.constant 0 : i32
      %839 = vector.broadcast %c0_i32_250 : i32 to vector<1x256xi32>
      %840 = arith.cmpi sge, %838, %839 : vector<1x256xi32>
      %c2_i32_251 = arith.constant 2 : i32
      %841 = vector.broadcast %c2_i32_251 : i32 to vector<1x256xi32>
      %842 = arith.addi %20, %841 : vector<1x256xi32>
      %c16_i32_252 = arith.constant 16 : i32
      %843 = vector.broadcast %c16_i32_252 : i32 to vector<1x256xi32>
      %844 = arith.cmpi slt, %842, %843 : vector<1x256xi32>
      %845 = arith.andi %840, %844 : vector<1x256xi1>
      %c-3_i32_253 = arith.constant -3 : i32
      %846 = vector.broadcast %c-3_i32_253 : i32 to vector<1x256xi32>
      %847 = arith.addi %21, %846 : vector<1x256xi32>
      %c0_i32_254 = arith.constant 0 : i32
      %848 = vector.broadcast %c0_i32_254 : i32 to vector<1x256xi32>
      %849 = arith.cmpi sge, %847, %848 : vector<1x256xi32>
      %850 = arith.andi %845, %849 : vector<1x256xi1>
      %c-3_i32_255 = arith.constant -3 : i32
      %851 = vector.broadcast %c-3_i32_255 : i32 to vector<1x256xi32>
      %852 = arith.addi %21, %851 : vector<1x256xi32>
      %c16_i32_256 = arith.constant 16 : i32
      %853 = vector.broadcast %c16_i32_256 : i32 to vector<1x256xi32>
      %854 = arith.cmpi slt, %852, %853 : vector<1x256xi32>
      %855 = arith.andi %850, %854 : vector<1x256xi1>
      %c227_i32 = arith.constant 227 : i32
      %856 = tpu.dynamic_rotate %17 by %c227_i32 dim 1 : vector<1x256xf32>, i32 -> vector<1x256xf32>
      %c227_i32_257 = arith.constant 227 : i32
      %857 = tpu.dynamic_rotate %18 by %c227_i32_257 dim 1 : vector<1x256xf32>, i32 -> vector<1x256xf32>
      %c35 = arith.constant 35 : index
      %858 = memref.load %arg2[%c35] : memref<98xf32, #tpu.memory_space<smem>>
      %c84 = arith.constant 84 : index
      %859 = memref.load %arg2[%c84] : memref<98xf32, #tpu.memory_space<smem>>
      %860 = vector.broadcast %858 : f32 to vector<1x256xf32>
      %861 = arith.mulf %860, %856 : vector<1x256xf32>
      %862 = vector.broadcast %859 : f32 to vector<1x256xf32>
      %863 = arith.mulf %862, %857 : vector<1x256xf32>
      %864 = arith.addf %861, %863 : vector<1x256xf32>
      %cst_258 = arith.constant 0.000000e+00 : f32
      %865 = vector.broadcast %cst_258 : f32 to vector<1x256xf32>
      %866 = arith.select %855, %864, %865 : vector<1x256xi1>, vector<1x256xf32>
      %867 = arith.addf %836, %866 : vector<1x256xf32>
      %c-2_i32_259 = arith.constant -2 : i32
      %868 = vector.broadcast %c-2_i32_259 : i32 to vector<1x256xi32>
      %869 = arith.addi %21, %868 : vector<1x256xi32>
      %c0_i32_260 = arith.constant 0 : i32
      %870 = vector.broadcast %c0_i32_260 : i32 to vector<1x256xi32>
      %871 = arith.cmpi sge, %869, %870 : vector<1x256xi32>
      %872 = arith.andi %845, %871 : vector<1x256xi1>
      %c-2_i32_261 = arith.constant -2 : i32
      %873 = vector.broadcast %c-2_i32_261 : i32 to vector<1x256xi32>
      %874 = arith.addi %21, %873 : vector<1x256xi32>
      %c16_i32_262 = arith.constant 16 : i32
      %875 = vector.broadcast %c16_i32_262 : i32 to vector<1x256xi32>
      %876 = arith.cmpi slt, %874, %875 : vector<1x256xi32>
      %877 = arith.andi %872, %876 : vector<1x256xi1>
      %c226_i32 = arith.constant 226 : i32
      %878 = tpu.dynamic_rotate %17 by %c226_i32 dim 1 : vector<1x256xf32>, i32 -> vector<1x256xf32>
      %c226_i32_263 = arith.constant 226 : i32
      %879 = tpu.dynamic_rotate %18 by %c226_i32_263 dim 1 : vector<1x256xf32>, i32 -> vector<1x256xf32>
      %c36 = arith.constant 36 : index
      %880 = memref.load %arg2[%c36] : memref<98xf32, #tpu.memory_space<smem>>
      %c85 = arith.constant 85 : index
      %881 = memref.load %arg2[%c85] : memref<98xf32, #tpu.memory_space<smem>>
      %882 = vector.broadcast %880 : f32 to vector<1x256xf32>
      %883 = arith.mulf %882, %878 : vector<1x256xf32>
      %884 = vector.broadcast %881 : f32 to vector<1x256xf32>
      %885 = arith.mulf %884, %879 : vector<1x256xf32>
      %886 = arith.addf %883, %885 : vector<1x256xf32>
      %cst_264 = arith.constant 0.000000e+00 : f32
      %887 = vector.broadcast %cst_264 : f32 to vector<1x256xf32>
      %888 = arith.select %877, %886, %887 : vector<1x256xi1>, vector<1x256xf32>
      %889 = arith.addf %867, %888 : vector<1x256xf32>
      %c-1_i32_265 = arith.constant -1 : i32
      %890 = vector.broadcast %c-1_i32_265 : i32 to vector<1x256xi32>
      %891 = arith.addi %21, %890 : vector<1x256xi32>
      %c0_i32_266 = arith.constant 0 : i32
      %892 = vector.broadcast %c0_i32_266 : i32 to vector<1x256xi32>
      %893 = arith.cmpi sge, %891, %892 : vector<1x256xi32>
      %894 = arith.andi %845, %893 : vector<1x256xi1>
      %c-1_i32_267 = arith.constant -1 : i32
      %895 = vector.broadcast %c-1_i32_267 : i32 to vector<1x256xi32>
      %896 = arith.addi %21, %895 : vector<1x256xi32>
      %c16_i32_268 = arith.constant 16 : i32
      %897 = vector.broadcast %c16_i32_268 : i32 to vector<1x256xi32>
      %898 = arith.cmpi slt, %896, %897 : vector<1x256xi32>
      %899 = arith.andi %894, %898 : vector<1x256xi1>
      %c225_i32 = arith.constant 225 : i32
      %900 = tpu.dynamic_rotate %17 by %c225_i32 dim 1 : vector<1x256xf32>, i32 -> vector<1x256xf32>
      %c225_i32_269 = arith.constant 225 : i32
      %901 = tpu.dynamic_rotate %18 by %c225_i32_269 dim 1 : vector<1x256xf32>, i32 -> vector<1x256xf32>
      %c37 = arith.constant 37 : index
      %902 = memref.load %arg2[%c37] : memref<98xf32, #tpu.memory_space<smem>>
      %c86 = arith.constant 86 : index
      %903 = memref.load %arg2[%c86] : memref<98xf32, #tpu.memory_space<smem>>
      %904 = vector.broadcast %902 : f32 to vector<1x256xf32>
      %905 = arith.mulf %904, %900 : vector<1x256xf32>
      %906 = vector.broadcast %903 : f32 to vector<1x256xf32>
      %907 = arith.mulf %906, %901 : vector<1x256xf32>
      %908 = arith.addf %905, %907 : vector<1x256xf32>
      %cst_270 = arith.constant 0.000000e+00 : f32
      %909 = vector.broadcast %cst_270 : f32 to vector<1x256xf32>
      %910 = arith.select %899, %908, %909 : vector<1x256xi1>, vector<1x256xf32>
      %911 = arith.addf %889, %910 : vector<1x256xf32>
      %c0_i32_271 = arith.constant 0 : i32
      %912 = vector.broadcast %c0_i32_271 : i32 to vector<1x256xi32>
      %913 = arith.addi %21, %912 : vector<1x256xi32>
      %c0_i32_272 = arith.constant 0 : i32
      %914 = vector.broadcast %c0_i32_272 : i32 to vector<1x256xi32>
      %915 = arith.cmpi sge, %913, %914 : vector<1x256xi32>
      %916 = arith.andi %845, %915 : vector<1x256xi1>
      %c0_i32_273 = arith.constant 0 : i32
      %917 = vector.broadcast %c0_i32_273 : i32 to vector<1x256xi32>
      %918 = arith.addi %21, %917 : vector<1x256xi32>
      %c16_i32_274 = arith.constant 16 : i32
      %919 = vector.broadcast %c16_i32_274 : i32 to vector<1x256xi32>
      %920 = arith.cmpi slt, %918, %919 : vector<1x256xi32>
      %921 = arith.andi %916, %920 : vector<1x256xi1>
      %c224_i32 = arith.constant 224 : i32
      %922 = tpu.dynamic_rotate %17 by %c224_i32 dim 1 : vector<1x256xf32>, i32 -> vector<1x256xf32>
      %c224_i32_275 = arith.constant 224 : i32
      %923 = tpu.dynamic_rotate %18 by %c224_i32_275 dim 1 : vector<1x256xf32>, i32 -> vector<1x256xf32>
      %c38 = arith.constant 38 : index
      %924 = memref.load %arg2[%c38] : memref<98xf32, #tpu.memory_space<smem>>
      %c87 = arith.constant 87 : index
      %925 = memref.load %arg2[%c87] : memref<98xf32, #tpu.memory_space<smem>>
      %926 = vector.broadcast %924 : f32 to vector<1x256xf32>
      %927 = arith.mulf %926, %922 : vector<1x256xf32>
      %928 = vector.broadcast %925 : f32 to vector<1x256xf32>
      %929 = arith.mulf %928, %923 : vector<1x256xf32>
      %930 = arith.addf %927, %929 : vector<1x256xf32>
      %cst_276 = arith.constant 0.000000e+00 : f32
      %931 = vector.broadcast %cst_276 : f32 to vector<1x256xf32>
      %932 = arith.select %921, %930, %931 : vector<1x256xi1>, vector<1x256xf32>
      %933 = arith.addf %911, %932 : vector<1x256xf32>
      %c1_i32_277 = arith.constant 1 : i32
      %934 = vector.broadcast %c1_i32_277 : i32 to vector<1x256xi32>
      %935 = arith.addi %21, %934 : vector<1x256xi32>
      %c0_i32_278 = arith.constant 0 : i32
      %936 = vector.broadcast %c0_i32_278 : i32 to vector<1x256xi32>
      %937 = arith.cmpi sge, %935, %936 : vector<1x256xi32>
      %938 = arith.andi %845, %937 : vector<1x256xi1>
      %c1_i32_279 = arith.constant 1 : i32
      %939 = vector.broadcast %c1_i32_279 : i32 to vector<1x256xi32>
      %940 = arith.addi %21, %939 : vector<1x256xi32>
      %c16_i32_280 = arith.constant 16 : i32
      %941 = vector.broadcast %c16_i32_280 : i32 to vector<1x256xi32>
      %942 = arith.cmpi slt, %940, %941 : vector<1x256xi32>
      %943 = arith.andi %938, %942 : vector<1x256xi1>
      %c223_i32 = arith.constant 223 : i32
      %944 = tpu.dynamic_rotate %17 by %c223_i32 dim 1 : vector<1x256xf32>, i32 -> vector<1x256xf32>
      %c223_i32_281 = arith.constant 223 : i32
      %945 = tpu.dynamic_rotate %18 by %c223_i32_281 dim 1 : vector<1x256xf32>, i32 -> vector<1x256xf32>
      %c39 = arith.constant 39 : index
      %946 = memref.load %arg2[%c39] : memref<98xf32, #tpu.memory_space<smem>>
      %c88 = arith.constant 88 : index
      %947 = memref.load %arg2[%c88] : memref<98xf32, #tpu.memory_space<smem>>
      %948 = vector.broadcast %946 : f32 to vector<1x256xf32>
      %949 = arith.mulf %948, %944 : vector<1x256xf32>
      %950 = vector.broadcast %947 : f32 to vector<1x256xf32>
      %951 = arith.mulf %950, %945 : vector<1x256xf32>
      %952 = arith.addf %949, %951 : vector<1x256xf32>
      %cst_282 = arith.constant 0.000000e+00 : f32
      %953 = vector.broadcast %cst_282 : f32 to vector<1x256xf32>
      %954 = arith.select %943, %952, %953 : vector<1x256xi1>, vector<1x256xf32>
      %955 = arith.addf %933, %954 : vector<1x256xf32>
      %c2_i32_283 = arith.constant 2 : i32
      %956 = vector.broadcast %c2_i32_283 : i32 to vector<1x256xi32>
      %957 = arith.addi %21, %956 : vector<1x256xi32>
      %c0_i32_284 = arith.constant 0 : i32
      %958 = vector.broadcast %c0_i32_284 : i32 to vector<1x256xi32>
      %959 = arith.cmpi sge, %957, %958 : vector<1x256xi32>
      %960 = arith.andi %845, %959 : vector<1x256xi1>
      %c2_i32_285 = arith.constant 2 : i32
      %961 = vector.broadcast %c2_i32_285 : i32 to vector<1x256xi32>
      %962 = arith.addi %21, %961 : vector<1x256xi32>
      %c16_i32_286 = arith.constant 16 : i32
      %963 = vector.broadcast %c16_i32_286 : i32 to vector<1x256xi32>
      %964 = arith.cmpi slt, %962, %963 : vector<1x256xi32>
      %965 = arith.andi %960, %964 : vector<1x256xi1>
      %c222_i32 = arith.constant 222 : i32
      %966 = tpu.dynamic_rotate %17 by %c222_i32 dim 1 : vector<1x256xf32>, i32 -> vector<1x256xf32>
      %c222_i32_287 = arith.constant 222 : i32
      %967 = tpu.dynamic_rotate %18 by %c222_i32_287 dim 1 : vector<1x256xf32>, i32 -> vector<1x256xf32>
      %c40 = arith.constant 40 : index
      %968 = memref.load %arg2[%c40] : memref<98xf32, #tpu.memory_space<smem>>
      %c89 = arith.constant 89 : index
      %969 = memref.load %arg2[%c89] : memref<98xf32, #tpu.memory_space<smem>>
      %970 = vector.broadcast %968 : f32 to vector<1x256xf32>
      %971 = arith.mulf %970, %966 : vector<1x256xf32>
      %972 = vector.broadcast %969 : f32 to vector<1x256xf32>
      %973 = arith.mulf %972, %967 : vector<1x256xf32>
      %974 = arith.addf %971, %973 : vector<1x256xf32>
      %cst_288 = arith.constant 0.000000e+00 : f32
      %975 = vector.broadcast %cst_288 : f32 to vector<1x256xf32>
      %976 = arith.select %965, %974, %975 : vector<1x256xi1>, vector<1x256xf32>
      %977 = arith.addf %955, %976 : vector<1x256xf32>
      %c3_i32_289 = arith.constant 3 : i32
      %978 = vector.broadcast %c3_i32_289 : i32 to vector<1x256xi32>
      %979 = arith.addi %21, %978 : vector<1x256xi32>
      %c0_i32_290 = arith.constant 0 : i32
      %980 = vector.broadcast %c0_i32_290 : i32 to vector<1x256xi32>
      %981 = arith.cmpi sge, %979, %980 : vector<1x256xi32>
      %982 = arith.andi %845, %981 : vector<1x256xi1>
      %c3_i32_291 = arith.constant 3 : i32
      %983 = vector.broadcast %c3_i32_291 : i32 to vector<1x256xi32>
      %984 = arith.addi %21, %983 : vector<1x256xi32>
      %c16_i32_292 = arith.constant 16 : i32
      %985 = vector.broadcast %c16_i32_292 : i32 to vector<1x256xi32>
      %986 = arith.cmpi slt, %984, %985 : vector<1x256xi32>
      %987 = arith.andi %982, %986 : vector<1x256xi1>
      %c221_i32 = arith.constant 221 : i32
      %988 = tpu.dynamic_rotate %17 by %c221_i32 dim 1 : vector<1x256xf32>, i32 -> vector<1x256xf32>
      %c221_i32_293 = arith.constant 221 : i32
      %989 = tpu.dynamic_rotate %18 by %c221_i32_293 dim 1 : vector<1x256xf32>, i32 -> vector<1x256xf32>
      %c41 = arith.constant 41 : index
      %990 = memref.load %arg2[%c41] : memref<98xf32, #tpu.memory_space<smem>>
      %c90 = arith.constant 90 : index
      %991 = memref.load %arg2[%c90] : memref<98xf32, #tpu.memory_space<smem>>
      %992 = vector.broadcast %990 : f32 to vector<1x256xf32>
      %993 = arith.mulf %992, %988 : vector<1x256xf32>
      %994 = vector.broadcast %991 : f32 to vector<1x256xf32>
      %995 = arith.mulf %994, %989 : vector<1x256xf32>
      %996 = arith.addf %993, %995 : vector<1x256xf32>
      %cst_294 = arith.constant 0.000000e+00 : f32
      %997 = vector.broadcast %cst_294 : f32 to vector<1x256xf32>
      %998 = arith.select %987, %996, %997 : vector<1x256xi1>, vector<1x256xf32>
      %999 = arith.addf %977, %998 : vector<1x256xf32>
      %c3_i32_295 = arith.constant 3 : i32
      %1000 = vector.broadcast %c3_i32_295 : i32 to vector<1x256xi32>
      %1001 = arith.addi %20, %1000 : vector<1x256xi32>
      %c0_i32_296 = arith.constant 0 : i32
      %1002 = vector.broadcast %c0_i32_296 : i32 to vector<1x256xi32>
      %1003 = arith.cmpi sge, %1001, %1002 : vector<1x256xi32>
      %c3_i32_297 = arith.constant 3 : i32
      %1004 = vector.broadcast %c3_i32_297 : i32 to vector<1x256xi32>
      %1005 = arith.addi %20, %1004 : vector<1x256xi32>
      %c16_i32_298 = arith.constant 16 : i32
      %1006 = vector.broadcast %c16_i32_298 : i32 to vector<1x256xi32>
      %1007 = arith.cmpi slt, %1005, %1006 : vector<1x256xi32>
      %1008 = arith.andi %1003, %1007 : vector<1x256xi1>
      %c-3_i32_299 = arith.constant -3 : i32
      %1009 = vector.broadcast %c-3_i32_299 : i32 to vector<1x256xi32>
      %1010 = arith.addi %21, %1009 : vector<1x256xi32>
      %c0_i32_300 = arith.constant 0 : i32
      %1011 = vector.broadcast %c0_i32_300 : i32 to vector<1x256xi32>
      %1012 = arith.cmpi sge, %1010, %1011 : vector<1x256xi32>
      %1013 = arith.andi %1008, %1012 : vector<1x256xi1>
      %c-3_i32_301 = arith.constant -3 : i32
      %1014 = vector.broadcast %c-3_i32_301 : i32 to vector<1x256xi32>
      %1015 = arith.addi %21, %1014 : vector<1x256xi32>
      %c16_i32_302 = arith.constant 16 : i32
      %1016 = vector.broadcast %c16_i32_302 : i32 to vector<1x256xi32>
      %1017 = arith.cmpi slt, %1015, %1016 : vector<1x256xi32>
      %1018 = arith.andi %1013, %1017 : vector<1x256xi1>
      %c211_i32 = arith.constant 211 : i32
      %1019 = tpu.dynamic_rotate %17 by %c211_i32 dim 1 : vector<1x256xf32>, i32 -> vector<1x256xf32>
      %c211_i32_303 = arith.constant 211 : i32
      %1020 = tpu.dynamic_rotate %18 by %c211_i32_303 dim 1 : vector<1x256xf32>, i32 -> vector<1x256xf32>
      %c42 = arith.constant 42 : index
      %1021 = memref.load %arg2[%c42] : memref<98xf32, #tpu.memory_space<smem>>
      %c91 = arith.constant 91 : index
      %1022 = memref.load %arg2[%c91] : memref<98xf32, #tpu.memory_space<smem>>
      %1023 = vector.broadcast %1021 : f32 to vector<1x256xf32>
      %1024 = arith.mulf %1023, %1019 : vector<1x256xf32>
      %1025 = vector.broadcast %1022 : f32 to vector<1x256xf32>
      %1026 = arith.mulf %1025, %1020 : vector<1x256xf32>
      %1027 = arith.addf %1024, %1026 : vector<1x256xf32>
      %cst_304 = arith.constant 0.000000e+00 : f32
      %1028 = vector.broadcast %cst_304 : f32 to vector<1x256xf32>
      %1029 = arith.select %1018, %1027, %1028 : vector<1x256xi1>, vector<1x256xf32>
      %1030 = arith.addf %999, %1029 : vector<1x256xf32>
      %c-2_i32_305 = arith.constant -2 : i32
      %1031 = vector.broadcast %c-2_i32_305 : i32 to vector<1x256xi32>
      %1032 = arith.addi %21, %1031 : vector<1x256xi32>
      %c0_i32_306 = arith.constant 0 : i32
      %1033 = vector.broadcast %c0_i32_306 : i32 to vector<1x256xi32>
      %1034 = arith.cmpi sge, %1032, %1033 : vector<1x256xi32>
      %1035 = arith.andi %1008, %1034 : vector<1x256xi1>
      %c-2_i32_307 = arith.constant -2 : i32
      %1036 = vector.broadcast %c-2_i32_307 : i32 to vector<1x256xi32>
      %1037 = arith.addi %21, %1036 : vector<1x256xi32>
      %c16_i32_308 = arith.constant 16 : i32
      %1038 = vector.broadcast %c16_i32_308 : i32 to vector<1x256xi32>
      %1039 = arith.cmpi slt, %1037, %1038 : vector<1x256xi32>
      %1040 = arith.andi %1035, %1039 : vector<1x256xi1>
      %c210_i32 = arith.constant 210 : i32
      %1041 = tpu.dynamic_rotate %17 by %c210_i32 dim 1 : vector<1x256xf32>, i32 -> vector<1x256xf32>
      %c210_i32_309 = arith.constant 210 : i32
      %1042 = tpu.dynamic_rotate %18 by %c210_i32_309 dim 1 : vector<1x256xf32>, i32 -> vector<1x256xf32>
      %c43 = arith.constant 43 : index
      %1043 = memref.load %arg2[%c43] : memref<98xf32, #tpu.memory_space<smem>>
      %c92 = arith.constant 92 : index
      %1044 = memref.load %arg2[%c92] : memref<98xf32, #tpu.memory_space<smem>>
      %1045 = vector.broadcast %1043 : f32 to vector<1x256xf32>
      %1046 = arith.mulf %1045, %1041 : vector<1x256xf32>
      %1047 = vector.broadcast %1044 : f32 to vector<1x256xf32>
      %1048 = arith.mulf %1047, %1042 : vector<1x256xf32>
      %1049 = arith.addf %1046, %1048 : vector<1x256xf32>
      %cst_310 = arith.constant 0.000000e+00 : f32
      %1050 = vector.broadcast %cst_310 : f32 to vector<1x256xf32>
      %1051 = arith.select %1040, %1049, %1050 : vector<1x256xi1>, vector<1x256xf32>
      %1052 = arith.addf %1030, %1051 : vector<1x256xf32>
      %c-1_i32_311 = arith.constant -1 : i32
      %1053 = vector.broadcast %c-1_i32_311 : i32 to vector<1x256xi32>
      %1054 = arith.addi %21, %1053 : vector<1x256xi32>
      %c0_i32_312 = arith.constant 0 : i32
      %1055 = vector.broadcast %c0_i32_312 : i32 to vector<1x256xi32>
      %1056 = arith.cmpi sge, %1054, %1055 : vector<1x256xi32>
      %1057 = arith.andi %1008, %1056 : vector<1x256xi1>
      %c-1_i32_313 = arith.constant -1 : i32
      %1058 = vector.broadcast %c-1_i32_313 : i32 to vector<1x256xi32>
      %1059 = arith.addi %21, %1058 : vector<1x256xi32>
      %c16_i32_314 = arith.constant 16 : i32
      %1060 = vector.broadcast %c16_i32_314 : i32 to vector<1x256xi32>
      %1061 = arith.cmpi slt, %1059, %1060 : vector<1x256xi32>
      %1062 = arith.andi %1057, %1061 : vector<1x256xi1>
      %c209_i32 = arith.constant 209 : i32
      %1063 = tpu.dynamic_rotate %17 by %c209_i32 dim 1 : vector<1x256xf32>, i32 -> vector<1x256xf32>
      %c209_i32_315 = arith.constant 209 : i32
      %1064 = tpu.dynamic_rotate %18 by %c209_i32_315 dim 1 : vector<1x256xf32>, i32 -> vector<1x256xf32>
      %c44 = arith.constant 44 : index
      %1065 = memref.load %arg2[%c44] : memref<98xf32, #tpu.memory_space<smem>>
      %c93 = arith.constant 93 : index
      %1066 = memref.load %arg2[%c93] : memref<98xf32, #tpu.memory_space<smem>>
      %1067 = vector.broadcast %1065 : f32 to vector<1x256xf32>
      %1068 = arith.mulf %1067, %1063 : vector<1x256xf32>
      %1069 = vector.broadcast %1066 : f32 to vector<1x256xf32>
      %1070 = arith.mulf %1069, %1064 : vector<1x256xf32>
      %1071 = arith.addf %1068, %1070 : vector<1x256xf32>
      %cst_316 = arith.constant 0.000000e+00 : f32
      %1072 = vector.broadcast %cst_316 : f32 to vector<1x256xf32>
      %1073 = arith.select %1062, %1071, %1072 : vector<1x256xi1>, vector<1x256xf32>
      %1074 = arith.addf %1052, %1073 : vector<1x256xf32>
      %c0_i32_317 = arith.constant 0 : i32
      %1075 = vector.broadcast %c0_i32_317 : i32 to vector<1x256xi32>
      %1076 = arith.addi %21, %1075 : vector<1x256xi32>
      %c0_i32_318 = arith.constant 0 : i32
      %1077 = vector.broadcast %c0_i32_318 : i32 to vector<1x256xi32>
      %1078 = arith.cmpi sge, %1076, %1077 : vector<1x256xi32>
      %1079 = arith.andi %1008, %1078 : vector<1x256xi1>
      %c0_i32_319 = arith.constant 0 : i32
      %1080 = vector.broadcast %c0_i32_319 : i32 to vector<1x256xi32>
      %1081 = arith.addi %21, %1080 : vector<1x256xi32>
      %c16_i32_320 = arith.constant 16 : i32
      %1082 = vector.broadcast %c16_i32_320 : i32 to vector<1x256xi32>
      %1083 = arith.cmpi slt, %1081, %1082 : vector<1x256xi32>
      %1084 = arith.andi %1079, %1083 : vector<1x256xi1>
      %c208_i32 = arith.constant 208 : i32
      %1085 = tpu.dynamic_rotate %17 by %c208_i32 dim 1 : vector<1x256xf32>, i32 -> vector<1x256xf32>
      %c208_i32_321 = arith.constant 208 : i32
      %1086 = tpu.dynamic_rotate %18 by %c208_i32_321 dim 1 : vector<1x256xf32>, i32 -> vector<1x256xf32>
      %c45 = arith.constant 45 : index
      %1087 = memref.load %arg2[%c45] : memref<98xf32, #tpu.memory_space<smem>>
      %c94 = arith.constant 94 : index
      %1088 = memref.load %arg2[%c94] : memref<98xf32, #tpu.memory_space<smem>>
      %1089 = vector.broadcast %1087 : f32 to vector<1x256xf32>
      %1090 = arith.mulf %1089, %1085 : vector<1x256xf32>
      %1091 = vector.broadcast %1088 : f32 to vector<1x256xf32>
      %1092 = arith.mulf %1091, %1086 : vector<1x256xf32>
      %1093 = arith.addf %1090, %1092 : vector<1x256xf32>
      %cst_322 = arith.constant 0.000000e+00 : f32
      %1094 = vector.broadcast %cst_322 : f32 to vector<1x256xf32>
      %1095 = arith.select %1084, %1093, %1094 : vector<1x256xi1>, vector<1x256xf32>
      %1096 = arith.addf %1074, %1095 : vector<1x256xf32>
      %c1_i32_323 = arith.constant 1 : i32
      %1097 = vector.broadcast %c1_i32_323 : i32 to vector<1x256xi32>
      %1098 = arith.addi %21, %1097 : vector<1x256xi32>
      %c0_i32_324 = arith.constant 0 : i32
      %1099 = vector.broadcast %c0_i32_324 : i32 to vector<1x256xi32>
      %1100 = arith.cmpi sge, %1098, %1099 : vector<1x256xi32>
      %1101 = arith.andi %1008, %1100 : vector<1x256xi1>
      %c1_i32_325 = arith.constant 1 : i32
      %1102 = vector.broadcast %c1_i32_325 : i32 to vector<1x256xi32>
      %1103 = arith.addi %21, %1102 : vector<1x256xi32>
      %c16_i32_326 = arith.constant 16 : i32
      %1104 = vector.broadcast %c16_i32_326 : i32 to vector<1x256xi32>
      %1105 = arith.cmpi slt, %1103, %1104 : vector<1x256xi32>
      %1106 = arith.andi %1101, %1105 : vector<1x256xi1>
      %c207_i32 = arith.constant 207 : i32
      %1107 = tpu.dynamic_rotate %17 by %c207_i32 dim 1 : vector<1x256xf32>, i32 -> vector<1x256xf32>
      %c207_i32_327 = arith.constant 207 : i32
      %1108 = tpu.dynamic_rotate %18 by %c207_i32_327 dim 1 : vector<1x256xf32>, i32 -> vector<1x256xf32>
      %c46 = arith.constant 46 : index
      %1109 = memref.load %arg2[%c46] : memref<98xf32, #tpu.memory_space<smem>>
      %c95 = arith.constant 95 : index
      %1110 = memref.load %arg2[%c95] : memref<98xf32, #tpu.memory_space<smem>>
      %1111 = vector.broadcast %1109 : f32 to vector<1x256xf32>
      %1112 = arith.mulf %1111, %1107 : vector<1x256xf32>
      %1113 = vector.broadcast %1110 : f32 to vector<1x256xf32>
      %1114 = arith.mulf %1113, %1108 : vector<1x256xf32>
      %1115 = arith.addf %1112, %1114 : vector<1x256xf32>
      %cst_328 = arith.constant 0.000000e+00 : f32
      %1116 = vector.broadcast %cst_328 : f32 to vector<1x256xf32>
      %1117 = arith.select %1106, %1115, %1116 : vector<1x256xi1>, vector<1x256xf32>
      %1118 = arith.addf %1096, %1117 : vector<1x256xf32>
      %c2_i32_329 = arith.constant 2 : i32
      %1119 = vector.broadcast %c2_i32_329 : i32 to vector<1x256xi32>
      %1120 = arith.addi %21, %1119 : vector<1x256xi32>
      %c0_i32_330 = arith.constant 0 : i32
      %1121 = vector.broadcast %c0_i32_330 : i32 to vector<1x256xi32>
      %1122 = arith.cmpi sge, %1120, %1121 : vector<1x256xi32>
      %1123 = arith.andi %1008, %1122 : vector<1x256xi1>
      %c2_i32_331 = arith.constant 2 : i32
      %1124 = vector.broadcast %c2_i32_331 : i32 to vector<1x256xi32>
      %1125 = arith.addi %21, %1124 : vector<1x256xi32>
      %c16_i32_332 = arith.constant 16 : i32
      %1126 = vector.broadcast %c16_i32_332 : i32 to vector<1x256xi32>
      %1127 = arith.cmpi slt, %1125, %1126 : vector<1x256xi32>
      %1128 = arith.andi %1123, %1127 : vector<1x256xi1>
      %c206_i32 = arith.constant 206 : i32
      %1129 = tpu.dynamic_rotate %17 by %c206_i32 dim 1 : vector<1x256xf32>, i32 -> vector<1x256xf32>
      %c206_i32_333 = arith.constant 206 : i32
      %1130 = tpu.dynamic_rotate %18 by %c206_i32_333 dim 1 : vector<1x256xf32>, i32 -> vector<1x256xf32>
      %c47 = arith.constant 47 : index
      %1131 = memref.load %arg2[%c47] : memref<98xf32, #tpu.memory_space<smem>>
      %c96 = arith.constant 96 : index
      %1132 = memref.load %arg2[%c96] : memref<98xf32, #tpu.memory_space<smem>>
      %1133 = vector.broadcast %1131 : f32 to vector<1x256xf32>
      %1134 = arith.mulf %1133, %1129 : vector<1x256xf32>
      %1135 = vector.broadcast %1132 : f32 to vector<1x256xf32>
      %1136 = arith.mulf %1135, %1130 : vector<1x256xf32>
      %1137 = arith.addf %1134, %1136 : vector<1x256xf32>
      %cst_334 = arith.constant 0.000000e+00 : f32
      %1138 = vector.broadcast %cst_334 : f32 to vector<1x256xf32>
      %1139 = arith.select %1128, %1137, %1138 : vector<1x256xi1>, vector<1x256xf32>
      %1140 = arith.addf %1118, %1139 : vector<1x256xf32>
      %c3_i32_335 = arith.constant 3 : i32
      %1141 = vector.broadcast %c3_i32_335 : i32 to vector<1x256xi32>
      %1142 = arith.addi %21, %1141 : vector<1x256xi32>
      %c0_i32_336 = arith.constant 0 : i32
      %1143 = vector.broadcast %c0_i32_336 : i32 to vector<1x256xi32>
      %1144 = arith.cmpi sge, %1142, %1143 : vector<1x256xi32>
      %1145 = arith.andi %1008, %1144 : vector<1x256xi1>
      %c3_i32_337 = arith.constant 3 : i32
      %1146 = vector.broadcast %c3_i32_337 : i32 to vector<1x256xi32>
      %1147 = arith.addi %21, %1146 : vector<1x256xi32>
      %c16_i32_338 = arith.constant 16 : i32
      %1148 = vector.broadcast %c16_i32_338 : i32 to vector<1x256xi32>
      %1149 = arith.cmpi slt, %1147, %1148 : vector<1x256xi32>
      %1150 = arith.andi %1145, %1149 : vector<1x256xi1>
      %c205_i32 = arith.constant 205 : i32
      %1151 = tpu.dynamic_rotate %17 by %c205_i32 dim 1 : vector<1x256xf32>, i32 -> vector<1x256xf32>
      %c205_i32_339 = arith.constant 205 : i32
      %1152 = tpu.dynamic_rotate %18 by %c205_i32_339 dim 1 : vector<1x256xf32>, i32 -> vector<1x256xf32>
      %c48 = arith.constant 48 : index
      %1153 = memref.load %arg2[%c48] : memref<98xf32, #tpu.memory_space<smem>>
      %c97 = arith.constant 97 : index
      %1154 = memref.load %arg2[%c97] : memref<98xf32, #tpu.memory_space<smem>>
      %1155 = vector.broadcast %1153 : f32 to vector<1x256xf32>
      %1156 = arith.mulf %1155, %1151 : vector<1x256xf32>
      %1157 = vector.broadcast %1154 : f32 to vector<1x256xf32>
      %1158 = arith.mulf %1157, %1152 : vector<1x256xf32>
      %1159 = arith.addf %1156, %1158 : vector<1x256xf32>
      %cst_340 = arith.constant 0.000000e+00 : f32
      %1160 = vector.broadcast %cst_340 : f32 to vector<1x256xf32>
      %1161 = arith.select %1150, %1159, %1160 : vector<1x256xi1>, vector<1x256xf32>
      %1162 = arith.addf %1140, %1161 : vector<1x256xf32>
      %1163 = arith.negf %1162 : vector<1x256xf32>
      %1164 = math.exp %1163 : vector<1x256xf32>
      %cst_341 = arith.constant 1.000000e+00 : f32
      %1165 = vector.broadcast %cst_341 : f32 to vector<1x256xf32>
      %1166 = arith.addf %1165, %1164 : vector<1x256xf32>
      %1167 = arith.divf %1165, %1166 : vector<1x256xf32>
      %1168 = vector.shape_cast %1167 : vector<1x256xf32> to vector<1x1x256xf32>
      %c0_342 = arith.constant 0 : index
      %c0_343 = arith.constant 0 : index
      %c0_344 = arith.constant 0 : index
      %1169 = vector.load %arg6[%c0_342, %c0_343, %c0_344] : memref<1x1x256xf32, #tpu.memory_space<vmem>>, vector<1x1x256xf32>
      tpu.vector_store %arg6[%c0_342, %c0_343, %c0_344], %1168 {strides = array<i32>} : memref<1x1x256xf32, #tpu.memory_space<vmem>>, vector<1x1x256xf32>,
    } else {
    }
    return
  }
  func.func @transform_0(%arg0: i32, %arg1: i32) -> i32 {
    %c0_i32 = arith.constant 0 : i32
    %c0_i32_0 = arith.constant 0 : i32
    return %c0_i32 : i32
  }
  func.func @transform_1(%arg0: i32, %arg1: i32) -> i32 {
    %c0_i32 = arith.constant 0 : i32
    %c0_i32_0 = arith.constant 0 : i32
    return %c0_i32 : i32
  }
  func.func @transform_2(%arg0: i32, %arg1: i32) -> (i32, i32) {
    %c0_i32 = arith.constant 0 : i32
    %c0_i32_0 = arith.constant 0 : i32
    %c0_i32_1 = arith.constant 0 : i32
    return %c0_i32, %c0_i32_0 : i32, i32
  }
  func.func @transform_3(%arg0: i32, %arg1: i32) -> (i32, i32, i32) {
    %c0_i32 = arith.constant 0 : i32
    %c0_i32_0 = arith.constant 0 : i32
    return %arg0, %arg1, %c0_i32 : i32, i32, i32
  }
  func.func @transform_4(%arg0: i32, %arg1: i32) -> (i32, i32, i32) {
    %c0_i32 = arith.constant 0 : i32
    %c0_i32_0 = arith.constant 0 : i32
    %c0_i32_1 = arith.constant 0 : i32
    return %arg0, %c0_i32, %c0_i32_0 : i32, i32, i32
  }
}

</mosaic_0001>

<bundles_post_ra>
// kernel: tpu_custom_call.1
= control target key start
LH: loop header
LB: loop body
LE: loop exit
PB: predicated region body
PF: predicated region fallthrough
CT: control target
= control target key end

     0   :  { %s4952_s0 = inlined_call_operand.vmem [shape: f32[98], index: 0, kind: input, shape index: {}]   ;;  %s4953_s1 = inlined_call_operand.<no memory space> [shape: f32[1], index: 1, kind: input, shape index: {}]   ;;  %s4954_s2 = inlined_call_operand.hbm [shape: s32[2,256], index: 2, kind: input, shape index: {}]   ;;  %s4955_s3 = inlined_call_operand.hbm [shape: f32[2,4,256], index: 3, kind: input, shape index: {}]   ;;  %s4956_s4 = inlined_call_operand.hbm [shape: f32[2,1,256], index: 4, kind: output, shape index: {}]  }
   0x1   :  { %9 = sst [smem:[#allocation4]] %s4953_s1 }
   0x2   :  { %10 = vsyncpa [#allocation8], 0 }
   0x3   :  { %11 = vsyncpa [#allocation6], 0 }
   0x4   :  { %12 = vsyncpa [#allocation11], 0 }
   0x5   :  { %14 = vsyncpa [#allocation11 + $0x1], 0 }
   0x6   :  { %15 = vsyncpa [#allocation7], 0 }
   0x7   :  { %17 = vsyncpa [#allocation7 + $0x1], 0  ;;  %s2662_s17 = smov 0   ;;  %s2664_s18 = smov 0  }
   0x8   :  { %s2666_s19 = smov 0   ;;  %s2668_s20 = smov 0  }
   0x9   :  { %s2670_s21 = smov 0   ;;  %s2672_s22 = smov 0  }
   0xa LB: > { %s2142_s1 = sadd.s32 4294967295, %s2578_s22   ;;  %s2143_s23 = sadd.s32 4294967294, %s2578_s22   ;;  %s2578_s22 = sphi %s2672_s22, %s23_s22   ;;  %s2574_s21 = sphi %s2670_s21, %s5313_s21   ;;  %s2570_s20 = sphi %s2668_s20, %s5312_s20   ;;  %s2566_s19 = sphi %s2666_s19, %s5311_s19   ;;  %s2562_s18 = sphi %s2664_s18, %s5310_s18   ;;  %s2558_s17 = sphi %s2662_s17, %s5309_s17  }
   0xb   : > { %p120_p0 = scmp.ne.s32.totalorder %s2562_s18, %s2558_s17  ;;  %p2696_p1 = scmp.eq.s32.totalorder %s2142_s1, 0 }
   0xc   : > { %p150_p2 = scmp.eq.s32.totalorder %s2143_s23, 1  ;;  %p2144_p4 = scmp.ge.s32.totalorder %s2578_s22, 1 }
   0xd   : > { %p2702_p3 = por %p2696_p1, %p120_p0  ;;  %p157_p6 = scmp.lt.s32.totalorder %s2578_s22, 3 }
   0xe   : > { %p2707_p5 = por %p150_p2, %p120_p0  ;;  %s169_s29 = sshll.u32 %s4952_s0, 4  ;;  %s170_s29 = int_to_ptr.vmem [resolvable:$true] %s169_s29 }
   0xf   : > { %p2715_p7 = pnand %p2144_p4, %p157_p6  ;;  %p2147_p8 = scmp.ge.s32.totalorder %s2578_s22, 2 }
  0x10   : > { %s182_s7 = sshll.u32 %s4954_s2, 4  ;;  %s2580_s8 = smov [#allocation9]   ;;  %s183_s7 = int_to_ptr.hbm [resolvable:$true] %s182_s7 }
  0x11   : > { %p2285_p9 = pneg %p2715_p7  ;;  %s184_s9 = sshll.u32 %s2580_s8, 4  ;;  %s185_s9 = int_to_ptr.vmem [resolvable:$true] %s184_s9 }
  0x12   : > { %s2581_s10 = smov [#allocation5]   ;;  %p144_p11 = scmp.eq.s32.totalorder %s2142_s1, 1 }
  0x13   : > { %p2286_p10 = pnand %p2285_p9, %p2696_p1  ;;  %s35_s11 = sadd.s32 1, %s2574_s21 }
  0x14   : > { %p37_p12 = scmp.ge.s32.totalorder %s35_s11, 2  ;;  %s107_s12 = sadd.s32 1, %s2566_s19 }
  0x15   : > { %2288 = dma.vmem_to_smem (!%p2286_p10), %s170_s29, 16, %s2581_s10, [#allocation8]  }
  0x16   : > { %2291 = dma.hbm_to_vmem [thread:$0]  (!%p2286_p10), %s183_s7, 64, %s185_s9, [#allocation6]  }
  0x17   : > { %p114_p13 = scmp.ne.s32.totalorder %s2566_s19, %s2562_s18  ;;  %p115_p0 = scmp.eq.s32.totalorder %s2578_s22, 0 }
  0x18   : > { %s5315_s11 = smov (%p37_p12, %s35_s11), 0  ;;  %p2302_p4 = scmp.lt.s32.totalorder %s2578_s22, 2 }
  0x19   : > { %p2734_p2 = por %p144_p11, %p114_p13  ;;  %s102_s14 = ssub.s32 %s2574_s21, %s5315_s11 }
  0x1a   : > { %s195_s15 = sand.u32 1, %s2566_s19   ;;  %p105_p6 = scmp.eq.s32.totalorder %s102_s14, 0 }
  0x1b   : > { %p116_p9 = por %p115_p0, %p114_p13  ;;  %s2148_s16 = sshll.u32 %s195_s15, 3 }
  0x1c   : > { %s2272_s1 = sshll.u32 %s2574_s21, 3  ;;  %s199_s6 = scalar_lea.vmem [#allocation10], %s2148_s16 }
  0x1d   : > { %s2744_s23 = scalar_select %p105_p6, %s2566_s19, %s107_s12  }
  0x1e   : > { %s206_s29 = scalar_lea.hbm %s4955_s3, %s2272_s1  ;;  %s210_s7 = sshll.u32 %s199_s6, 4  ;;  %s211_s7 = int_to_ptr.vmem [resolvable:$true] %s210_s7 }
  0x1f   : > { %s208_s5 = sshll.u32 %s206_s29, 4  ;;  %p2293_p10 = pnand %p2302_p4, %p116_p9  ;;  %s209_s5 = int_to_ptr.hbm [resolvable:$true] %s208_s5 }
  0x20   : > { %s196_s8 = scalar_lea.sflag [#allocation11], %s195_s15  ;;  %219 = sbr.rel (%p2715_p7) target bundleno = 750 (0x2ee), region = 36 }
  0x21   : > { %2295 = dma.hbm_to_vmem [thread:$0]  (!%p2293_p10), %s209_s5, 128, %s211_s7, %s196_s8  }
  0x25   : > { %2541 = dma.done.wait (%p2696_p1), [#allocation8], 16  }
  0x26   : > { %2543 = vsyncadd (%p2696_p1), [#allocation8], 4294967280 }
  0x27   : > { %2545 = dma.done.wait (%p2696_p1), [#allocation6], 64  }
  0x28   : > { %2547 = vsyncadd (%p2696_p1), [#allocation6], 4294967232  ;;  %s2762_s9 = sand.u32 1, %s2562_s18  }
  0x29   : > { %s2154_s30 = sshll.u32 %s2762_s9, 3  ;;  %s232_s10 = scalar_lea.sflag [#allocation11], %s2762_s9 }
  0x2a   : > { %s235_s12 = scalar_lea.vmem [#allocation10], %s2154_s30 }
  0x2b   : > { %2549 = dma.done.wait (%p2702_p3), %s232_s10, 128  }
  0x2c   : > { %2551 = vsyncadd (%p2702_p3), %s232_s10, 4294967168 }
  0x2d   : > { %241 = sfence }
  0x2e   : > { %v266_v0 = vlaneseq  ;;  %v272_v1 = vld [vmem:[%s235_s12] sm:$0xff]  ;;  %v5026_v2 = vmov 0  ;;  %v2582_v3 = vmov 0.0   ;;  %v2583_v4 = vmov -inf   ;;  %s2584_s24 = smov 48   ;;  %s2585_s25 = smov 51  }
  0x2f   : > { %275 = vst [vmem:[#allocation1] ss:$2 sm:$0xff] %v272_v1  ;;  %vm280_vm1 = vcmask 1043456   ;;  %vm4957_vm2 = vcmask 1040384   ;;  %s2586_s14 = smov 50   ;;  %s2587_s15 = smov 47  }
  0x30   : > { %vm2771_vm0 = vcmp.lt.s32.totalorder %v266_v0, 256  ;;  %s2588_s16 = smov 49   ;;  %s2589_s1 = smov 46  }
  0x31   : > { %v5027_v2 = vsel %vm2771_vm0, 4294967295, %v5026_v2  ;;  %270 = vst.msk [vmem:[#allocation2] sm:$0x3] %vm2771_vm0, %v2582_v3  ;;  %s2590_s27 = smov 45   ;;  %s2591_s28 = smov 35  }
  0x32   : > { %5028 = vst [vmem:[#allocation17_spill] sm:$0xff] %v5027_v2  ;;  %s2592_s29 = smov 34   ;;  %s2593_s5 = smov 33  }
  0x33   : > { %271 = vst.msk [vmem:[#allocation3] sm:$0x3] %vm2771_vm0, %v2583_v4  ;;  %s2594_s6 = smov 32   ;;  %s2595_s7 = smov 31  }
  0x34   : > { %s2596_s8 = smov 30   ;;  %s2597_s30 = smov 29  }
  0x35   : > { %s2598_s10 = smov 19   ;;  %s2599_s12 = smov 18  }
  0x36   : > { %v276_v5 = vld.sshfl [vmem:[#allocation1] sm:$0xff pattern:$0x75316420]  ;;  %v277_v6 = vld.sshfl [vmem:[#allocation1 + $0x8] sm:$0xff pattern:$0x75316420] }
  0x37   : > { %v281_v7 = vsel %vm280_vm1, %v276_v5, 0.0  ;;  %v288_v8 = vsel %vm280_vm1, %v277_v6, 0.0  ;;  %308 = vst [vmem:[#allocation1] ss:$2 sm:$0xff] %v272_v1 }
  0x38   : > { %v282_v9 = vrot.slane %v281_v7, 4  ;;  %v289_v10 = vrot.slane %v288_v8, 4  ;;  %v273_v29 = vld [vmem:[#allocation2] sm:$0x3] }
  0x3a   : > { %v283_v11 = vadd.f32 %v282_v9, %v281_v7  ;;  %v290_v12 = vadd.f32 %v289_v10, %v288_v8  ;;  %v307_v41 = vld [vmem:[#allocation3] sm:$0x3] }
  0x3c   : > { %v284_v13 = vrot.slane %v283_v11, 2  ;;  %v291_v14 = vrot.slane %v290_v12, 2 }
  0x3e   : > { %v285_v15 = vadd.f32 %v284_v13, %v283_v11  ;;  %v292_v16 = vadd.f32 %v291_v14, %v290_v12  ;;  %v309_v17 = vld.sshfl [vmem:[#allocation1] sm:$0xff pattern:$0x75316420]  ;;  %v310_v18 = vld.sshfl [vmem:[#allocation1 + $0x8] sm:$0xff pattern:$0x75316420] }
  0x3f   : > { %v313_v19 = vsel %vm280_vm1, %v309_v17, -inf  ;;  %v320_v20 = vsel %vm280_vm1, %v310_v18, -inf  ;;  %v2921_v17 = vld [vmem:[#allocation9] sm:$0xf] }
  0x40   : > { %v286_v21 = vrot.slane %v285_v15, 1  ;;  %v293_v22 = vrot.slane %v292_v16, 1  ;;  %v314_v23 = vrot.slane %v313_v19, 4  ;;  %v321_v24 = vrot.slane %v320_v20, 4 }
  0x41   : > { %v2933_v18 = vadd.s32 4294967293, %v2921_v17  ;;  %vm4964_vm15 = vcmp.ge.s32.totalorder %v2921_v17, 0  ;;  %vm4973_vm1 = vcmp.lt.s32.totalorder %v2921_v17, 16 }
  0x42   : > { %v287_v25 = vadd.f32 %v286_v21, %v285_v15  ;;  %v294_v26 = vadd.f32 %v293_v22, %v292_v16  ;;  %v315_v27 = vmax.f32 %v313_v19, %v314_v23  ;;  %v322_v28 = vmax.f32 %v320_v20, %v321_v24 }
  0x43   : > { %v2940_v21 = vand.u32 127, %v266_v0  ;;  %vm344_vm3 = vcmp.ge.s32.totalorder %v2933_v18, 0  ;;  %v2954_v23 = vadd.s32 4294967294, %v2921_v17  ;;  %vm345_vm5 = vcmp.lt.s32.totalorder %v2933_v18, 16 }
  0x44   : > { %v297_v30 = vrot.slane %v294_v26, 7  ;;  %v316_v31 = vrot.slane %v315_v27, 2  ;;  %v323_v32 = vrot.slane %v322_v28, 2  ;;  %v4961_v24 = vmov 0  }
  0x45   : > { %5030 = vst [vmem:[#allocation19_spill] sm:$0xff] %v2954_v23  ;;  %vm417_vm4 = vcmp.lt.s32.totalorder %v2940_v21, 50  ;;  %vm4980_vm6 = vcmp.lt.s32.totalorder %v2940_v21, 47  ;;  %vm4960_vm7 = vcmp.ge.s32.totalorder %v2954_v23, 0  ;;  %vm368_vm8 = vcmp.lt.s32.totalorder %v2940_v21, 51 }
  0x46   : > { %v299_v33 = vsel %vm4957_vm2, %v287_v25, %v297_v30  ;;  %v317_v34 = vmax.f32 %v315_v27, %v316_v31  ;;  %v324_v35 = vmax.f32 %v322_v28, %v323_v32  ;;  %v347_v25 = vsel %vm344_vm3, 1, %v4961_v24 }
  0x47   : > { %v301_v36 = vadd.f32 %v299_v33, %v273_v29  ;;  %v352_v31 = vsel %vm345_vm5, 1, %v4961_v24  ;;  %vm4974_vm9 = vcmp.lt.s32.totalorder %v2954_v23, 16  ;;  %v2988_v32 = vadd.s32 4294967295, %v2921_v17 }
  0x48   : > { %v318_v37 = vrot.slane %v317_v34, 1  ;;  %v325_v38 = vrot.slane %v324_v35, 1  ;;  %vm460_vm10 = vcmp.lt.s32.totalorder %v2940_v21, 49  ;;  %vm4975_vm14 = vcmp.lt.s32.totalorder %v2940_v21, 48 }
  0x49   : > { %306 = vst.msk [vmem:[#allocation2] sm:$0x3] %vm2771_vm0, %v301_v36  ;;  %v2156_v36 = vrot.slane %v347_v25, 9  ;;  %vm4958_vm11 = vcmp.ge.s32.totalorder %v2988_v32, 0  ;;  %vm4959_vm12 = vcmp.lt.s32.totalorder %v2988_v32, 16 }
  0x4a   : > { %v319_v39 = vmax.f32 %v317_v34, %v318_v37  ;;  %v326_v40 = vmax.f32 %v324_v35, %v325_v38  ;;  %5031 = vst [vmem:[#allocation20_spill] sm:$0xff] %v2988_v32 }
  0x4b   : > { %vm3027_vm13 = vcmp.ne.s32.totalorder %v2156_v36, 0  ;;  %v445_v36 = vsel %vm4958_vm11, 1, %v4961_v24 }
  0x4c   : > { %v329_v42 = vrot.slane %v326_v40, 7  ;;  %v402_v40 = vsel %vm4960_vm7, 1, %v4961_v24 }
  0x4e   : > { %v330_v43 = vsel %vm4957_vm2, %v319_v39, %v329_v42  ;;  %v5036_v39 = vmov 0 }
  0x4f   : > { %v332_v44 = vmax.f32 %v307_v41, %v330_v43  ;;  %v2157_v41 = vrot.slane %v352_v31, 9 }
  0x50   : > { %v337_v45 = vld [vmem:[#allocation2] sm:$0x3] }
  0x51   : > { %v2787_v46 = vmul.f32 0.25, %v337_v45  ;;  %333 = vst.msk [vmem:[#allocation3] sm:$0x3] %vm2771_vm0, %v332_v44  ;;  %v408_v44 = vsel %vm4974_vm9, 1, %v4961_v24  ;;  %vm3067_vm2 = vcmp.ne.s32.totalorder %v2157_v41, 0 }
  0x52   : > { %v5037_v39 = vsel %vm3067_vm2, 4294967295, %v5036_v39 }
  0x53   : > { %5029 = vst [vmem:[#allocation18_spill] sm:$0xff] %v2787_v46  ;;  %v2792_v47 = vperm.slane %v2787_v46, 1  ;;  %v2795_v48 = vperm.slane %v2787_v46, 0 }
  0x54   : > { %5038 = vst [vmem:[#allocation23_spill] sm:$0xff] %v5037_v39 }
  0x55   : > { %500 = vrot.lane.b32.xlu1 %v2792_v47, %s2584_s24  ;;  %362 = vrot.lane.b32.xlu0 %v2795_v48, %s2585_s25 }
  0x56   : > { %413 = vrot.lane.b32.xlu2 %v2795_v48, %s2586_s14 }
  0x58   : > { %v339_v49 = vld [vmem:[#allocation3] sm:$0x3] }
  0x59   : > { %v2803_v50 = vperm.slane %v339_v49, 0  ;;  %v2808_v51 = vperm.slane %v339_v49, 1  ;;  %v3017_v49 = vadd.s32 1, %v2921_v17 }
  0x5b   : > { %5032 = vst [vmem:[#allocation21_spill] sm:$0xff] %v3017_v49  ;;  %vm4966_vm11 = vcmp.ge.s32.totalorder %v3017_v49, 0 }
  0x5d   : > { %541 = vrot.lane.b32.xlu1 %v2795_v48, %s2587_s15  ;;  %364 = vrot.lane.b32.xlu0 %v2792_v47, %s2585_s25 }
  0x5e   : > { %415 = vrot.lane.b32.xlu2 %v2792_v47, %s2586_s14 }
  0x65   : > { %376 = vrot.lane.b32.xlu1 %v2803_v50, %s2585_s25  ;;  %458 = vrot.lane.b32.xlu0 %v2792_v47, %s2588_s16 }
  0x66   : > { %456 = vrot.lane.b32.xlu2 %v2795_v48, %s2588_s16 }
  0x6d   : > { %378 = vrot.lane.b32.xlu1 %v2808_v51, %s2585_s25  ;;  %498 = vrot.lane.b32.xlu0 %v2795_v48, %s2584_s24  ;;  %s2923_s25 = sld [smem:[#allocation5 + $0x1]] }
  0x6e   : > { %543 = vrot.lane.b32.xlu2 %v2792_v47, %s2587_s15 }
  0x73   : > { %v428_v0 = vstv %s2923_s25  ;;  %s3231_s25 = sld [smem:[#allocation5 + $0x6]] }
  0x75   : > { %422 = vrot.lane.b32.xlu1 %v2808_v51, %s2586_s14  ;;  %420 = vrot.lane.b32.xlu0 %v2803_v50, %s2586_s14  ;;  %s2927_s14 = sld [smem:[#allocation5 + $0x4]] }
  0x76   : > { %465 = vrot.lane.b32.xlu2 %v2808_v51, %s2588_s16 }
  0x7b   : > { %v556_v28 = vstv %s2927_s14  ;;  %s3245_s14 = sld [smem:[#allocation5 + $0x37]] }
  0x7d   : > { %463 = vrot.lane.b32.xlu1 %v2803_v50, %s2588_s16  ;;  %507 = vrot.lane.b32.xlu0 %v2808_v51, %s2584_s24  ;;  %s2930_s16 = sld [smem:[#allocation5]] }
  0x7e   : > { %505 = vrot.lane.b32.xlu2 %v2803_v50, %s2584_s24  ;;  %s2600_s24 = smov 17  }
  0x83   : > { %v384_v34 = vstv %s2930_s16  ;;  %s3326_s16 = sld [smem:[#allocation5 + $0x38]] }
  0x85   : > { %550 = vrot.lane.b32.xlu1 %v2808_v51, %s2587_s15  ;;  %548 = vrot.lane.b32.xlu0 %v2803_v50, %s2587_s15  ;;  %s2601_s15 = smov 16  }
  0x86   : > { %584 = vrot.lane.b32.xlu2 %v2795_v48, %s2589_s1 }
  0x8d   : > { %591 = vrot.lane.b32.xlu1 %v2803_v50, %s2589_s1  ;;  %586 = vrot.lane.b32.xlu0 %v2792_v47, %s2589_s1 }
  0x8e   : > { %593 = vrot.lane.b32.xlu2 %v2808_v51, %s2589_s1  ;;  %s2942_s1 = sld [smem:[#allocation5 + $0x2]] }
  0x94   : > { %v5048_v18 = vstv %s2942_s1  ;;  %s3341_s1 = sld [smem:[#allocation5 + $0x7]] }
  0x95   : > { %629 = vrot.lane.b32.xlu1 %v2792_v47, %s2590_s27  ;;  %627 = vrot.lane.b32.xlu0 %v2795_v48, %s2590_s27 }
  0x96   : > { %634 = vrot.lane.b32.xlu2 %v2803_v50, %s2590_s27 }
  0x9d   : > { %660 = vrot.lane.b32.xlu1 %v2795_v48, %s2591_s28  ;;  %636 = vrot.lane.b32.xlu0 %v2808_v51, %s2590_s27  ;;  %s2946_s27 = sld [smem:[#allocation5 + $0x31]] }
  0x9e   : > { %662 = vrot.lane.b32.xlu2 %v2792_v47, %s2591_s28 }
  0xa3   : > { %v387_v42 = vstv %s2946_s27  ;;  %s3397_s27 = sld [smem:[#allocation5 + $0x39]] }
  0xa5   : > { %669 = vrot.lane.b32.xlu1 %v2808_v51, %s2591_s28  ;;  %667 = vrot.lane.b32.xlu0 %v2803_v50, %s2591_s28  ;;  %s2948_s28 = sld [smem:[#allocation4]] }
  0xa6   : > { %692 = vrot.lane.b32.xlu2 %v2795_v48, %s2592_s29 }
  0xad   : > { %699 = vrot.lane.b32.xlu1 %v2803_v50, %s2592_s29  ;;  %694 = vrot.lane.b32.xlu0 %v2792_v47, %s2592_s29 }
  0xae   : > { %701 = vrot.lane.b32.xlu2 %v2808_v51, %s2592_s29  ;;  %s2951_s29 = sld [smem:[#allocation5 + $0x3]] }
  0xb0   : > { %v2837_v52 = vpop.permute.xlu2 %413 }
  0xb5   : > { %726 = vrot.lane.b32.xlu1 %v2792_v47, %s2593_s5  ;;  %724 = vrot.lane.b32.xlu0 %v2795_v48, %s2593_s5 }
  0xb6   : > { %731 = vrot.lane.b32.xlu2 %v2803_v50, %s2593_s5 }
  0xb8   : > { %v2842_v53 = vpop.permute.xlu2 %415 }
  0xb9   : > { %v418_v26 = vsel %vm417_vm4, %v2837_v52, %v2842_v53  ;;  %v419_v27 = vsel %vm417_vm4, %v2842_v53, %v2837_v52 }
  0xba   : > { %v2997_v37 = vmul.f32 %v428_v0, %v419_v27  ;;  %v2999_v38 = vmul.f32 %v428_v0, %v418_v26  ;;  %v5033_v0 = vmov 0  ;;  %v2159_v26 = vrot.slane %v402_v40, 9 }
  0xbb   : > { %v5034_v0 = vsel %vm3027_vm13, 4294967295, %v5033_v0  ;;  %v451_v40 = vsel %vm4959_vm12, 1, %v4961_v24  ;;  %vm4984_vm12 = vcmask 1041408  }
  0xbc   : > { %5035 = vst [vmem:[#allocation22_spill] sm:$0xff] %v5034_v0  ;;  %vm3074_vm7 = vcmp.ne.s32.totalorder %v2159_v26, 0  ;;  %v2164_v26 = vrot.slane %v451_v40, 9  ;;  %v5066_v0 = vmov 0 }
  0xbd   : > { %756 = vrot.lane.b32.xlu1 %v2795_v48, %s2594_s6  ;;  %733 = vrot.lane.b32.xlu0 %v2808_v51, %s2593_s5  ;;  %s2965_s5 = sld [smem:[#allocation5 + $0x32]] }
  0xbe   : > { %758 = vrot.lane.b32.xlu2 %v2792_v47, %s2594_s6 }
  0xc0   : > { %v2847_v54 = vpop.permute.xlu2 %456 }
  0xc3   : > { %v5045_v40 = vstv %s2965_s5 }
  0xc5   : > { %765 = vrot.lane.b32.xlu1 %v2808_v51, %s2594_s6  ;;  %763 = vrot.lane.b32.xlu0 %v2803_v50, %s2594_s6  ;;  %s2995_s6 = sld [smem:[#allocation5 + $0x33]] }
  0xc6   : > { %788 = vrot.lane.b32.xlu2 %v2795_v48, %s2595_s7 }
  0xc7   : > { %v2852_v55 = vpop.permute.xlu1 %500  ;;  %v2854_v56 = vpop.permute.xlu0 %362 }
  0xc8   : > { %v2856_v57 = vpop.permute.xlu2 %543 }
  0xcd   : > { %795 = vrot.lane.b32.xlu1 %v2803_v50, %s2595_s7  ;;  %790 = vrot.lane.b32.xlu0 %v2792_v47, %s2595_s7 }
  0xce   : > { %797 = vrot.lane.b32.xlu2 %v2808_v51, %s2595_s7  ;;  %s3036_s7 = sld [smem:[#allocation5 + $0x34]] }
  0xcf   : > { %v2861_v58 = vpop.permute.xlu1 %541  ;;  %v2863_v59 = vpop.permute.xlu0 %364 }
  0xd0   : > { %v2865_v60 = vpop.permute.xlu2 %465  ;;  %v547_v45 = vsel %vm4980_vm6, %v2856_v57, %v2861_v58  ;;  %v546_v52 = vsel %vm4980_vm6, %v2861_v58, %v2856_v57  ;;  %v370_v53 = vsel %vm368_vm8, %v2863_v59, %v2854_v56  ;;  %v369_v57 = vsel %vm368_vm8, %v2854_v56, %v2863_v59 }
  0xd1   : > { %v2160_v58 = vrot.slane %v408_v44, 9  ;;  %v3050_v31 = vmul.f32 %v556_v28, %v547_v45  ;;  %v3065_v44 = vmul.f32 %v556_v28, %v546_v52  ;;  %v385_v45 = vmul.f32 %v384_v34, %v370_v53 }
  0xd2   : > { %v386_v27 = vmul.f32 %v384_v34, %v369_v57  ;;  %v5042_v52 = vmov 0  }
  0xd3   : > { %v487_v53 = vsel %vm4964_vm15, 1, %v5042_v52  ;;  %v493_v57 = vsel %vm4973_vm1, 1, %v5042_v52  ;;  %vm3105_vm15 = vcmp.ne.s32.totalorder %v2160_v58, 0 }
  0xd5   : > { %822 = vrot.lane.b32.xlu1 %v2792_v47, %s2596_s8  ;;  %820 = vrot.lane.b32.xlu0 %v2795_v48, %s2596_s8 }
  0xd6   : > { %827 = vrot.lane.b32.xlu2 %v2803_v50, %s2596_s8 }
  0xd7   : > { %v2870_v61 = vpop.permute.xlu1 %376  ;;  %v2872_v62 = vpop.permute.xlu0 %458 }
  0xd8   : > { %v2874_v63 = vpop.permute.xlu2 %505  ;;  %v461_v41 = vsel %vm460_vm10, %v2847_v54, %v2872_v62  ;;  %v462_v2 = vsel %vm460_vm10, %v2872_v62, %v2847_v54  ;;  %v3116_v62 = vadd.s32 2, %v2921_v17 }
  0xd9   : > { %v3135_v32 = vmul.f32 %v5048_v18, %v462_v2 }
  0xda   : > { %vm4985_vm9 = vcmp.lt.s32.totalorder %v3116_v62, 16 }
  0xdd   : > { %852 = vrot.lane.b32.xlu1 %v2795_v48, %s2597_s30  ;;  %829 = vrot.lane.b32.xlu0 %v2808_v51, %s2596_s8  ;;  %s2603_s8 = smov 15  }
  0xde   : > { %854 = vrot.lane.b32.xlu2 %v2792_v47, %s2597_s30 }
  0xdf   : > { %v2879_v1 = vpop.permute.xlu1 %378  ;;  %v2881_v3 = vpop.permute.xlu0 %498 }
  0xe0   : > { %v2883_v4 = vpop.permute.xlu2 %584  ;;  %v380_v25 = vsel %vm368_vm8, %v2870_v61, %v2879_v1  ;;  %v381_v34 = vsel %vm368_vm8, %v2879_v1, %v2870_v61  ;;  %v530_v61 = vsel %vm4966_vm11, 1, %v5042_v52  ;;  %vm4972_vm8 = vcmp.lt.s32.totalorder %v3017_v49, 16  ;;  %vm3122_vm11 = vmand %vm344_vm3, %vm345_vm5 }
  0xe1   : > { %v389_v43 = vmul.f32 %v387_v42, %v380_v25  ;;  %v2163_v25 = vrot.slane %v445_v36, 9  ;;  %v5043_v36 = vmov 0  ;;  %v388_v58 = vmul.f32 %v387_v42, %v381_v34  ;;  %vm351_vm5 = vmand %vm3122_vm11, %vm3027_vm13 }
  0xe2   : > { %v5044_v36 = vsel %vm3105_vm15, 4294967295, %v5043_v36  ;;  %v5050_v42 = vmov 0  ;;  %v5052_v34 = vstv %s2995_s6 }
  0xe3   : > { %v391_v1 = vadd.f32 %v389_v43, %v386_v27  ;;  %v2167_v27 = vrot.slane %v487_v53, 9  ;;  %vm3139_vm3 = vcmp.ne.s32.totalorder %v2163_v25, 0  ;;  %v536_v53 = vsel %vm4972_vm8, 1, %v5042_v52 }
  0xe4   : > { %v5051_v42 = vsel %vm3139_vm3, 4294967295, %v5050_v42  ;;  %vm4983_vm8 = vcmp.ge.s32.totalorder %v3116_v62, 0 }
  0xe5   : > { %861 = vrot.lane.b32.xlu1 %v2808_v51, %s2597_s30  ;;  %859 = vrot.lane.b32.xlu0 %v2803_v50, %s2597_s30  ;;  %s3059_s30 = sld [smem:[#allocation5 + $0x35]]  ;;  %vm3191_vm1 = vcmp.ne.s32.totalorder %v2167_v27, 0 }
  0xe6   : > { %885 = vrot.lane.b32.xlu2 %v2795_v48, %s2598_s10 }
  0xe7   : > { %v2888_v5 = vpop.permute.xlu1 %422  ;;  %v2890_v6 = vpop.permute.xlu0 %420 }
  0xe8   : > { %v2892_v7 = vpop.permute.xlu2 %593  ;;  %v424_v28 = vsel %vm417_vm4, %v2890_v6, %v2888_v5  ;;  %v425_v2 = vsel %vm417_vm4, %v2888_v5, %v2890_v6  ;;  %v504_v5 = vsel %vm4975_vm14, %v2852_v55, %v2881_v3  ;;  %vm3170_vm4 = vcmp.ne.s32.totalorder %v2164_v26, 0 }
  0xe9   : > { %v433_v46 = vmul.f32 %v5045_v40, %v424_v28  ;;  %v2168_v28 = vrot.slane %v493_v57, 9  ;;  %v394_v40 = vrot.slane %v391_v1, 6  ;;  %v503_v1 = vsel %vm4975_vm14, %v2881_v3, %v2852_v55 }
  0xea   : > { %v5055_v26 = vstv %s2965_s5  ;;  %v5060_v3 = vstv %s2951_s29  ;;  %s3426_s29 = sld [smem:[#allocation5 + $0x9]] }
  0xeb   : > { %v435_v6 = vadd.f32 %v433_v46, %v2999_v38  ;;  %v2172_v38 = vrot.slane %v536_v53, 9  ;;  %v432_v25 = vmul.f32 %v5055_v26, %v425_v2  ;;  %v573_v2 = vsel %vm4983_vm8, 1, %v5042_v52  ;;  %s3435_s5 = sld [smem:[#allocation5 + $0xa]] }
  0xec   : > { %v5063_v49 = vmov %v5060_v3  ;;  %vm5073_vm8 = vcmp.lt.s32.totalorder %v2940_v21, 48 }
  0xed   : > { %892 = vrot.lane.b32.xlu1 %v2803_v50, %s2598_s10  ;;  %887 = vrot.lane.b32.xlu0 %v2792_v47, %s2598_s10  ;;  %v515_v39 = vmul.f32 %v5063_v49, %v503_v1  ;;  %v579_v49 = vsel %vm4985_vm9, 1, %v5042_v52 }
  0xee   : > { %894 = vrot.lane.b32.xlu2 %v2808_v51, %s2598_s10  ;;  %s3127_s10 = sld [smem:[#allocation5 + $0x36]] }
  0xef   : > { %v2897_v8 = vpop.permute.xlu1 %463  ;;  %v2899_v9 = vpop.permute.xlu0 %507 }
  0xf0   : > { %v2901_v10 = vpop.permute.xlu2 %634  ;;  %v467_v54 = vsel %vm460_vm10, %v2897_v8, %v2865_v60  ;;  %v509_v46 = vsel %vm4975_vm14, %v2874_v63, %v2899_v9 }
  0xf4   : > { %v602_v1 = vstv %s3127_s10  ;;  %s3485_s10 = sld [smem:[#allocation5 + $0xb]] }
  0xf5   : > { %919 = vrot.lane.b32.xlu1 %v2792_v47, %s2599_s12  ;;  %917 = vrot.lane.b32.xlu0 %v2795_v48, %s2599_s12 }
  0xf6   : > { %924 = vrot.lane.b32.xlu2 %v2803_v50, %s2599_s12 }
  0xf7   : > { %v2906_v11 = vpop.permute.xlu1 %550  ;;  %v2908_v12 = vpop.permute.xlu0 %548 }
  0xf8   : > { %v2910_v13 = vpop.permute.xlu2 %662  ;;  %v552_v55 = vsel %vm4980_vm6, %v2908_v12, %v2906_v11  ;;  %vm3235_vm6 = vcmp.ne.s32.totalorder %v2168_v28, 0  ;;  %v434_v28 = vadd.f32 %v432_v25, %v2997_v37 }
  0xf9   : > { %v5067_v0 = vsel %vm3235_vm6, 4294967295, %v5066_v0 }
  0xfd   : > { %949 = vrot.lane.b32.xlu1 %v2795_v48, %s2600_s24  ;;  %926 = vrot.lane.b32.xlu0 %v2808_v51, %s2599_s12  ;;  %s2604_s12 = smov 14  }
  0xfe   : > { %951 = vrot.lane.b32.xlu2 %v2792_v47, %s2600_s24 }
  0xff   : > { %v2915_v14 = vpop.permute.xlu1 %591  ;;  %v2917_v15 = vpop.permute.xlu0 %586 }
 0x100   : > { %v2919_v16 = vpop.permute.xlu2 %692 }
 0x105   : > { %958 = vrot.lane.b32.xlu1 %v2808_v51, %s2600_s24  ;;  %956 = vrot.lane.b32.xlu0 %v2803_v50, %s2600_s24  ;;  %s3146_s24 = sld [smem:[#allocation5 + $0x5]] }
 0x106   : > { %981 = vrot.lane.b32.xlu2 %v2795_v48, %s2601_s15 }
 0x107   : > { %v2935_v19 = vpop.permute.xlu1 %629  ;;  %v2937_v20 = vpop.permute.xlu0 %627 }
 0x108   : > { %v2944_v22 = vpop.permute.xlu2 %701 }
 0x10d   : > { %988 = vrot.lane.b32.xlu1 %v2803_v50, %s2601_s15  ;;  %983 = vrot.lane.b32.xlu0 %v2792_v47, %s2601_s15 }
 0x10e   : > { %990 = vrot.lane.b32.xlu2 %v2808_v51, %s2601_s15  ;;  %s2605_s15 = smov 13  }
 0x10f   : > { %v2978_v29 = vpop.permute.xlu1 %660  ;;  %v2980_v30 = vpop.permute.xlu0 %636 }
 0x110   : > { %v2990_v33 = vpop.permute.xlu2 %731 }
 0x115   : > { %1015 = vrot.lane.b32.xlu1 %v2792_v47, %s2603_s8  ;;  %1013 = vrot.lane.b32.xlu0 %v2795_v48, %s2603_s8 }
 0x116   : > { %1020 = vrot.lane.b32.xlu2 %v2803_v50, %s2603_s8 }
 0x117   : > { %v3061_v56 = vpop.permute.xlu1 %669  ;;  %v3063_v59 = vpop.permute.xlu0 %667 }
 0x118   : > { %v3072_v35 = vpop.permute.xlu2 %758 }
 0x119   : > { %5039 = vst [vmem:[#allocation24_spill] sm:$0xff] %v3072_v35  ;;  %v5049_v35 = vmov %v5048_v18 }
 0x11a   : > { %v473_v23 = vmul.f32 %v5049_v35, %v461_v41  ;;  %v476_v35 = vmul.f32 %v5052_v34, %v467_v54  ;;  %v2171_v41 = vrot.slane %v530_v61, 9  ;;  %v5053_v61 = vmov 0 }
 0x11b   : > { %v5054_v61 = vsel %vm3170_vm4, 4294967295, %v5053_v61  ;;  %v390_v34 = vadd.f32 %v388_v58, %v385_v45  ;;  %v468_v45 = vsel %vm460_vm10, %v2865_v60, %v2897_v8  ;;  %v5056_v58 = vmov 0  ;;  %vm3207_vm10 = vmand %vm351_vm5, %vm3067_vm2 }
 0x11c   : > { %v5057_v58 = vsel %vm3191_vm1, 4294967295, %v5056_v58  ;;  %v3213_v8 = vmul.f32 %v5060_v3, %v504_v5  ;;  %v478_v27 = vadd.f32 %v476_v35, %v473_v23  ;;  %vm3215_vm14 = vcmp.ne.s32.totalorder %v2171_v41, 0  ;;  %vm406_vm5 = vmand %vm3122_vm11, %vm3074_vm7 }
 0x11d   : > { %1045 = vrot.lane.b32.xlu1 %v2795_v48, %s2604_s12  ;;  %1022 = vrot.lane.b32.xlu0 %v2808_v51, %s2603_s8  ;;  %v396_v26 = vsel %vm4984_vm12, %v390_v34, %v394_v40  ;;  %v438_v23 = vrot.slane %v435_v6, 6  ;;  %v5064_v35 = vstv %s3036_s7  ;;  %v5065_v5 = vstv %s2995_s6  ;;  %vm3269_vm9 = vmand %vm406_vm5, %vm3105_vm15  ;;  %s3443_s6 = sld [smem:[#allocation5 + $0x3a]] }
 0x11e   : > { %1047 = vrot.lane.b32.xlu2 %v2792_v47, %s2604_s12  ;;  %v518_v41 = vmul.f32 %v5064_v35, %v509_v46  ;;  %v475_v3 = vmul.f32 %v5065_v5, %v468_v45  ;;  %v5068_v40 = vstv %s3059_s30  ;;  %vm3252_vm12 = vcmp.ne.s32.totalorder %v2172_v38, 0  ;;  %vm449_vm5 = vmand %vm3122_vm11, %vm3139_vm3  ;;  %s3458_s8 = sld [smem:[#allocation5 + $0x3b]] }
 0x11f   : > { %v3157_v57 = vpop.permute.xlu1 %699  ;;  %v3159_v18 = vpop.permute.xlu0 %694  ;;  %v561_v34 = vmul.f32 %v5068_v40, %v552_v55  ;;  %v5069_v6 = vmov 0  ;;  %v2175_v46 = vrot.slane %v573_v2, 9  ;;  %v599_v45 = vstv %s3146_s24  ;;  %s3628_s24 = sld [smem:[#allocation5 + $0xc]] }
 0x120   : > { %v3175_v54 = vpop.permute.xlu2 %788  ;;  %v5070_v6 = vsel %vm3252_vm12, 4294967295, %v5069_v6  ;;  %v398_v55 = vsel %vm3207_vm10, %v396_v26, 0.0  ;;  %v481_v25 = vrot.slane %v478_v27, 6  ;;  %v510_v38 = vsel %vm5073_vm8, %v2899_v9, %v2874_v63 }
 0x121   : > { %v3278_v60 = vadd.s32 3, %v2921_v17  ;;  %vm5074_vm10 = vcmask 1041408   ;;  %v520_v27 = vadd.f32 %v518_v41, %v515_v39  ;;  %vm5075_vm8 = vcmp.lt.s32.totalorder %v2940_v21, 47 }
 0x122   : > { %v439_v35 = vsel %vm5074_vm10, %v434_v28, %v438_v23  ;;  %v553_v63 = vsel %vm5075_vm8, %v2906_v11, %v2908_v12  ;;  %v2176_v9 = vrot.slane %v579_v49, 9  ;;  %v477_v40 = vadd.f32 %v475_v3, %v3135_v32 }
 0x123   : > { %v563_v23 = vadd.f32 %v561_v34, %v3065_v44  ;;  %vm5076_vm10 = vcmp.lt.s32.totalorder %v2940_v21, 46  ;;  %v5078_v12 = vstv %s2948_s28  ;;  %v5079_v49 = vstv %s3036_s7  ;;  %s3414_s28 = sld [smem:[#allocation5 + $0x8]]  ;;  %s2606_s7 = smov 3  }
 0x124   : > { %v595_v39 = vsel %vm5076_vm10, %v2915_v14, %v2892_v7  ;;  %vm5077_vm0 = vmmov %vm5076_vm10  ;;  %v399_v41 = vadd.f32 %v398_v55, %v5078_v12  ;;  %v517_v28 = vmul.f32 %v5079_v49, %v510_v38  ;;  %vm3309_vm8 = vcmp.ne.s32.totalorder %v2175_v46, 0 }
 0x125   : > { %1054 = vrot.lane.b32.xlu1 %v2808_v51, %s2604_s12  ;;  %1052 = vrot.lane.b32.xlu0 %v2803_v50, %s2604_s12  ;;  %v589_v11 = vsel %vm5077_vm0, %v2883_v4, %v2917_v15  ;;  %v5080_v32 = vmov 0  ;;  %vm4992_vm15 = vcmp.lt.s32.totalorder %v2940_v21, 45  ;;  %v441_v44 = vsel %vm3269_vm9, %v439_v35, 0.0  ;;  %vm3318_vm10 = vmand %vm449_vm5, %vm3170_vm4  ;;  %s2607_s12 = smov 2  }
 0x126   : > { %1077 = vrot.lane.b32.xlu2 %v2795_v48, %s2605_s15  ;;  %v5081_v32 = vsel %vm3309_vm8, 4294967295, %v5080_v32  ;;  %vm5084_vm0 = vcmask 1041408   ;;  %v5085_v55 = vstv %s3059_s30  ;;  %vm4991_vm3 = vcmp.ge.s32.totalorder %v3278_v60, 0  ;;  %s3464_s30 = sld [smem:[#allocation5 + $0x3c]] }
 0x127   : > { %v3280_v2 = vpop.permute.xlu1 %726  ;;  %v3282_v26 = vpop.permute.xlu0 %724  ;;  %v482_v34 = vsel %vm5084_vm0, %v477_v40, %v481_v25  ;;  %v560_v38 = vmul.f32 %v5085_v55, %v553_v63  ;;  %v523_v46 = vrot.slane %v520_v27, 6  ;;  %v604_v12 = vmul.f32 %v602_v1, %v595_v39  ;;  %vm534_vm0 = vmand %vm3122_vm11, %vm3215_vm14 }
 0x128   : > { %v3293_v5 = vpop.permute.xlu2 %797  ;;  %v601_v37 = vmul.f32 %v599_v45, %v589_v11  ;;  %v642_v35 = vstv %s3231_s25  ;;  %v566_v49 = vrot.slane %v563_v23, 6  ;;  %vm3337_vm5 = vcmp.ne.s32.totalorder %v2176_v9, 0  ;;  %s3639_s25 = sld [smem:[#allocation5 + $0x3d]] }
 0x129   : > { %v5086_v25 = vmov 0  ;;  %v645_v27 = vstv %s3245_s14  ;;  %v638_v63 = vsel %vm4992_vm15, %v2901_v10, %v2980_v30  ;;  %v442_v9 = vadd.f32 %v441_v44, %v399_v41  ;;  %s2608_s14 = smov 1  }
 0x12a   : > { %v5087_v25 = vsel %vm3337_vm5, 4294967295, %v5086_v25  ;;  %v484_v40 = vsel %vm3318_vm10, %v482_v34, 0.0  ;;  %v519_v23 = vadd.f32 %v517_v28, %v3213_v8  ;;  %v616_v39 = vsel %vm4991_vm3, 1, %v5042_v52 }
 0x12b   : > { %v562_v11 = vadd.f32 %v560_v38, %v3050_v31  ;;  %vm5088_vm10 = vcmp.lt.s32.totalorder %v2940_v21, 46  ;;  %v632_v28 = vsel %vm4992_vm15, %v2937_v20, %v2935_v19  ;;  %vm5093_vm3 = vcmask 1041408  }
 0x12c   : > { %v596_v41 = vsel %vm5088_vm10, %v2892_v7, %v2915_v14  ;;  %vm5089_vm9 = vmmov %vm5088_vm10  ;;  %v524_v7 = vsel %vm5093_vm3, %v519_v23, %v523_v46  ;;  %v606_v14 = vadd.f32 %v604_v12, %v601_v37  ;;  %vm5094_vm15 = vcmp.lt.s32.totalorder %v3278_v60, 16 }
 0x12d   : > { %1084 = vrot.lane.b32.xlu1 %v2803_v50, %s2605_s15  ;;  %1079 = vrot.lane.b32.xlu0 %v2792_v47, %s2605_s15  ;;  %v590_v8 = vsel %vm5089_vm9, %v2917_v15, %v2883_v4  ;;  %vm5090_vm10 = vmand %vm3122_vm11, %vm3191_vm1  ;;  %v622_v15 = vsel %vm5094_vm15, 1, %v5042_v52  ;;  %v647_v3 = vmul.f32 %v645_v27, %v638_v63  ;;  %v485_v55 = vadd.f32 %v484_v40, %v442_v9 }
 0x12e   : > { %1086 = vrot.lane.b32.xlu2 %v2808_v51, %s2605_s15  ;;  %vm3389_vm9 = vmand %vm5090_vm10, %vm3235_vm6  ;;  %vm5097_vm10 = vcmask 1041408   ;;  %vm4995_vm15 = vcmp.lt.s32.totalorder %v2940_v21, 35  ;;  %v2179_v46 = vrot.slane %v616_v39, 9  ;;  %v603_v12 = vmul.f32 %v602_v1, %v596_v41  ;;  %s3712_s15 = sld [smem:[#allocation5 + $0xd]] }
 0x12f   : > { %v3378_v44 = vpop.permute.xlu1 %756  ;;  %v3380_v31 = vpop.permute.xlu0 %733  ;;  %vm3408_vm3 = vmand %vm534_vm0, %vm3252_vm12  ;;  %v567_v52 = vsel %vm5097_vm10, %v562_v11, %v566_v49  ;;  %v600_v37 = vmul.f32 %v599_v45, %v590_v8  ;;  %v644_v63 = vmul.f32 %v642_v35, %v632_v28  ;;  %vm5098_vm0 = vcmp.lt.s32.totalorder %v2940_v21, 45 }
 0x130   : > { %v3399_v34 = vpop.permute.xlu2 %827  ;;  %v639_v9 = vsel %vm5098_vm0, %v2980_v30, %v2901_v10  ;;  %v526_v49 = vsel %vm3389_vm9, %v524_v7, 0.0  ;;  %v2180_v40 = vrot.slane %v622_v15, 9  ;;  %v678_v23 = vstv %s3326_s16  ;;  %vm5099_vm10 = vmmov %vm5098_vm0  ;;  %s3720_s16 = sld [smem:[#allocation5 + $0x3e]] }
 0x131   : > { %v671_v1 = vsel %vm4995_vm15, %v3063_v59, %v3061_v56  ;;  %v569_v45 = vsel %vm3408_vm3, %v567_v52, 0.0  ;;  %v609_v39 = vrot.slane %v606_v14, 6  ;;  %v633_v10 = vsel %vm5099_vm10, %v2935_v19, %v2937_v20  ;;  %vm577_vm9 = vmand %vm3122_vm11, %vm3309_vm8 }
 0x132   : > { %v649_v30 = vadd.f32 %v647_v3, %v644_v63  ;;  %v527_v11 = vadd.f32 %v526_v49, %v485_v55  ;;  %v675_v41 = vstv %s3341_s1  ;;  %v665_v8 = vsel %vm4995_vm15, %v2978_v29, %v2910_v13  ;;  %vm3494_vm12 = vmand %vm577_vm9, %vm3337_vm5  ;;  %s2609_s1 = smov 127  }
 0x133   : > { %v646_v28 = vmul.f32 %v645_v27, %v639_v9  ;;  %v605_v19 = vadd.f32 %v603_v12, %v600_v37  ;;  %vm3460_vm3 = vcmp.ne.s32.totalorder %v2179_v46, 0  ;;  %v5100_v20 = vmov 0 }
 0x134   : > { %v5101_v20 = vsel %vm3460_vm3, 4294967295, %v5100_v20  ;;  %v680_v4 = vmul.f32 %v678_v23, %v671_v1  ;;  %v3468_v27 = vadd.f32 %v569_v45, %v527_v11  ;;  %v643_v7 = vmul.f32 %v642_v35, %v633_v10 }
 0x135   : > { %1112 = vrot.lane.b32.xlu1 %v2792_v47, %s2606_s7  ;;  %1110 = vrot.lane.b32.xlu0 %v2795_v48, %s2606_s7  ;;  %vm3472_vm0 = vcmp.ne.s32.totalorder %v2180_v40, 0  ;;  %v5102_v14 = vmov 0  ;;  %v672_v15 = vsel %vm4995_vm15, %v3061_v56, %v3063_v59  ;;  %vm5106_vm15 = vcmask 1041408  }
 0x136   : > { %1117 = vrot.lane.b32.xlu2 %v2803_v50, %s2606_s7  ;;  %v5103_v14 = vsel %vm3472_vm0, 4294967295, %v5102_v14  ;;  %v3499_v56 = vsel %vm5106_vm15, %v605_v19, %v609_v39  ;;  %v677_v59 = vmul.f32 %v675_v41, %v665_v8  ;;  %v652_v38 = vrot.slane %v649_v30, 6 }
 0x137   : > { %v3481_v3 = vpop.permute.xlu1 %765  ;;  %v3483_v55 = vpop.permute.xlu0 %763  ;;  %v710_v52 = vstv %s3397_s27  ;;  %vm5107_vm10 = vcmp.lt.s32.totalorder %v2940_v21, 35  ;;  %v648_v37 = vadd.f32 %v646_v28, %v643_v7  ;;  %v707_v63 = vstv %s3414_s28  ;;  %s3776_s27 = sld [smem:[#allocation5 + $0x3f]] }
 0x138   : > { %v3502_v46 = vpop.permute.xlu2 %854  ;;  %v666_v12 = vsel %vm5107_vm10, %v2910_v13, %v2978_v29  ;;  %v679_v9 = vmul.f32 %v678_v23, %v672_v15  ;;  %v3510_v49 = vadd.f32 %v680_v4, %v677_v59  ;;  %vm5108_vm15 = vcmp.lt.s32.totalorder %v2940_v21, 34  ;;  %s3780_s28 = sld [smem:[#allocation5 + $0xe]] }
 0x139   : > { %v703_v40 = vsel %vm5108_vm15, %v3157_v57, %v2944_v22  ;;  %vm5109_vm5 = vmmov %vm5108_vm15  ;;  %v739_v29 = vstv %s3426_s29  ;;  %v676_v45 = vmul.f32 %v675_v41, %v666_v12  ;;  %vm5110_vm9 = vcmask 1041408   ;;  %s2610_s29 = smov 126  }
 0x13a   : > { %v697_v1 = vsel %vm5109_vm5, %v2919_v16, %v3159_v18  ;;  %v3527_v39 = vsel %vm5110_vm9, %v648_v37, %v652_v38  ;;  %v742_v10 = vstv %s3443_s6  ;;  %vm5111_vm15 = vcmp.lt.s32.totalorder %v2940_v21, 33  ;;  %vm5112_vm9 = vmmov %vm5109_vm5  ;;  %s2200_s6 = sld [smem:[#allocation5 + $0x40]] }
 0x13b   : > { %v735_v30 = vsel %vm5111_vm15, %v2990_v33, %v3380_v31  ;;  %v712_v11 = vmul.f32 %v710_v52, %v703_v40  ;;  %v709_v8 = vmul.f32 %v707_v63, %v697_v1  ;;  %v774_v28 = vstv %s3458_s8  ;;  %vm5113_vm10 = vmmov %vm5111_vm15  ;;  %v5118_v40 = vld [vmem:[#allocation19_spill] sm:$0xff]  ;;  %s3851_s8 = sld [smem:[#allocation5 + $0x10]] }
 0x13c   : > { %v681_v41 = vadd.f32 %v679_v9, %v676_v45  ;;  %v685_v19 = vrot.slane %v3510_v49, 6  ;;  %v704_v4 = vsel %vm5112_vm9, %v2944_v22, %v3157_v57  ;;  %v806_v7 = vstv %s3464_s30  ;;  %s3853_s30 = sld [smem:[#allocation5 + $0x41]] }
 0x13d   : > { %1142 = vrot.lane.b32.xlu1 %v2795_v48, %s2607_s12  ;;  %1119 = vrot.lane.b32.xlu0 %v2808_v51, %s2606_s7  ;;  %v698_v15 = vsel %vm5109_vm5, %v3159_v18, %v2919_v16  ;;  %v729_v59 = vsel %vm5113_vm10, %v3282_v26, %v3280_v2  ;;  %v744_v22 = vmul.f32 %v742_v10, %v735_v30  ;;  %v803_v38 = vstv %s3485_s10  ;;  %s2611_s7 = smov 125   ;;  %s2612_s10 = smov 115  }
 0x13e   : > { %1144 = vrot.lane.b32.xlu2 %v2792_v47, %s2607_s12  ;;  %vm5114_vm9 = vcmp.lt.s32.totalorder %v2940_v21, 32  ;;  %vm5115_vm15 = vcmp.lt.s32.totalorder %v2940_v21, 31  ;;  %vm5119_vm8 = vcmp.lt.s32.totalorder %v5118_v40, 16  ;;  %vm5120_vm6 = vcmp.ge.s32.totalorder %v5118_v40, 0 }
 0x13f   : > { %v796_v57 = vpop.permute.xlu1 %795  ;;  %v791_v12 = vpop.permute.xlu0 %790  ;;  %v767_v37 = vsel %vm5114_vm9, %v3483_v55, %v3481_v3  ;;  %vm5116_vm5 = vmmov %vm5115_vm15  ;;  %v714_v45 = vadd.f32 %v712_v11, %v709_v8  ;;  %v741_v11 = vmul.f32 %v739_v29, %v729_v59  ;;  %v5127_v8 = vld [vmem:[#allocation24_spill] sm:$0xff] }
 0x140   : > { %v799_v9 = vsel %vm5115_vm15, %v796_v57, %v3293_v5  ;;  %v800_v16 = vsel %vm5116_vm5, %v3293_v5, %v796_v57  ;;  %vm5117_vm10 = vmmov %vm5116_vm5  ;;  %v3574_v49 = vpop.permute.xlu2 %885  ;;  %v776_v40 = vmul.f32 %v774_v28, %v767_v37 }
 0x141   : > { %v793_v18 = vsel %vm5117_vm10, %v3175_v54, %v791_v12  ;;  %vm3580_vm9 = vmand %vm5120_vm6, %vm5119_vm8  ;;  %v807_v30 = vmul.f32 %v806_v7, %v800_v16  ;;  %v808_v13 = vmul.f32 %v806_v7, %v799_v9  ;;  %vm5128_vm6 = vcmp.lt.s32.totalorder %v2940_v21, 32 }
 0x142   : > { %vm5123_vm15 = vmmov %vm5116_vm5  ;;  %v761_v7 = vsel %vm5128_vm6, %v3378_v44, %v5127_v8  ;;  %v711_v9 = vmul.f32 %v710_v52, %v704_v4  ;;  %v708_v16 = vmul.f32 %v707_v63, %v698_v15  ;;  %vm5133_vm6 = vcmask 1041408  }
 0x143   : > { %v794_v5 = vsel %vm5123_vm15, %v791_v12, %v3175_v54  ;;  %vm5124_vm5 = vmand %vm3122_vm11, %vm3460_vm3  ;;  %v805_v12 = vmul.f32 %v803_v38, %v793_v18  ;;  %vm5129_vm11 = vcmp.lt.s32.totalorder %v2940_v21, 33 }
 0x144   : > { %vm3594_vm10 = vmand %vm5124_vm5, %vm3472_vm0  ;;  %v804_v54 = vmul.f32 %v803_v38, %v794_v5  ;;  %v736_v43 = vsel %vm5129_vm11, %v3380_v31, %v2990_v33  ;;  %v746_v38 = vadd.f32 %v744_v22, %v741_v11  ;;  %v717_v33 = vrot.slane %v714_v45, 6 }
 0x145   : > { %vm658_vm8 = vmand %vm3580_vm9, %vm3027_vm13  ;;  %v810_v63 = vadd.f32 %v808_v13, %v805_v12  ;;  %v655_v4 = vsel %vm3594_vm10, %v3527_v39, 0.0  ;;  %v5132_v31 = vstv %s3435_s5  ;;  %1151 = vrot.lane.b32.xlu1 %v2808_v51, %s2607_s12  ;;  %1149 = vrot.lane.b32.xlu0 %v2803_v50, %s2607_s12  ;;  %vm5002_vm5 = vcmp.lt.s32.totalorder %v2940_v21, 30  ;;  %s2199_s5 = sld [smem:[#allocation5 + $0xf]] }
 0x146   : > { %vm5131_vm15 = vmmov %vm5129_vm11  ;;  %v809_v52 = vadd.f32 %v807_v30, %v804_v54  ;;  %v773_v15 = vmul.f32 %v5132_v31, %v761_v7  ;;  %vm5134_vm11 = vcmp.lt.s32.totalorder %v2940_v21, 32  ;;  %1174 = vrot.lane.b32.xlu2 %v2795_v48, %s2608_s14  ;;  %v749_v45 = vrot.slane %v746_v38, 6  ;;  %s3884_s12 = sld [smem:[#allocation5 + $0x42]] }
 0x147   : > { %v730_v59 = vsel %vm5131_vm15, %v3280_v2, %v3282_v26  ;;  %v686_v2 = vsel %vm5133_vm6, %v681_v41, %v685_v19  ;;  %v743_v26 = vmul.f32 %v742_v10, %v736_v43  ;;  %v768_v13 = vsel %vm5134_vm11, %v3481_v3, %v3483_v55  ;;  %vm3650_vm15 = vmand %vm658_vm8, %vm3067_vm2  ;;  %v823_v37 = vpop.permute.xlu1 %822  ;;  %v821_v18 = vpop.permute.xlu0 %820 }
 0x148   : > { %v813_v39 = vrot.slane %v810_v63, 6  ;;  %v713_v3 = vadd.f32 %v711_v9, %v708_v16  ;;  %v740_v55 = vmul.f32 %v739_v29, %v730_v59  ;;  %vm5138_vm6 = vmmov %vm5134_vm11  ;;  %v778_v19 = vadd.f32 %v776_v40, %v773_v15  ;;  %v3669_v57 = vpop.permute.xlu2 %894 }
 0x149   : > { %v762_v41 = vsel %vm5138_vm6, %v5127_v8, %v3378_v44  ;;  %vm5139_vm11 = vnez %v5051_v42  ;;  %vm5140_vm10 = vcmask 1041408   ;;  %v825_v29 = vsel %vm5002_vm5, %v821_v18, %v823_v37 }
 0x14a   : > { %vm722_vm8 = vmand %vm3580_vm9, %vm5139_vm11  ;;  %v814_v30 = vsel %vm5140_vm10, %v809_v52, %v813_v39  ;;  %v826_v5 = vsel %vm5002_vm5, %v823_v37, %v821_v18  ;;  %v5141_v44 = vsel %vm3494_vm12, %v3499_v56, 0.0  ;;  %vm5142_vm6 = vnez %v5044_v36 }
 0x14b   : > { %v613_v11 = vadd.f32 %v5141_v44, %v3468_v27  ;;  %vm5143_vm10 = vmand %vm3580_vm9, %vm3074_vm7  ;;  %vm5146_vm5 = vcmask 1041408   ;;  %v775_v54 = vmul.f32 %v774_v28, %v768_v13  ;;  %v688_v35 = vsel %vm3650_vm15, %v686_v2, 0.0 }
 0x14c   : > { %vm3683_vm11 = vmand %vm5143_vm10, %vm5142_vm6  ;;  %v718_v7 = vsel %vm5146_vm5, %v713_v3, %v717_v33  ;;  %v745_v27 = vadd.f32 %v743_v26, %v740_v55  ;;  %v5147_v12 = vmov %v5132_v31  ;;  %v781_v43 = vrot.slane %v778_v19, 6 }
 0x14d   : > { %v656_v56 = vadd.f32 %v655_v4, %v613_v11  ;;  %v772_v9 = vmul.f32 %v5147_v12, %v762_v41  ;;  %vm3696_vm12 = vmand %vm722_vm8, %vm3170_vm4  ;;  %v720_v40 = vsel %vm3683_vm11, %v718_v7, 0.0  ;;  %1181 = vrot.lane.b32.xlu1 %v2803_v50, %s2608_s14  ;;  %1176 = vrot.lane.b32.xlu0 %v2792_v47, %s2608_s14  ;;  %v835_v52 = vstv %s3628_s24  ;;  %s3888_s24 = sld [smem:[#allocation5 + $0x11]] }
 0x14e   : > { %v750_v28 = vsel %vm5146_vm5, %v745_v27, %v749_v45  ;;  %vm754_vm15 = vmand %vm3580_vm9, %vm3191_vm1  ;;  %v838_v63 = vstv %s3639_s25  ;;  %1183 = vrot.lane.b32.xlu2 %v2808_v51, %s2608_s14  ;;  %vm5150_vm10 = vnez %v5067_v0  ;;  %vm5153_vm8 = vcmask 1041408   ;;  %s2613_s25 = smov 114   ;;  %s2205_s14 = sld [smem:[#allocation5 + $0x12]] }
 0x14f   : > { %v689_v59 = vadd.f32 %v688_v35, %v656_v56  ;;  %v777_v38 = vadd.f32 %v775_v54, %v772_v9  ;;  %v752_v33 = vsel %vm3696_vm12, %v750_v28, 0.0  ;;  %vm3728_vm5 = vmand %vm754_vm15, %vm5150_vm10  ;;  %v853_v2 = vpop.permute.xlu1 %852  ;;  %v830_v26 = vpop.permute.xlu0 %829  ;;  %vm5154_vm11 = vcmp.lt.s32.totalorder %v2940_v21, 29 }
 0x150   : > { %v857_v13 = vsel %vm5154_vm11, %v853_v2, %v3502_v46  ;;  %vm5155_vm1 = vmmov %vm5154_vm11  ;;  %vm5156_vm12 = vcmp.lt.s32.totalorder %v2940_v21, 30  ;;  %v3745_v55 = vpop.permute.xlu2 %924  ;;  %v836_v41 = vmul.f32 %v835_v52, %v826_v5  ;;  %v837_v19 = vmul.f32 %v835_v52, %v825_v29 }
 0x151   : > { %v721_v4 = vadd.f32 %v720_v40, %v689_v59  ;;  %v782_v15 = vsel %vm5153_vm8, %v777_v38, %v781_v43  ;;  %v858_v39 = vsel %vm5155_vm1, %v3502_v46, %v853_v2  ;;  %v831_v10 = vsel %vm5156_vm12, %v3399_v34, %v830_v26  ;;  %vm5157_vm15 = vmmov %vm5156_vm12 }
 0x152   : > { %v832_v3 = vsel %vm5157_vm15, %v830_v26, %v3399_v34  ;;  %vm5158_vm8 = vnez %v5070_v6  ;;  %vm5159_vm11 = vmand %vm3580_vm9, %vm3215_vm14  ;;  %v840_v18 = vmul.f32 %v838_v63, %v831_v10  ;;  %v784_v34 = vsel %vm3728_vm5, %v782_v15, 0.0 }
 0x153   : > { %vm3754_vm10 = vmand %vm5159_vm11, %vm5158_vm8  ;;  %v839_v37 = vmul.f32 %v838_v63, %v832_v3  ;;  %vm5162_vm1 = vnez %v5081_v32  ;;  %v753_v45 = vadd.f32 %v752_v33, %v721_v4  ;;  %v867_v5 = vstv %s3712_s15  ;;  %s2206_s15 = sld [smem:[#allocation5 + $0x43]] }
 0x154   : > { %vm818_vm12 = vmand %vm3580_vm9, %vm5162_vm1  ;;  %v842_v11 = vadd.f32 %v840_v18, %v837_v19  ;;  %v816_v8 = vsel %vm3754_vm10, %v814_v30, 0.0  ;;  %vm5163_vm15 = vnez %v5087_v25  ;;  %v870_v35 = vstv %s3720_s16  ;;  %s2614_s16 = smov 113  }
 0x155   : > { %v841_v44 = vadd.f32 %v839_v37, %v836_v41  ;;  %v785_v7 = vadd.f32 %v784_v34, %v753_v45  ;;  %vm3769_vm11 = vmand %vm818_vm12, %vm5163_vm15  ;;  %1225 = vrot.lane.b32.xlu1 %v2792_v47, %s2609_s1  ;;  %1223 = vrot.lane.b32.xlu0 %v2795_v48, %s2609_s1  ;;  %vm5166_vm10 = vcmask 1041408   ;;  %v868_v9 = vmul.f32 %v867_v5, %v858_v39  ;;  %v5172_v41 = vld [vmem:[#allocation20_spill] sm:$0xff] }
 0x156   : > { %v845_v54 = vrot.slane %v842_v11, 6  ;;  %1230 = vrot.lane.b32.xlu2 %v2803_v50, %s2609_s1  ;;  %vm5167_vm5 = vcmp.lt.s32.totalorder %v2940_v21, 29  ;;  %v869_v59 = vmul.f32 %v867_v5, %v857_v13  ;;  %v903_v2 = vstv %s3776_s27  ;;  %s3945_s27 = sld [smem:[#allocation5 + $0x44]] }
 0x157   : > { %v817_v30 = vadd.f32 %v816_v8, %v785_v7  ;;  %v862_v56 = vpop.permute.xlu1 %861  ;;  %v860_v12 = vpop.permute.xlu0 %859  ;;  %vm5168_vm12 = vmmov %vm5167_vm5  ;;  %v900_v13 = vstv %s3780_s28  ;;  %s2615_s28 = smov 112  }
 0x158   : > { %v846_v27 = vsel %vm5166_vm10, %v841_v44, %v845_v54  ;;  %v863_v43 = vsel %vm5167_vm5, %v860_v12, %v862_v56  ;;  %v864_v40 = vsel %vm5168_vm12, %v862_v56, %v860_v12  ;;  %v3788_v28 = vpop.permute.xlu2 %951  ;;  %vm850_vm10 = vmand %vm3580_vm9, %vm3460_vm3  ;;  %vm889_vm5 = vcmp.lt.s32.totalorder %v2940_v21, 19 }
 0x159   : > { %v848_v16 = vsel %vm3769_vm11, %v846_v27, 0.0  ;;  %v871_v52 = vmul.f32 %v870_v35, %v864_v40  ;;  %v872_v63 = vmul.f32 %v870_v35, %v863_v43  ;;  %vm3796_vm11 = vmand %vm850_vm10, %vm3472_vm0  ;;  %vm5171_vm9 = vcmask 1041408  }
 0x15a   : > { %v849_v38 = vadd.f32 %v848_v16, %v817_v30  ;;  %vm5173_vm12 = vcmp.lt.s32.totalorder %v5172_v41, 16  ;;  %vm5174_vm10 = vcmp.ge.s32.totalorder %v5172_v41, 0  ;;  %v932_v16 = vstv %s2199_s5  ;;  %s3980_s5 = sld [smem:[#allocation5 + $0x14]] }
 0x15b   : > { %v873_v4 = vadd.f32 %v871_v52, %v868_v9  ;;  %v874_v33 = vadd.f32 %v872_v63, %v869_v59  ;;  %vm3819_vm0 = vmand %vm5174_vm10, %vm5173_vm12  ;;  %vm953_vm10 = vcmp.lt.s32.totalorder %v2940_v21, 17  ;;  %v935_v43 = vstv %s2200_s6  ;;  %s2616_s6 = smov 111  }
 0x15d   : > { %v877_v15 = vrot.slane %v874_v33, 6  ;;  %1255 = vrot.lane.b32.xlu1 %v2795_v48, %s2610_s29  ;;  %1232 = vrot.lane.b32.xlu0 %v2808_v51, %s2609_s1  ;;  %s3943_s1 = sld [smem:[#allocation5 + $0x13]] }
 0x15e   : > { %1257 = vrot.lane.b32.xlu2 %v2792_v47, %s2610_s29 }
 0x15f   : > { %v878_v1 = vsel %vm5171_vm9, %v873_v4, %v877_v15  ;;  %v893_v26 = vpop.permute.xlu1 %892  ;;  %v888_v39 = vpop.permute.xlu0 %887  ;;  %vm921_vm9 = vcmp.lt.s32.totalorder %v2940_v21, 18 }
 0x160   : > { %v880_v10 = vsel %vm3796_vm11, %v878_v1, 0.0  ;;  %v896_v3 = vsel %vm889_vm5, %v893_v26, %v3669_v57  ;;  %v897_v46 = vsel %vm889_vm5, %v3669_v57, %v893_v26  ;;  %v890_v37 = vsel %vm889_vm5, %v3574_v49, %v888_v39  ;;  %v3826_v18 = vpop.permute.xlu2 %981  ;;  %vm883_vm11 = vmand %vm3819_vm0, %vm3027_vm13 }
 0x161   : > { %v881_v34 = vadd.f32 %v880_v10, %v849_v38  ;;  %v904_v45 = vmul.f32 %v903_v2, %v897_v46  ;;  %v905_v44 = vmul.f32 %v903_v2, %v896_v3  ;;  %v891_v57 = vsel %vm889_vm5, %v888_v39, %v3574_v49  ;;  %vm884_vm12 = vmand %vm883_vm11, %vm3067_vm2 }
 0x162   : > { %v901_v11 = vmul.f32 %v900_v13, %v891_v57  ;;  %v902_v8 = vmul.f32 %v900_v13, %v890_v37  ;;  %vm5177_vm5 = vcmask 1041408   ;;  %vm915_vm11 = vmand %vm3819_vm0, %vm3074_vm7  ;;  %v964_v13 = vstv %s3851_s8  ;;  %s2212_s8 = sld [smem:[#allocation5 + $0x46]] }
 0x163   : > { %v967_v10 = vstv %s3853_s30  ;;  %s2617_s30 = smov 110  }
 0x164   : > { %v906_v7 = vadd.f32 %v904_v45, %v901_v11  ;;  %v907_v5 = vadd.f32 %v905_v44, %v902_v8 }
 0x165   : > { %1264 = vrot.lane.b32.xlu1 %v2808_v51, %s2610_s29  ;;  %1262 = vrot.lane.b32.xlu0 %v2803_v50, %s2610_s29  ;;  %s3976_s29 = sld [smem:[#allocation5 + $0x45]] }
 0x166   : > { %v910_v49 = vrot.slane %v907_v5, 6  ;;  %1287 = vrot.lane.b32.xlu2 %v2795_v48, %s2611_s7 }
 0x167   : > { %v920_v29 = vpop.permute.xlu1 %919  ;;  %v918_v54 = vpop.permute.xlu0 %917 }
 0x168   : > { %v911_v35 = vsel %vm5177_vm5, %v906_v7, %v910_v49  ;;  %v922_v30 = vsel %vm921_vm9, %v918_v54, %v920_v29  ;;  %v923_v27 = vsel %vm921_vm9, %v920_v29, %v918_v54  ;;  %v3846_v56 = vpop.permute.xlu2 %990 }
 0x169   : > { %v913_v12 = vsel %vm884_vm12, %v911_v35, 0.0  ;;  %v933_v31 = vmul.f32 %v932_v16, %v923_v27  ;;  %v934_v15 = vmul.f32 %v932_v16, %v922_v30  ;;  %vm3877_vm12 = vmand %vm915_vm11, %vm5142_vm6  ;;  %v999_v30 = vstv %s3884_s12  ;;  %s4040_s12 = sld [smem:[#allocation5 + $0x47]] }
 0x16a   : > { %v914_v9 = vadd.f32 %v913_v12, %v881_v34 }
 0x16d   : > { %1294 = vrot.lane.b32.xlu1 %v2803_v50, %s2611_s7  ;;  %1289 = vrot.lane.b32.xlu0 %v2792_v47, %s2611_s7 }
 0x16e   : > { %1296 = vrot.lane.b32.xlu2 %v2808_v51, %s2611_s7  ;;  %s4022_s7 = sld [smem:[#allocation5 + $0x15]] }
 0x16f   : > { %v950_v40 = vpop.permute.xlu1 %949  ;;  %v927_v59 = vpop.permute.xlu0 %926 }
 0x170   : > { %v954_v38 = vsel %vm953_vm10, %v950_v40, %v3788_v28  ;;  %v955_v52 = vsel %vm953_vm10, %v3788_v28, %v950_v40  ;;  %v928_v63 = vsel %vm921_vm9, %v3745_v55, %v927_v59  ;;  %v929_v4 = vsel %vm921_vm9, %v927_v59, %v3745_v55  ;;  %v3868_v33 = vpop.permute.xlu2 %1020  ;;  %vm5180_vm9 = vmmov %vm5177_vm5 }
 0x171   : > { %v936_v2 = vmul.f32 %v935_v43, %v929_v4  ;;  %v937_v1 = vmul.f32 %v935_v43, %v928_v63  ;;  %v965_v37 = vmul.f32 %v964_v13, %v955_v52  ;;  %v966_v11 = vmul.f32 %v964_v13, %v954_v38 }
 0x172   : > { %vm5181_vm5 = vnez %v5051_v42 }
 0x173   : > { %v938_v28 = vadd.f32 %v936_v2, %v933_v31  ;;  %v939_v26 = vadd.f32 %v937_v1, %v934_v15  ;;  %vm947_vm11 = vmand %vm3819_vm0, %vm5181_vm5 }
 0x175   : > { %v942_v55 = vrot.slane %v939_v26, 6  ;;  %1322 = vrot.lane.b32.xlu1 %v2792_v47, %s2612_s10  ;;  %1320 = vrot.lane.b32.xlu0 %v2795_v48, %s2612_s10 }
 0x176   : > { %1327 = vrot.lane.b32.xlu2 %v2803_v50, %s2612_s10 }
 0x177   : > { %v943_v3 = vsel %vm5180_vm9, %v938_v28, %v942_v55  ;;  %v959_v46 = vpop.permute.xlu1 %958  ;;  %v957_v41 = vpop.permute.xlu0 %956 }
 0x178   : > { %v945_v34 = vsel %vm3877_vm12, %v943_v3, 0.0  ;;  %v960_v45 = vsel %vm953_vm10, %v957_v41, %v959_v46  ;;  %v961_v44 = vsel %vm953_vm10, %v959_v46, %v957_v41  ;;  %v3896_v57 = vpop.permute.xlu2 %1047  ;;  %vm3904_vm12 = vmand %vm947_vm11, %vm3170_vm4  ;;  %vm985_vm10 = vcmp.lt.s32.totalorder %v2940_v21, 16 }
 0x179   : > { %v946_v8 = vadd.f32 %v945_v34, %v914_v9  ;;  %v968_v7 = vmul.f32 %v967_v10, %v961_v44  ;;  %v969_v5 = vmul.f32 %v967_v10, %v960_v45  ;;  %v996_v9 = vstv %s3888_s24  ;;  %s2618_s24 = smov 109  }
 0x17a   : > { %vm5184_vm11 = vnez %v5057_v58  ;;  %vm5185_vm4 = vnez %v5067_v0  ;;  %v1031_v34 = vstv %s2206_s15  ;;  %s4097_s15 = sld [smem:[#allocation5 + $0x18]] }
 0x17b   : > { %v970_v49 = vadd.f32 %v968_v7, %v965_v37  ;;  %v971_v29 = vadd.f32 %v969_v5, %v966_v11  ;;  %v1028_v37 = vstv %s2205_s14  ;;  %s4083_s14 = sld [smem:[#allocation5 + $0x17]] }
 0x17d   : > { %v974_v35 = vrot.slane %v971_v29, 6  ;;  %1352 = vrot.lane.b32.xlu1 %v2795_v48, %s2613_s25  ;;  %1329 = vrot.lane.b32.xlu0 %v2808_v51, %s2612_s10  ;;  %s4037_s10 = sld [smem:[#allocation5 + $0x16]] }
 0x17e   : > { %1354 = vrot.lane.b32.xlu2 %v2792_v47, %s2613_s25 }
 0x17f   : > { %v975_v27 = vsel %vm5180_vm9, %v970_v49, %v974_v35  ;;  %v989_v12 = vpop.permute.xlu1 %988  ;;  %v984_v16 = vpop.permute.xlu0 %983  ;;  %vm1017_vm9 = vcmp.lt.s32.totalorder %v2940_v21, 15 }
 0x180   : > { %v977_v43 = vsel %vm3904_vm12, %v975_v27, 0.0  ;;  %v992_v40 = vsel %vm985_vm10, %v989_v12, %v3846_v56  ;;  %v993_v59 = vsel %vm985_vm10, %v3846_v56, %v989_v12  ;;  %v986_v38 = vsel %vm985_vm10, %v3826_v18, %v984_v16  ;;  %v3920_v52 = vpop.permute.xlu2 %1077  ;;  %vm979_vm12 = vmand %vm3819_vm0, %vm5184_vm11 }
 0x181   : > { %v978_v63 = vadd.f32 %v977_v43, %v946_v8  ;;  %v1000_v4 = vmul.f32 %v999_v30, %v993_v59  ;;  %v1001_v31 = vmul.f32 %v999_v30, %v992_v40  ;;  %v987_v15 = vsel %vm985_vm10, %v984_v16, %v3826_v18  ;;  %vm980_vm5 = vmand %vm979_vm12, %vm5185_vm4 }
 0x182   : > { %v997_v2 = vmul.f32 %v996_v9, %v987_v15  ;;  %v998_v1 = vmul.f32 %v996_v9, %v986_v38  ;;  %vm5186_vm10 = vcmask 1041408   ;;  %vm1049_vm12 = vcmp.lt.s32.totalorder %v2940_v21, 14 }
 0x183   : > { %v1060_v12 = vstv %s3943_s1  ;;  %v1063_v16 = vstv %s3945_s27  ;;  %s2619_s1 = smov 99   ;;  %s4131_s27 = sld [smem:[#allocation5 + $0x19]] }
 0x184   : > { %v1002_v28 = vadd.f32 %v1000_v4, %v997_v2  ;;  %v1003_v26 = vadd.f32 %v1001_v31, %v998_v1 }
 0x185   : > { %1361 = vrot.lane.b32.xlu1 %v2808_v51, %s2613_s25  ;;  %1359 = vrot.lane.b32.xlu0 %v2803_v50, %s2613_s25  ;;  %s4079_s25 = sld [smem:[#allocation5 + $0x48]] }
 0x186   : > { %v1006_v18 = vrot.slane %v1003_v26, 6  ;;  %1384 = vrot.lane.b32.xlu2 %v2795_v48, %s2614_s16 }
 0x187   : > { %v1016_v56 = vpop.permute.xlu1 %1015  ;;  %v1014_v13 = vpop.permute.xlu0 %1013 }
 0x188   : > { %v1007_v39 = vsel %vm5186_vm10, %v1002_v28, %v1006_v18  ;;  %v1018_v55 = vsel %vm1017_vm9, %v1014_v13, %v1016_v56  ;;  %v1019_v10 = vsel %vm1017_vm9, %v1016_v56, %v1014_v13  ;;  %v3938_v3 = vpop.permute.xlu2 %1086 }
 0x189   : > { %v1009_v46 = vsel %vm980_vm5, %v1007_v39, 0.0  ;;  %v1029_v29 = vmul.f32 %v1028_v37, %v1019_v10  ;;  %v1030_v54 = vmul.f32 %v1028_v37, %v1018_v55  ;;  %vm1011_vm5 = vmand %vm3819_vm0, %vm3215_vm14  ;;  %v1095_v55 = vstv %s3976_s29  ;;  %s2620_s29 = smov 98  }
 0x18a   : > { %v1010_v41 = vadd.f32 %v1009_v46, %v978_v63  ;;  %vm3969_vm10 = vmand %vm1011_vm5, %vm5158_vm8 }
 0x18b   : > { %vm1043_vm5 = vmand %vm3819_vm0, %vm5162_vm1 }
 0x18d   : > { %1391 = vrot.lane.b32.xlu1 %v2803_v50, %s2614_s16  ;;  %1386 = vrot.lane.b32.xlu0 %v2792_v47, %s2614_s16 }
 0x18e   : > { %1393 = vrot.lane.b32.xlu2 %v2808_v51, %s2614_s16  ;;  %s4099_s16 = sld [smem:[#allocation5 + $0x49]] }
 0x18f   : > { %v1046_v45 = vpop.permute.xlu1 %1045  ;;  %v1023_v44 = vpop.permute.xlu0 %1022 }
 0x190   : > { %v1050_v11 = vsel %vm1049_vm12, %v1046_v45, %v3896_v57  ;;  %v1051_v8 = vsel %vm1049_vm12, %v3896_v57, %v1046_v45  ;;  %v1024_v7 = vsel %vm1017_vm9, %v3868_v33, %v1023_v44  ;;  %v1025_v5 = vsel %vm1017_vm9, %v1023_v44, %v3868_v33  ;;  %v3960_v49 = vpop.permute.xlu2 %1117 }
 0x191   : > { %v1032_v35 = vmul.f32 %v1031_v34, %v1025_v5  ;;  %v1033_v30 = vmul.f32 %v1031_v34, %v1024_v7  ;;  %vm5189_vm9 = vcmask 1041408   ;;  %v1061_v38 = vmul.f32 %v1060_v12, %v1051_v8 }
 0x192   : > { %v1062_v2 = vmul.f32 %v1060_v12, %v1050_v11 }
 0x193   : > { %v1034_v57 = vadd.f32 %v1032_v35, %v1029_v29  ;;  %v1035_v27 = vadd.f32 %v1033_v30, %v1030_v54 }
 0x195   : > { %v1038_v33 = vrot.slane %v1035_v27, 6  ;;  %1418 = vrot.lane.b32.xlu1 %v2792_v47, %s2615_s28  ;;  %1416 = vrot.lane.b32.xlu0 %v2795_v48, %s2615_s28 }
 0x196   : > { %1423 = vrot.lane.b32.xlu2 %v2803_v50, %s2615_s28 }
 0x197   : > { %v1039_v43 = vsel %vm5189_vm9, %v1034_v57, %v1038_v33  ;;  %v1055_v40 = vpop.permute.xlu1 %1054  ;;  %v1053_v59 = vpop.permute.xlu0 %1052 }
 0x198   : > { %v1041_v63 = vsel %vm3969_vm10, %v1039_v43, 0.0  ;;  %v1056_v4 = vsel %vm1049_vm12, %v1053_v59, %v1055_v40  ;;  %v1057_v31 = vsel %vm1049_vm12, %v1055_v40, %v1053_v59  ;;  %v3988_v15 = vpop.permute.xlu2 %1144  ;;  %vm3996_vm10 = vmand %vm1043_vm5, %vm5163_vm15  ;;  %vm1081_vm12 = vcmp.lt.s32.totalorder %v2940_v21, 13 }
 0x199   : > { %v1042_v1 = vadd.f32 %v1041_v63, %v1010_v41  ;;  %v1064_v28 = vmul.f32 %v1063_v16, %v1057_v31  ;;  %v1065_v26 = vmul.f32 %v1063_v16, %v1056_v4  ;;  %v1092_v41 = vstv %s3980_s5  ;;  %vm1075_vm5 = vmand %vm3819_vm0, %vm3460_vm3  ;;  %s4155_s5 = sld [smem:[#allocation5 + $0x1a]] }
 0x19a   : > { %vm5193_vm0 = vcmask 1041408   ;;  %v1125_v59 = vstv %s4022_s7  ;;  %s2622_s7 = smov 97  }
 0x19b   : > { %v1066_v18 = vadd.f32 %v1064_v28, %v1061_v38  ;;  %v1067_v56 = vadd.f32 %v1065_v26, %v1062_v2  ;;  %v1128_v38 = vstv %s2212_s8  ;;  %s4202_s8 = sld [smem:[#allocation5 + $0x4c]] }
 0x19d   : > { %v1070_v39 = vrot.slane %v1067_v56, 6  ;;  %1448 = vrot.lane.b32.xlu1 %v2795_v48, %s2616_s6  ;;  %1425 = vrot.lane.b32.xlu0 %v2808_v51, %s2615_s28  ;;  %s4139_s28 = sld [smem:[#allocation5 + $0x4a]] }
 0x19e   : > { %1450 = vrot.lane.b32.xlu2 %v2792_v47, %s2616_s6 }
 0x19f   : > { %v1071_v10 = vsel %vm5189_vm9, %v1066_v18, %v1070_v39  ;;  %v1085_v46 = vpop.permute.xlu1 %1084  ;;  %v1080_v37 = vpop.permute.xlu0 %1079  ;;  %vm5192_vm9 = vnez %v5103_v14 }
 0x1a0   : > { %v1073_v34 = vsel %vm3996_vm10, %v1071_v10, 0.0  ;;  %v1088_v45 = vsel %vm1081_vm12, %v1085_v46, %v3938_v3  ;;  %v1089_v44 = vsel %vm1081_vm12, %v3938_v3, %v1085_v46  ;;  %v1082_v11 = vsel %vm1081_vm12, %v3920_v52, %v1080_v37  ;;  %v4012_v8 = vpop.permute.xlu2 %1174 }
 0x1a1   : > { %v1074_v7 = vadd.f32 %v1073_v34, %v1042_v1  ;;  %v1096_v5 = vmul.f32 %v1095_v55, %v1089_v44  ;;  %v1097_v29 = vmul.f32 %v1095_v55, %v1088_v45  ;;  %v1083_v54 = vsel %vm1081_vm12, %v1080_v37, %v3920_v52  ;;  %vm1076_vm12 = vmand %vm1075_vm5, %vm5192_vm9 }
 0x1a2   : > { %v1093_v35 = vmul.f32 %v1092_v41, %v1083_v54  ;;  %v1094_v30 = vmul.f32 %v1092_v41, %v1082_v11  ;;  %vm5009_vm10 = vcmp.lt.s32.totalorder %v2940_v21, 3  ;;  %vm1146_vm5 = vcmp.lt.s32.totalorder %v2940_v21, 2 }
 0x1a3   : > { %vm5198_vm9 = vcmp.lt.s32.totalorder %v2940_v21, 3  ;;  %v1157_v10 = vstv %s4037_s10  ;;  %v1160_v41 = vstv %s4040_s12  ;;  %s2623_s10 = smov 96   ;;  %s4248_s12 = sld [smem:[#allocation5 + $0x1c]] }
 0x1a4   : > { %v1098_v57 = vadd.f32 %v1096_v5, %v1093_v35  ;;  %v1099_v27 = vadd.f32 %v1097_v29, %v1094_v30  ;;  %vm5199_vm3 = vmmov %vm5198_vm9 }
 0x1a5   : > { %1457 = vrot.lane.b32.xlu1 %v2808_v51, %s2616_s6  ;;  %1455 = vrot.lane.b32.xlu0 %v2803_v50, %s2616_s6  ;;  %s4163_s6 = sld [smem:[#allocation5 + $0x4b]] }
 0x1a6   : > { %v1102_v52 = vrot.slane %v1099_v27, 6  ;;  %1480 = vrot.lane.b32.xlu2 %v2795_v48, %s2617_s30 }
 0x1a7   : > { %v1113_v19 = vpop.permute.xlu1 %1112  ;;  %v1111_v3 = vpop.permute.xlu0 %1110 }
 0x1a8   : > { %v1103_v12 = vsel %vm5193_vm0, %v1098_v57, %v1102_v52  ;;  %v1115_v9 = vsel %vm5009_vm10, %v1111_v3, %v1113_v19  ;;  %v1116_v33 = vsel %vm5009_vm10, %v1113_v19, %v1111_v3  ;;  %v4032_v16 = vpop.permute.xlu2 %1183  ;;  %vm5194_vm0 = vcmp.lt.s32.totalorder %v2921_v17, 16 }
 0x1a9   : > { %v1105_v43 = vsel %vm1076_vm12, %v1103_v12, 0.0  ;;  %vm5195_vm12 = vcmp.ge.s32.totalorder %v2921_v17, 0  ;;  %v1126_v18 = vmul.f32 %v1125_v59, %v1116_v33  ;;  %v1127_v56 = vmul.f32 %v1125_v59, %v1115_v9 }
 0x1aa   : > { %v1106_v40 = vadd.f32 %v1105_v43, %v1074_v7  ;;  %vm4047_vm10 = vmand %vm5195_vm12, %vm5194_vm0  ;;  %v1192_v12 = vstv %s4079_s25  ;;  %v1189_v43 = vstv %s4083_s14  ;;  %v1238_v19 = vstv %s4131_s27  ;;  %s2624_s25 = smov 95   ;;  %s4263_s14 = sld [smem:[#allocation5 + $0x1d]] }
 0x1ab   : > { %vm1108_vm0 = vmand %vm4047_vm10, %vm3027_vm13  ;;  %s4309_s27 = sld [smem:[#allocation5 + $0x1e]] }
 0x1ac   : > { %vm1140_vm12 = vmand %vm4047_vm10, %vm3074_vm7 }
 0x1ad   : > { %1487 = vrot.lane.b32.xlu1 %v2803_v50, %s2617_s30  ;;  %1482 = vrot.lane.b32.xlu0 %v2792_v47, %s2617_s30 }
 0x1ae   : > { %1489 = vrot.lane.b32.xlu2 %v2808_v51, %s2617_s30  ;;  %s4206_s30 = sld [smem:[#allocation5 + $0x1b]] }
 0x1af   : > { %v1143_v63 = vpop.permute.xlu1 %1142  ;;  %v1120_v31 = vpop.permute.xlu0 %1119 }
 0x1b0   : > { %v1147_v2 = vsel %vm1146_vm5, %v1143_v63, %v3988_v15  ;;  %v1148_v1 = vsel %vm1146_vm5, %v3988_v15, %v1143_v63  ;;  %v1121_v28 = vsel %vm5198_vm9, %v3960_v49, %v1120_v31  ;;  %v1122_v17 = vsel %vm5199_vm3, %v1120_v31, %v3960_v49  ;;  %v4063_v26 = vpop.permute.xlu2 %1230  ;;  %vm4072_vm9 = vmand %vm1108_vm0, %vm3067_vm2 }
 0x1b1   : > { %v1129_v13 = vmul.f32 %v1128_v38, %v1122_v17  ;;  %v1130_v39 = vmul.f32 %v1128_v38, %v1121_v28  ;;  %vm5202_vm3 = vcmask 1041408   ;;  %v1158_v44 = vmul.f32 %v1157_v10, %v1148_v1 }
 0x1b2   : > { %v1159_v54 = vmul.f32 %v1157_v10, %v1147_v2  ;;  %vm1178_vm0 = vcmp.lt.s32.totalorder %v2940_v21, 1 }
 0x1b3   : > { %v1131_v15 = vadd.f32 %v1129_v13, %v1126_v18  ;;  %v1132_v55 = vadd.f32 %v1130_v39, %v1127_v56  ;;  %v1208_v39 = vstv %s4097_s15  ;;  %s4266_s15 = sld [smem:[#allocation5 + $0x4e]] }
 0x1b5   : > { %v1135_v49 = vrot.slane %v1132_v55, 6  ;;  %1514 = vrot.lane.b32.xlu1 %v2792_v47, %s2618_s24  ;;  %1512 = vrot.lane.b32.xlu0 %v2795_v48, %s2618_s24 }
 0x1b6   : > { %1519 = vrot.lane.b32.xlu2 %v2803_v50, %s2618_s24 }
 0x1b7   : > { %v1136_v37 = vsel %vm5202_vm3, %v1131_v15, %v1135_v49  ;;  %v1152_v34 = vpop.permute.xlu1 %1151  ;;  %v1150_v45 = vpop.permute.xlu0 %1149 }
 0x1b8   : > { %v1138_v11 = vsel %vm4072_vm9, %v1136_v37, 0.0  ;;  %v1153_v7 = vsel %vm1146_vm5, %v1150_v45, %v1152_v34  ;;  %v1154_v5 = vsel %vm1146_vm5, %v1152_v34, %v1150_v45  ;;  %v4091_v29 = vpop.permute.xlu2 %1257  ;;  %vm4103_vm5 = vmand %vm1140_vm12, %vm5142_vm6  ;;  %v2412_v34 = vld [vmem:[#allocation3] sm:$0x3] }
 0x1b9   : > { %v1139_v35 = vadd.f32 %v1138_v11, %v1106_v40  ;;  %v1161_v30 = vmul.f32 %v1160_v41, %v1154_v5  ;;  %v1162_v57 = vmul.f32 %v1160_v41, %v1153_v7  ;;  %vm5205_vm9 = vmmov %vm5202_vm3  ;;  %vm5206_vm3 = vnez %v5051_v42  ;;  %v5210_v41 = vld [vmem:[#allocation18_spill] sm:$0xff] }
 0x1ba   : > { %vm1172_vm12 = vmand %vm4047_vm10, %vm5206_vm3  ;;  %v1209_v37 = vmul.f32 %v1208_v39, %v5210_v41 }
 0x1bb   : > { %v1163_v27 = vadd.f32 %v1161_v30, %v1158_v44  ;;  %v1164_v52 = vadd.f32 %v1162_v57, %v1159_v54  ;;  %v2621_v44 = vmov 857870592  }
 0x1bc   : > { %v1215_v11 = vunpack.c.l.s4 %v2621_v44 }
 0x1bd   : > { %v1167_v3 = vrot.slane %v1164_v52, 6  ;;  %1545 = vrot.lane.b32.xlu1 %v2795_v48, %s2619_s1  ;;  %1521 = vrot.lane.b32.xlu0 %v2808_v51, %s2618_s24  ;;  %s2226_s24 = sld [smem:[#allocation5 + $0x4d]] }
 0x1be   : > { %1547 = vrot.lane.b32.xlu2 %v2792_v47, %s2619_s1  ;;  %v1216_v52 = vunpack.c.0.s8 %v1215_v11 }
 0x1bf   : > { %v1168_v9 = vsel %vm5205_vm9, %v1163_v27, %v1167_v3  ;;  %v1182_v33 = vpop.permute.xlu1 %1181  ;;  %v1177_v40 = vpop.permute.xlu0 %1176  ;;  %v1241_v3 = vstv %s4139_s28  ;;  %s2626_s28 = smov 93  }
 0x1c0   : > { %v1170_v59 = vsel %vm4103_vm5, %v1168_v9, 0.0  ;;  %v1185_v38 = vsel %vm1178_vm0, %v1182_v33, %v4032_v16  ;;  %v1186_v63 = vsel %vm1178_vm0, %v4032_v16, %v1182_v33  ;;  %v1179_v31 = vsel %vm1178_vm0, %v4012_v8, %v1177_v40  ;;  %v4119_v2 = vpop.permute.xlu2 %1287 }
 0x1c1   : > { %v1171_v1 = vadd.f32 %v1170_v59, %v1139_v35  ;;  %v1193_v28 = vmul.f32 %v1192_v12, %v1186_v63  ;;  %v1194_v17 = vmul.f32 %v1192_v12, %v1185_v38  ;;  %v1180_v18 = vsel %vm1178_vm0, %v1177_v40, %v4012_v8 }
 0x1c2   : > { %v1190_v56 = vmul.f32 %v1189_v43, %v1180_v18  ;;  %v1191_v13 = vmul.f32 %v1189_v43, %v1179_v31  ;;  %v1210_v16 = vstv %s4099_s16  ;;  %vm5012_vm5 = vcmp.lt.s32.totalorder %v2940_v21, 127  ;;  %s2625_s16 = smov 94  }
 0x1c3   : > { %vm5207_vm0 = vnez %v5054_v61  ;;  %v1211_v45 = vmul.f32 %v2412_v34, %v1210_v16 }
 0x1c4   : > { %v1195_v15 = vadd.f32 %v1193_v28, %v1190_v56  ;;  %v1196_v55 = vadd.f32 %v1194_v17, %v1191_v13  ;;  %vm4135_vm9 = vmand %vm1172_vm12, %vm5207_vm0  ;;  %vm5211_vm12 = vcmask 1041408   ;;  %v1270_v13 = vstv %s4155_s5  ;;  %s2232_s5 = sld [smem:[#allocation5 + $0x50]] }
 0x1c5   : > { %1554 = vrot.lane.b32.xlu1 %v2808_v51, %s2619_s1  ;;  %1552 = vrot.lane.b32.xlu0 %v2803_v50, %s2619_s1  ;;  %v1212_v27 = vadd.f32 %v1211_v45, %v1209_v37  ;;  %s4305_s1 = sld [smem:[#allocation5 + $0x4f]] }
 0x1c6   : > { %v1199_v10 = vrot.slane %v1196_v55, 6  ;;  %1577 = vrot.lane.b32.xlu2 %v2795_v48, %s2620_s29  ;;  %v1273_v55 = vstv %s4163_s6  ;;  %s2627_s6 = smov 83  }
 0x1c7   : > { %v1226_v46 = vpop.permute.xlu1 %1225  ;;  %v1224_v49 = vpop.permute.xlu0 %1223  ;;  %v1217_v9 = vperm.slane %v1212_v27, %v1216_v52  ;;  %v1305_v52 = vstv %s4202_s8  ;;  %s4366_s8 = sld [smem:[#allocation5 + $0x51]] }
 0x1c8   : > { %v1200_v7 = vsel %vm5211_vm12, %v1195_v15, %v1199_v10  ;;  %v1228_v5 = vsel %vm5012_vm5, %v1224_v49, %v1226_v46  ;;  %v1229_v54 = vsel %vm5012_vm5, %v1226_v46, %v1224_v49  ;;  %v4148_v35 = vpop.permute.xlu2 %1296  ;;  %vm1259_vm12 = vcmp.lt.s32.totalorder %v2940_v21, 126  ;;  %vm1204_vm5 = vmand %vm4047_vm10, %vm5184_vm11 }
 0x1c9   : > { %v1202_v30 = vsel %vm4135_vm9, %v1200_v7, 0.0  ;;  %vm5212_vm9 = vcmp.lt.s32.totalorder %v2940_v21, 127  ;;  %v1239_v31 = vmul.f32 %v1238_v19, %v1228_v5  ;;  %vm4182_vm0 = vmand %vm1204_vm5, %vm5185_vm4  ;;  %vm5218_vm5 = vcmask 1041408  }
 0x1ca   : > { %v1203_v57 = vadd.f32 %v1202_v30, %v1171_v1  ;;  %vm5213_vm11 = vmmov %vm5212_vm9  ;;  %v1240_v1 = vmul.f32 %v1238_v19, %v1229_v54  ;;  %v1219_v56 = vsel %vm4182_vm0, %v1217_v9, 0.0 }
 0x1cb   : > { %vm1253_vm0 = vmand %vm4047_vm10, %vm5162_vm1 }
 0x1cc   : > { %v1220_v16 = vadd.f32 %v1219_v56, %v1203_v57 }
 0x1cd   : > { %1584 = vrot.lane.b32.xlu1 %v2803_v50, %s2620_s29  ;;  %1579 = vrot.lane.b32.xlu0 %v2792_v47, %s2620_s29 }
 0x1ce   : > { %1586 = vrot.lane.b32.xlu2 %v2808_v51, %s2620_s29  ;;  %s2231_s29 = sld [smem:[#allocation5 + $0x1f]] }
 0x1cf   : > { %v1256_v12 = vpop.permute.xlu1 %1255  ;;  %v1233_v33 = vpop.permute.xlu0 %1232 }
 0x1d0   : > { %v1260_v43 = vsel %vm1259_vm12, %v1256_v12, %v4091_v29  ;;  %v1261_v40 = vsel %vm1259_vm12, %v4091_v29, %v1256_v12  ;;  %v1234_v59 = vsel %vm5212_vm9, %v4063_v26, %v1233_v33  ;;  %v1235_v38 = vsel %vm5213_vm11, %v1233_v33, %v4063_v26  ;;  %v4178_v63 = vpop.permute.xlu2 %1327  ;;  %vm1221_vm9 = vmand %vm4047_vm10, %vm3215_vm14 }
 0x1d1   : > { %v1242_v29 = vmul.f32 %v1241_v3, %v1234_v59  ;;  %v1243_v17 = vmul.f32 %v1241_v3, %v1235_v38  ;;  %vm4195_vm11 = vmand %vm1221_vm9, %vm5158_vm8  ;;  %v1271_v49 = vmul.f32 %v1270_v13, %v1260_v43  ;;  %v1272_v44 = vmul.f32 %v1270_v13, %v1261_v40 }
 0x1d2   : > { %vm4222_vm9 = vmand %vm1253_vm0, %vm5163_vm15  ;;  %v1302_v12 = vstv %s4206_s30  ;;  %s2628_s30 = smov 82  }
 0x1d3   : > { %v1244_v18 = vadd.f32 %v1242_v29, %v1239_v31  ;;  %v1245_v26 = vadd.f32 %v1243_v17, %v1240_v1 }
 0x1d5   : > { %v1248_v15 = vrot.slane %v1245_v26, 6  ;;  %1611 = vrot.lane.b32.xlu1 %v2792_v47, %s2622_s7  ;;  %1609 = vrot.lane.b32.xlu0 %v2795_v48, %s2622_s7 }
 0x1d6   : > { %1616 = vrot.lane.b32.xlu2 %v2803_v50, %s2622_s7 }
 0x1d7   : > { %v1249_v8 = vsel %vm5218_vm5, %v1244_v18, %v1248_v15  ;;  %v1265_v10 = vpop.permute.xlu1 %1264  ;;  %v1263_v46 = vpop.permute.xlu0 %1262 }
 0x1d8   : > { %v1251_v41 = vsel %vm4195_vm11, %v1249_v8, 0.0  ;;  %v1266_v37 = vsel %vm1259_vm12, %v1263_v46, %v1265_v10  ;;  %v1267_v34 = vsel %vm1259_vm12, %v1265_v10, %v1263_v46  ;;  %v4214_v45 = vpop.permute.xlu2 %1354  ;;  %vm1291_vm12 = vcmp.lt.s32.totalorder %v2940_v21, 125  ;;  %vm5221_vm11 = vmmov %vm5218_vm5 }
 0x1d9   : > { %v1252_v11 = vadd.f32 %v1251_v41, %v1220_v16  ;;  %v1274_v7 = vmul.f32 %v1273_v55, %v1266_v37  ;;  %v1275_v5 = vmul.f32 %v1273_v55, %v1267_v34  ;;  %vm5222_vm5 = vnez %v5101_v20  ;;  %v5225_v41 = vld [vmem:[#allocation21_spill] sm:$0xff] }
 0x1da   : > { %vm1285_vm0 = vmand %vm4047_vm10, %vm5222_vm5  ;;  %vm5224_vm10 = vcmask 1041408   ;;  %v1335_v10 = vstv %s4248_s12  ;;  %v1338_v46 = vstv %s2226_s24  ;;  %s4401_s12 = sld [smem:[#allocation5 + $0x21]]  ;;  %s2629_s24 = smov 81  }
 0x1db   : > { %v1276_v54 = vadd.f32 %v1274_v7, %v1271_v49  ;;  %v1277_v30 = vadd.f32 %v1275_v5, %v1272_v44 }
 0x1dd   : > { %v1280_v27 = vrot.slane %v1277_v30, 6  ;;  %1641 = vrot.lane.b32.xlu1 %v2795_v48, %s2623_s10  ;;  %1618 = vrot.lane.b32.xlu0 %v2808_v51, %s2622_s7  ;;  %s4364_s7 = sld [smem:[#allocation5 + $0x20]] }
 0x1de   : > { %1643 = vrot.lane.b32.xlu2 %v2792_v47, %s2623_s10 }
 0x1df   : > { %v1281_v19 = vsel %vm5221_vm11, %v1276_v54, %v1280_v27  ;;  %v1295_v3 = vpop.permute.xlu1 %1294  ;;  %v1290_v9 = vpop.permute.xlu0 %1289  ;;  %vm5223_vm11 = vnez %v5103_v14 }
 0x1e0   : > { %v1283_v33 = vsel %vm4222_vm9, %v1281_v19, 0.0  ;;  %v1298_v43 = vsel %vm1291_vm12, %v1295_v3, %v4148_v35  ;;  %v1299_v40 = vsel %vm1291_vm12, %v4148_v35, %v1295_v3  ;;  %v1292_v59 = vsel %vm1291_vm12, %v4119_v2, %v1290_v9  ;;  %v4238_v38 = vpop.permute.xlu2 %1384 }
 0x1e1   : > { %v1284_v31 = vadd.f32 %v1283_v33, %v1252_v11  ;;  %v1306_v1 = vmul.f32 %v1305_v52, %v1298_v43  ;;  %v1307_v28 = vmul.f32 %v1305_v52, %v1299_v40  ;;  %v1293_v29 = vsel %vm1291_vm12, %v1290_v9, %v4119_v2  ;;  %vm1286_vm12 = vmand %vm1285_vm0, %vm5223_vm11 }
 0x1e2   : > { %v1303_v17 = vmul.f32 %v1302_v12, %v1292_v59  ;;  %v1304_v18 = vmul.f32 %v1302_v12, %v1293_v29  ;;  %vm5014_vm9 = vcmp.lt.s32.totalorder %v2940_v21, 115  ;;  %vm1356_vm0 = vcmp.lt.s32.totalorder %v2940_v21, 114 }
 0x1e3   : > { %vm5230_vm11 = vcmp.lt.s32.totalorder %v2940_v21, 115  ;;  %v1367_v3 = vstv %s4263_s14  ;;  %v1370_v9 = vstv %s4266_s15  ;;  %s2238_s14 = sld [smem:[#allocation5 + $0x53]]  ;;  %s2630_s15 = smov 80  }
 0x1e4   : > { %v1308_v26 = vadd.f32 %v1306_v1, %v1303_v17  ;;  %v1309_v56 = vadd.f32 %v1307_v28, %v1304_v18  ;;  %vm5231_vm5 = vmmov %vm5230_vm11 }
 0x1e5   : > { %1650 = vrot.lane.b32.xlu1 %v2808_v51, %s2623_s10  ;;  %1648 = vrot.lane.b32.xlu0 %v2803_v50, %s2623_s10  ;;  %s4397_s10 = sld [smem:[#allocation5 + $0x52]] }
 0x1e6   : > { %v1312_v2 = vrot.slane %v1309_v56, 6  ;;  %1673 = vrot.lane.b32.xlu2 %v2795_v48, %s2624_s25 }
 0x1e7   : > { %v1323_v4 = vpop.permute.xlu1 %1322  ;;  %v1321_v35 = vpop.permute.xlu0 %1320 }
 0x1e8   : > { %v1313_v13 = vsel %vm5224_vm10, %v1308_v26, %v1312_v2  ;;  %v1325_v39 = vsel %vm5014_vm9, %v1321_v35, %v1323_v4  ;;  %v1326_v15 = vsel %vm5014_vm9, %v1323_v4, %v1321_v35  ;;  %v4258_v55 = vpop.permute.xlu2 %1393  ;;  %vm5226_vm10 = vcmp.lt.s32.totalorder %v5225_v41, 16 }
 0x1e9   : > { %v1315_v16 = vsel %vm1286_vm12, %v1313_v13, 0.0  ;;  %vm5227_vm12 = vcmp.ge.s32.totalorder %v5225_v41, 0  ;;  %v1336_v30 = vmul.f32 %v1335_v10, %v1325_v39  ;;  %v1337_v57 = vmul.f32 %v1335_v10, %v1326_v15 }
 0x1ea   : > { %v1316_v8 = vadd.f32 %v1315_v16, %v1284_v31  ;;  %vm4273_vm9 = vmand %vm5227_vm12, %vm5226_vm10  ;;  %v1402_v39 = vstv %s4305_s1  ;;  %s4458_s1 = sld [smem:[#allocation5 + $0x54]] }
 0x1eb   : > { %vm1318_vm10 = vmand %vm4273_vm9, %vm3027_vm13 }
 0x1ec   : > { %vm1350_vm12 = vmand %vm4273_vm9, %vm3074_vm7 }
 0x1ed   : > { %1680 = vrot.lane.b32.xlu1 %v2803_v50, %s2624_s25  ;;  %1675 = vrot.lane.b32.xlu0 %v2792_v47, %s2624_s25 }
 0x1ee   : > { %1682 = vrot.lane.b32.xlu2 %v2808_v51, %s2624_s25  ;;  %s2237_s25 = sld [smem:[#allocation5 + $0x22]] }
 0x1ef   : > { %v1353_v49 = vpop.permute.xlu1 %1352  ;;  %v1330_v34 = vpop.permute.xlu0 %1329 }
 0x1f0   : > { %v1357_v44 = vsel %vm1356_vm0, %v1353_v49, %v4214_v45  ;;  %v1358_v11 = vsel %vm1356_vm0, %v4214_v45, %v1353_v49  ;;  %v1331_v7 = vsel %vm5230_vm11, %v4178_v63, %v1330_v34  ;;  %v1332_v5 = vsel %vm5231_vm5, %v1330_v34, %v4178_v63  ;;  %v4289_v54 = vpop.permute.xlu2 %1423  ;;  %vm4298_vm11 = vmand %vm1318_vm10, %vm3067_vm2 }
 0x1f1   : > { %v1339_v27 = vmul.f32 %v1338_v46, %v1331_v7  ;;  %v1340_v52 = vmul.f32 %v1338_v46, %v1332_v5  ;;  %vm5234_vm5 = vcmask 1041408   ;;  %v1368_v59 = vmul.f32 %v1367_v3, %v1357_v44  ;;  %vm4325_vm10 = vmand %vm1350_vm12, %vm5142_vm6 }
 0x1f2   : > { %v1369_v17 = vmul.f32 %v1367_v3, %v1358_v11  ;;  %vm1420_vm12 = vcmp.lt.s32.totalorder %v2940_v21, 112 }
 0x1f3   : > { %v1341_v45 = vadd.f32 %v1339_v27, %v1336_v30  ;;  %v1342_v19 = vadd.f32 %v1340_v52, %v1337_v57 }
 0x1f5   : > { %v1345_v63 = vrot.slane %v1342_v19, 6  ;;  %1707 = vrot.lane.b32.xlu1 %v2792_v47, %s2625_s16  ;;  %1705 = vrot.lane.b32.xlu0 %v2795_v48, %s2625_s16 }
 0x1f6   : > { %1712 = vrot.lane.b32.xlu2 %v2803_v50, %s2625_s16 }
 0x1f7   : > { %v1346_v33 = vsel %vm5234_vm5, %v1341_v45, %v1345_v63  ;;  %v1362_v43 = vpop.permute.xlu1 %1361  ;;  %v1360_v40 = vpop.permute.xlu0 %1359 }
 0x1f8   : > { %v1348_v31 = vsel %vm4298_vm11, %v1346_v33, 0.0  ;;  %v1363_v1 = vsel %vm1356_vm0, %v1360_v40, %v1362_v43  ;;  %v1364_v28 = vsel %vm1356_vm0, %v1362_v43, %v1360_v40  ;;  %v4317_v29 = vpop.permute.xlu2 %1450  ;;  %vm1388_vm0 = vcmp.lt.s32.totalorder %v2940_v21, 113  ;;  %vm5237_vm11 = vmmov %vm5234_vm5 }
 0x1f9   : > { %v1349_v18 = vadd.f32 %v1348_v31, %v1316_v8  ;;  %v1371_v26 = vmul.f32 %v1370_v9, %v1363_v1  ;;  %v1372_v56 = vmul.f32 %v1370_v9, %v1364_v28  ;;  %v1399_v8 = vstv %s4309_s27  ;;  %vm1382_vm5 = vmand %vm4273_vm9, %vm5206_vm3  ;;  %s2631_s27 = smov 79  }
 0x1fa   : > { %v1431_v40 = vstv %s2231_s29  ;;  %s4501_s29 = sld [smem:[#allocation5 + $0x24]] }
 0x1fb   : > { %v1373_v2 = vadd.f32 %v1371_v26, %v1368_v59  ;;  %v1374_v4 = vadd.f32 %v1372_v56, %v1369_v17  ;;  %v1434_v59 = vstv %s2232_s5  ;;  %s2632_s5 = smov 78  }
 0x1fd   : > { %v1377_v13 = vrot.slane %v1374_v4, 6  ;;  %1737 = vrot.lane.b32.xlu1 %v2795_v48, %s2626_s28  ;;  %1714 = vrot.lane.b32.xlu0 %v2808_v51, %s2625_s16  ;;  %s4456_s16 = sld [smem:[#allocation5 + $0x23]] }
 0x1fe   : > { %1739 = vrot.lane.b32.xlu2 %v2792_v47, %s2626_s28 }
 0x1ff   : > { %v1378_v15 = vsel %vm5237_vm11, %v1373_v2, %v1377_v13  ;;  %v1392_v16 = vpop.permute.xlu1 %1391  ;;  %v1387_v10 = vpop.permute.xlu0 %1386 }
 0x200   : > { %v1380_v46 = vsel %vm4325_vm10, %v1378_v15, 0.0  ;;  %v1395_v49 = vsel %vm1388_vm0, %v1392_v16, %v4258_v55  ;;  %v1396_v41 = vsel %vm1388_vm0, %v4258_v55, %v1392_v16  ;;  %v1389_v34 = vsel %vm1388_vm0, %v4238_v38, %v1387_v10  ;;  %v4341_v44 = vpop.permute.xlu2 %1480 }
 0x201   : > { %v1381_v11 = vadd.f32 %v1380_v46, %v1349_v18  ;;  %v1403_v7 = vmul.f32 %v1402_v39, %v1395_v49  ;;  %v1404_v5 = vmul.f32 %v1402_v39, %v1396_v41  ;;  %v1390_v30 = vsel %vm1388_vm0, %v1387_v10, %v4238_v38 }
 0x202   : > { %v1400_v57 = vmul.f32 %v1399_v8, %v1389_v34  ;;  %v1401_v27 = vmul.f32 %v1399_v8, %v1390_v30  ;;  %vm5238_vm10 = vnez %v5054_v61  ;;  %vm5239_vm0 = vcmask 1041408  }
 0x203   : > { %vm1383_vm11 = vmand %vm1382_vm5, %vm5238_vm10  ;;  %vm5015_vm5 = vcmp.lt.s32.totalorder %v2940_v21, 111  ;;  %v1463_v15 = vstv %s4364_s7  ;;  %v1466_v8 = vstv %s4366_s8  ;;  %s2244_s7 = sld [smem:[#allocation5 + $0x56]]  ;;  %s2633_s8 = smov 77  }
 0x204   : > { %v1405_v52 = vadd.f32 %v1403_v7, %v1400_v57  ;;  %v1406_v45 = vadd.f32 %v1404_v5, %v1401_v27 }
 0x205   : > { %1746 = vrot.lane.b32.xlu1 %v2808_v51, %s2626_s28  ;;  %1744 = vrot.lane.b32.xlu0 %v2803_v50, %s2626_s28  ;;  %s4489_s28 = sld [smem:[#allocation5 + $0x55]] }
 0x206   : > { %v1409_v38 = vrot.slane %v1406_v45, 6  ;;  %1770 = vrot.lane.b32.xlu2 %v2795_v48, %s2627_s6 }
 0x207   : > { %v1419_v55 = vpop.permute.xlu1 %1418  ;;  %v1417_v19 = vpop.permute.xlu0 %1416 }
 0x208   : > { %v1410_v3 = vsel %vm5239_vm0, %v1405_v52, %v1409_v38  ;;  %v1421_v12 = vsel %vm1420_vm12, %v1417_v19, %v1419_v55  ;;  %v1422_v63 = vsel %vm1420_vm12, %v1419_v55, %v1417_v19  ;;  %v4359_v9 = vpop.permute.xlu2 %1489 }
 0x209   : > { %v1412_v33 = vsel %vm1383_vm11, %v1410_v3, 0.0  ;;  %v1432_v2 = vmul.f32 %v1431_v40, %v1421_v12  ;;  %v1433_v4 = vmul.f32 %v1431_v40, %v1422_v63  ;;  %vm5240_vm11 = vnez %v5057_v58 }
 0x20a   : > { %v1413_v43 = vadd.f32 %v1412_v33, %v1381_v11  ;;  %vm1414_vm0 = vmand %vm4273_vm9, %vm5240_vm11  ;;  %v1498_v3 = vstv %s4397_s10  ;;  %v1495_v33 = vstv %s4401_s12  ;;  %s4556_s10 = sld [smem:[#allocation5 + $0x57]] }
 0x20b   : > { %s4581_s12 = sld [smem:[#allocation5 + $0x58]] }
 0x20d   : > { %1777 = vrot.lane.b32.xlu1 %v2803_v50, %s2627_s6  ;;  %1772 = vrot.lane.b32.xlu0 %v2792_v47, %s2627_s6 }
 0x20e   : > { %1779 = vrot.lane.b32.xlu2 %v2808_v51, %s2627_s6  ;;  %s2243_s6 = sld [smem:[#allocation5 + $0x25]] }
 0x20f   : > { %v1449_v31 = vpop.permute.xlu1 %1448  ;;  %v1426_v1 = vpop.permute.xlu0 %1425 }
 0x210   : > { %v1453_v28 = vsel %vm5015_vm5, %v1449_v31, %v4317_v29  ;;  %v1454_v17 = vsel %vm5015_vm5, %v4317_v29, %v1449_v31  ;;  %v1427_v18 = vsel %vm1420_vm12, %v4289_v54, %v1426_v1  ;;  %v1428_v26 = vsel %vm1420_vm12, %v1426_v1, %v4289_v54  ;;  %v4381_v56 = vpop.permute.xlu2 %1519  ;;  %vm4390_vm5 = vmand %vm1414_vm0, %vm5185_vm4 }
 0x211   : > { %v1435_v35 = vmul.f32 %v1434_v59, %v1427_v18  ;;  %v1436_v13 = vmul.f32 %v1434_v59, %v1428_v26  ;;  %vm5243_vm12 = vcmask 1041408   ;;  %v1464_v41 = vmul.f32 %v1463_v15, %v1453_v28 }
 0x212   : > { %vm5244_vm0 = vcmp.lt.s32.totalorder %v2940_v21, 111  ;;  %v1465_v30 = vmul.f32 %v1463_v15, %v1454_v17 }
 0x213   : > { %v1437_v29 = vadd.f32 %v1435_v35, %v1432_v2  ;;  %v1438_v39 = vadd.f32 %v1436_v13, %v1433_v4  ;;  %vm5245_vm4 = vmmov %vm5244_vm0 }
 0x215   : > { %v1441_v54 = vrot.slane %v1438_v39, 6  ;;  %1804 = vrot.lane.b32.xlu1 %v2792_v47, %s2628_s30  ;;  %1802 = vrot.lane.b32.xlu0 %v2795_v48, %s2628_s30 }
 0x216   : > { %1809 = vrot.lane.b32.xlu2 %v2803_v50, %s2628_s30 }
 0x217   : > { %v1442_v10 = vsel %vm5243_vm12, %v1437_v29, %v1441_v54  ;;  %v1458_v46 = vpop.permute.xlu1 %1457  ;;  %v1456_v49 = vpop.permute.xlu0 %1455  ;;  %vm1446_vm12 = vmand %vm4273_vm9, %vm3215_vm14 }
 0x218   : > { %v1444_v34 = vsel %vm4390_vm5, %v1442_v10, 0.0  ;;  %v1459_v11 = vsel %vm5244_vm0, %v1456_v49, %v1458_v46  ;;  %v1460_v7 = vsel %vm5245_vm4, %v1458_v46, %v1456_v49  ;;  %v4409_v5 = vpop.permute.xlu2 %1547  ;;  %vm4417_vm5 = vmand %vm1446_vm12, %vm5158_vm8  ;;  %vm1484_vm4 = vcmp.lt.s32.totalorder %v2940_v21, 110 }
 0x219   : > { %v1445_v57 = vadd.f32 %v1444_v34, %v1413_v43  ;;  %v1467_v27 = vmul.f32 %v1466_v8, %v1459_v11  ;;  %v1468_v52 = vmul.f32 %v1466_v8, %v1460_v7  ;;  %vm5248_vm0 = vcmask 1041408   ;;  %vm1478_vm12 = vmand %vm4273_vm9, %vm5162_vm1 }
 0x21a   : > { %v1527_v49 = vstv %s2237_s25  ;;  %s2249_s25 = sld [smem:[#allocation5 + $0x28]] }
 0x21b   : > { %v1469_v45 = vadd.f32 %v1467_v27, %v1464_v41  ;;  %v1470_v38 = vadd.f32 %v1468_v52, %v1465_v30  ;;  %v1530_v41 = vstv %s2238_s14  ;;  %s2250_s14 = sld [smem:[#allocation5 + $0x59]] }
 0x21d   : > { %v1473_v19 = vrot.slane %v1470_v38, 6  ;;  %1834 = vrot.lane.b32.xlu1 %v2795_v48, %s2629_s24  ;;  %1811 = vrot.lane.b32.xlu0 %v2808_v51, %s2628_s30  ;;  %s4554_s30 = sld [smem:[#allocation5 + $0x26]] }
 0x21e   : > { %1836 = vrot.lane.b32.xlu2 %v2792_v47, %s2629_s24 }
 0x21f   : > { %v1474_v12 = vsel %vm5248_vm0, %v1469_v45, %v1473_v19  ;;  %v1488_v63 = vpop.permute.xlu1 %1487  ;;  %v1483_v43 = vpop.permute.xlu0 %1482  ;;  %vm1479_vm0 = vmand %vm1478_vm12, %vm5163_vm15  ;;  %vm5017_vm12 = vcmp.lt.s32.totalorder %v2940_v21, 99 }
 0x220   : > { %v1476_v40 = vsel %vm4417_vm5, %v1474_v12, 0.0  ;;  %v1491_v59 = vsel %vm1484_vm4, %v1488_v63, %v4359_v9  ;;  %v1492_v31 = vsel %vm1484_vm4, %v4359_v9, %v1488_v63  ;;  %v1485_v1 = vsel %vm1484_vm4, %v4341_v44, %v1483_v43  ;;  %v4433_v28 = vpop.permute.xlu2 %1577 }
 0x221   : > { %v1477_v17 = vadd.f32 %v1476_v40, %v1445_v57  ;;  %v1499_v18 = vmul.f32 %v1498_v3, %v1491_v59  ;;  %v1500_v26 = vmul.f32 %v1498_v3, %v1492_v31  ;;  %v1486_v2 = vsel %vm1484_vm4, %v1483_v43, %v4341_v44 }
 0x222   : > { %v1496_v4 = vmul.f32 %v1495_v33, %v1485_v1  ;;  %v1497_v35 = vmul.f32 %v1495_v33, %v1486_v2  ;;  %vm1516_vm5 = vcmp.lt.s32.totalorder %v2940_v21, 109  ;;  %vm5249_vm4 = vcmask 1041408  }
 0x223   : > { %v1560_v12 = vstv %s4456_s16  ;;  %v1563_v33 = vstv %s4458_s1  ;;  %s2252_s16 = sld [smem:[#allocation5 + $0x5a]] }
 0x224   : > { %v1501_v13 = vadd.f32 %v1499_v18, %v1496_v4  ;;  %v1502_v29 = vadd.f32 %v1500_v26, %v1497_v35  ;;  %s4659_s1 = sld [smem:[#allocation5 + $0x5b]] }
 0x225   : > { %1843 = vrot.lane.b32.xlu1 %v2808_v51, %s2629_s24  ;;  %1841 = vrot.lane.b32.xlu0 %v2803_v50, %s2629_s24  ;;  %s2247_s24 = sld [smem:[#allocation5 + $0x27]] }
 0x226   : > { %v1505_v44 = vrot.slane %v1502_v29, 6  ;;  %1866 = vrot.lane.b32.xlu2 %v2795_v48, %s2630_s15 }
 0x227   : > { %v1515_v9 = vpop.permute.xlu1 %1514  ;;  %v1513_v39 = vpop.permute.xlu0 %1512 }
 0x228   : > { %v1506_v15 = vsel %vm5249_vm4, %v1501_v13, %v1505_v44  ;;  %v1517_v16 = vsel %vm1516_vm5, %v1513_v39, %v1515_v9  ;;  %v1518_v54 = vsel %vm1516_vm5, %v1515_v9, %v1513_v39  ;;  %v4451_v8 = vpop.permute.xlu2 %1586  ;;  %v1595_v39 = vstv %s4489_s28  ;;  %s4669_s28 = sld [smem:[#allocation5 + $0x5c]] }
 0x229   : > { %v1508_v10 = vsel %vm1479_vm0, %v1506_v15, 0.0  ;;  %v1528_v45 = vmul.f32 %v1527_v49, %v1517_v16  ;;  %v1529_v38 = vmul.f32 %v1527_v49, %v1518_v54  ;;  %vm5250_vm0 = vnez %v5101_v20 }
 0x22a   : > { %v1509_v46 = vadd.f32 %v1508_v10, %v1477_v17  ;;  %vm1510_vm4 = vmand %vm4273_vm9, %vm5250_vm0  ;;  %vm5254_vm9 = vcmask 1041408   ;;  %vm5259_vm0 = vcmp.lt.s32.totalorder %v2940_v21, 99  ;;  %v1592_v54 = vstv %s4501_s29  ;;  %s4671_s29 = sld [smem:[#allocation5 + $0x2b]] }
 0x22b   : > { %v1659_v44 = vstv %s4556_s10  ;;  %s4708_s10 = sld [smem:[#allocation5 + $0x2e]] }
 0x22d   : > { %1873 = vrot.lane.b32.xlu1 %v2803_v50, %s2630_s15  ;;  %1868 = vrot.lane.b32.xlu0 %v2792_v47, %s2630_s15 }
 0x22e   : > { %1875 = vrot.lane.b32.xlu2 %v2808_v51, %s2630_s15  ;;  %s4616_s15 = sld [smem:[#allocation5 + $0x29]] }
 0x22f   : > { %v1546_v34 = vpop.permute.xlu1 %1545  ;;  %v1522_v11 = vpop.permute.xlu0 %1521 }
 0x230   : > { %v1550_v7 = vsel %vm5017_vm12, %v1546_v34, %v4409_v5  ;;  %v1551_v30 = vsel %vm5017_vm12, %v4409_v5, %v1546_v34  ;;  %v1523_v57 = vsel %vm1516_vm5, %v4381_v56, %v1522_v11  ;;  %v1524_v27 = vsel %vm1516_vm5, %v1522_v11, %v4381_v56  ;;  %v4473_v52 = vpop.permute.xlu2 %1616 }
 0x231   : > { %v1531_v55 = vmul.f32 %v1530_v41, %v1523_v57  ;;  %v1532_v19 = vmul.f32 %v1530_v41, %v1524_v27  ;;  %vm5251_vm12 = vnez %v5103_v14  ;;  %vm5255_vm5 = vcmp.lt.s32.totalorder %v3116_v62, 16 }
 0x232   : > { %vm4482_vm15 = vmand %vm1510_vm4, %vm5251_vm12  ;;  %vm5256_vm4 = vcmp.ge.s32.totalorder %v3116_v62, 0  ;;  %v1561_v31 = vmul.f32 %v1560_v12, %v1550_v7  ;;  %v1562_v62 = vmul.f32 %v1560_v12, %v1551_v30 }
 0x233   : > { %v1533_v5 = vadd.f32 %v1531_v55, %v1528_v45  ;;  %v1534_v3 = vadd.f32 %v1532_v19, %v1529_v38  ;;  %vm4497_vm12 = vmand %vm5256_vm4, %vm5255_vm5  ;;  %vm5263_vm4 = vcmask 1041408  }
 0x234   : > { %vm1543_vm5 = vmand %vm4497_vm12, %vm3027_vm13 }
 0x235   : > { %v1537_v56 = vrot.slane %v1534_v3, 6  ;;  %1900 = vrot.lane.b32.xlu1 %v2792_v47, %s2631_s27  ;;  %1898 = vrot.lane.b32.xlu0 %v2795_v48, %s2631_s27 }
 0x236   : > { %1905 = vrot.lane.b32.xlu2 %v2803_v50, %s2631_s27 }
 0x237   : > { %v1538_v37 = vsel %vm5254_vm9, %v1533_v5, %v1537_v56  ;;  %v1555_v43 = vpop.permute.xlu1 %1554  ;;  %v1553_v59 = vpop.permute.xlu0 %1552  ;;  %vm5260_vm9 = vmmov %vm5259_vm0 }
 0x238   : > { %v1540_v1 = vsel %vm4482_vm15, %v1538_v37, 0.0  ;;  %v1556_v17 = vsel %vm5259_vm0, %v1553_v59, %v1555_v43  ;;  %v1557_v18 = vsel %vm5260_vm9, %v1555_v43, %v1553_v59  ;;  %v4509_v26 = vpop.permute.xlu2 %1643  ;;  %vm4517_vm15 = vmand %vm1543_vm5, %vm3067_vm2  ;;  %vm1581_vm0 = vcmp.lt.s32.totalorder %v2940_v21, 98 }
 0x239   : > { %v1541_v2 = vadd.f32 %v1540_v1, %v1509_v46  ;;  %v1564_v4 = vmul.f32 %v1563_v33, %v1556_v17  ;;  %v1565_v35 = vmul.f32 %v1563_v33, %v1557_v18  ;;  %vm1575_vm9 = vmand %vm4497_vm12, %vm3074_vm7  ;;  %vm1613_vm5 = vcmp.lt.s32.totalorder %v2940_v21, 97 }
 0x23a   : > { %v1627_v43 = vstv %s2244_s7  ;;  %s4678_s7 = sld [smem:[#allocation5 + $0x5e]] }
 0x23b   : > { %v1566_v13 = vadd.f32 %v1564_v4, %v1561_v31  ;;  %v1567_v29 = vadd.f32 %v1565_v35, %v1562_v62 }
 0x23d   : > { %v1570_v9 = vrot.slane %v1567_v29, 6  ;;  %1930 = vrot.lane.b32.xlu1 %v2795_v48, %s2632_s5  ;;  %1907 = vrot.lane.b32.xlu0 %v2808_v51, %s2631_s27  ;;  %s4661_s27 = sld [smem:[#allocation5 + $0x2a]] }
 0x23e   : > { %1932 = vrot.lane.b32.xlu2 %v2792_v47, %s2632_s5 }
 0x23f   : > { %v1571_v15 = vsel %vm5263_vm4, %v1566_v13, %v1570_v9  ;;  %v1585_v16 = vpop.permute.xlu1 %1584  ;;  %v1580_v10 = vpop.permute.xlu0 %1579  ;;  %v1656_v13 = vstv %s4554_s30  ;;  %s4700_s30 = sld [smem:[#allocation5 + $0x5f]] }
 0x240   : > { %v1573_v46 = vsel %vm4517_vm15, %v1571_v15, 0.0  ;;  %v1588_v49 = vsel %vm1581_vm0, %v1585_v16, %v4451_v8  ;;  %v1589_v41 = vsel %vm1581_vm0, %v4451_v8, %v1585_v16  ;;  %v1582_v34 = vsel %vm1581_vm0, %v4433_v28, %v1580_v10  ;;  %v4533_v11 = vpop.permute.xlu2 %1673  ;;  %vm1576_vm15 = vmand %vm1575_vm9, %vm5142_vm6 }
 0x241   : > { %v1574_v7 = vadd.f32 %v1573_v46, %v1541_v2  ;;  %v1596_v30 = vmul.f32 %v1595_v39, %v1588_v49  ;;  %v1597_v57 = vmul.f32 %v1595_v39, %v1589_v41  ;;  %v1583_v27 = vsel %vm1581_vm0, %v1580_v10, %v4433_v28  ;;  %vm5264_vm0 = vmmov %vm5263_vm4 }
 0x242   : > { %v1593_v45 = vmul.f32 %v1592_v54, %v1582_v34  ;;  %v1594_v38 = vmul.f32 %v1592_v54, %v1583_v27  ;;  %vm1645_vm4 = vcmp.lt.s32.totalorder %v2940_v21, 96  ;;  %vm1607_vm9 = vmand %vm4497_vm12, %vm5206_vm3 }
 0x244   : > { %v1598_v55 = vadd.f32 %v1596_v30, %v1593_v45  ;;  %v1599_v19 = vadd.f32 %v1597_v57, %v1594_v38  ;;  %v1691_v45 = vstv %s4581_s12  ;;  %s4724_s12 = sld [smem:[#allocation5 + $0x2f]] }
 0x245   : > { %1939 = vrot.lane.b32.xlu1 %v2808_v51, %s2632_s5  ;;  %1937 = vrot.lane.b32.xlu0 %v2803_v50, %s2632_s5  ;;  %s4673_s5 = sld [smem:[#allocation5 + $0x2c]] }
 0x246   : > { %v1602_v28 = vrot.slane %v1599_v19, 6  ;;  %1962 = vrot.lane.b32.xlu2 %v2795_v48, %s2633_s8  ;;  %v1624_v48 = vstv %s2243_s6  ;;  %v1688_v19 = vstv %s2247_s24  ;;  %s4676_s6 = sld [smem:[#allocation5 + $0x5d]] }
 0x247   : > { %v1612_v8 = vpop.permute.xlu1 %1611  ;;  %v1610_v5 = vpop.permute.xlu0 %1609  ;;  %s4730_s24 = sld [smem:[#allocation5 + $0x60]] }
 0x248   : > { %v1603_v3 = vsel %vm5264_vm0, %v1598_v55, %v1602_v28  ;;  %v1614_v12 = vsel %vm1613_vm5, %v1610_v5, %v1612_v8  ;;  %v1615_v63 = vsel %vm1613_vm5, %v1612_v8, %v1610_v5  ;;  %v1683_v56 = vpop.permute.xlu2 %1682 }
 0x249   : > { %v1605_v33 = vsel %vm1576_vm15, %v1603_v3, 0.0  ;;  %v1625_v18 = vmul.f32 %v1624_v48, %v1614_v12  ;;  %v1626_v62 = vmul.f32 %v1624_v48, %v1615_v63  ;;  %vm1608_vm15 = vmand %vm1607_vm9, %vm5238_vm10  ;;  %vm5266_vm9 = vnez %v5067_v0 }
 0x24a   : > { %v1606_v37 = vadd.f32 %v1605_v33, %v1574_v7 }
 0x24d   : > { %1969 = vrot.lane.b32.xlu1 %v2803_v50, %s2633_s8  ;;  %1964 = vrot.lane.b32.xlu0 %v2792_v47, %s2633_s8 }
 0x24e   : > { %1971 = vrot.lane.b32.xlu2 %v2808_v51, %s2633_s8  ;;  %s4688_s8 = sld [smem:[#allocation5 + $0x2d]] }
 0x24f   : > { %v1642_v59 = vpop.permute.xlu1 %1641  ;;  %v1619_v31 = vpop.permute.xlu0 %1618 }
 0x250   : > { %v1646_v50 = vsel %vm1645_vm4, %v1642_v59, %v4509_v26  ;;  %v1647_v47 = vsel %vm1645_vm4, %v4509_v26, %v1642_v59  ;;  %v1620_v1 = vsel %vm1613_vm5, %v4473_v52, %v1619_v31  ;;  %v1621_v17 = vsel %vm1613_vm5, %v1619_v31, %v4473_v52  ;;  %v4571_v51 = vpop.permute.xlu2 %1712  ;;  %vm5265_vm5 = vmmov %vm5264_vm0 }
 0x251   : > { %v1628_v2 = vmul.f32 %v1627_v43, %v1620_v1  ;;  %v1629_v4 = vmul.f32 %v1627_v43, %v1621_v17  ;;  %v1657_v15 = vmul.f32 %v1656_v13, %v1646_v50  ;;  %v1658_v49 = vmul.f32 %v1656_v13, %v1647_v47  ;;  %vm1639_vm0 = vmand %vm4497_vm12, %vm5240_vm11 }
 0x252   : > { %v1723_v13 = vstv %s2250_s14  ;;  %s4808_s14 = sld [smem:[#allocation5 + $0x30]] }
 0x253   : > { %v1630_v26 = vadd.f32 %v1628_v2, %v1625_v18  ;;  %v1631_v35 = vadd.f32 %v1629_v4, %v1626_v62 }
 0x255   : > { %v1634_v29 = vrot.slane %v1631_v35, 6  ;;  %v1720_v35 = vstv %s2249_s25  ;;  %s4800_s25 = sld [smem:[#allocation5 + $0x61]] }
 0x257   : > { %v1635_v52 = vsel %vm5265_vm5, %v1630_v26, %v1634_v29  ;;  %v1651_v9 = vpop.permute.xlu1 %1650  ;;  %v1649_v39 = vpop.permute.xlu0 %1648  ;;  %vm1677_vm5 = vcmp.lt.s32.totalorder %v2940_v21, 95 }
 0x258   : > { %v1637_v16 = vsel %vm1608_vm15, %v1635_v52, 0.0  ;;  %v1652_v54 = vsel %vm1645_vm4, %v1649_v39, %v1651_v9  ;;  %v1653_v10 = vsel %vm1645_vm4, %v1651_v9, %v1649_v39  ;;  %v1740_v46 = vpop.permute.xlu2 %1739  ;;  %vm1640_vm15 = vmand %vm1639_vm0, %vm5266_vm9  ;;  %vm5267_vm4 = vcmask 1041408  }
 0x259   : > { %v1638_v41 = vadd.f32 %v1637_v16, %v1606_v37  ;;  %v1660_v34 = vmul.f32 %v1659_v44, %v1652_v54  ;;  %v1661_v7 = vmul.f32 %v1659_v44, %v1653_v10  ;;  %vm1671_vm0 = vmand %vm4497_vm12, %vm3215_vm14  ;;  %vm1741_vm9 = vcmp.lt.s32.totalorder %v2940_v21, 93 }
 0x25b   : > { %v1662_v30 = vadd.f32 %v1660_v34, %v1657_v15  ;;  %v1663_v57 = vadd.f32 %v1661_v7, %v1658_v49  ;;  %v1752_v7 = vstv %s4616_s15  ;;  %s2155_s15 = sshll.u32 %s2762_s9, 1 }
 0x25d   : > { %v1666_v27 = vrot.slane %v1663_v57, 6 }
 0x25f   : > { %v1667_v38 = vsel %vm5267_vm4, %v1662_v30, %v1666_v27  ;;  %v1681_v55 = vpop.permute.xlu1 %1680  ;;  %v1676_v28 = vpop.permute.xlu0 %1675  ;;  %vm1672_vm4 = vmand %vm1671_vm0, %vm5158_vm8  ;;  %v1755_v30 = vstv %s2252_s16  ;;  %vm5273_vm8 = vcmask 1041408   ;;  %s2269_s16 = sshll.u32 %s2570_s20, 1 }
 0x260   : > { %v1669_v8 = vsel %vm1640_vm15, %v1667_v38, 0.0  ;;  %v1684_v5 = vsel %vm1677_vm5, %v1681_v55, %v1683_v56  ;;  %v1685_v3 = vsel %vm1677_vm5, %v1683_v56, %v1681_v55  ;;  %v1678_v12 = vsel %vm1677_vm5, %v4533_v11, %v1676_v28  ;;  %v4599_v31 = vpop.permute.xlu2 %1770  ;;  %vm1703_vm0 = vmand %vm4497_vm12, %vm5162_vm1 }
 0x261   : > { %v1670_v63 = vadd.f32 %v1669_v8, %v1638_v41  ;;  %v1692_v33 = vmul.f32 %v1691_v45, %v1684_v5  ;;  %v1693_v37 = vmul.f32 %v1691_v45, %v1685_v3  ;;  %v1679_v48 = vsel %vm1677_vm5, %v1676_v28, %v4533_v11 }
 0x262   : > { %v1689_v43 = vmul.f32 %v1688_v19, %v1678_v12  ;;  %v1690_v59 = vmul.f32 %v1688_v19, %v1679_v48  ;;  %vm1709_vm15 = vcmp.lt.s32.totalorder %v2940_v21, 94  ;;  %vm5268_vm5 = vcmask 1041408  }
 0x264   : > { %v1694_v50 = vadd.f32 %v1692_v33, %v1689_v43  ;;  %v1695_v47 = vadd.f32 %v1693_v37, %v1690_v59 }
 0x266   : > { %v1698_v56 = vrot.slane %v1695_v47, 6 }
 0x267   : > { %v1708_v11 = vpop.permute.xlu1 %1707  ;;  %v1706_v1 = vpop.permute.xlu0 %1705 }
 0x268   : > { %v1699_v17 = vsel %vm5268_vm5, %v1694_v50, %v1698_v56  ;;  %v1710_v18 = vsel %vm1709_vm15, %v1706_v1, %v1708_v11  ;;  %v1711_v62 = vsel %vm1709_vm15, %v1708_v11, %v1706_v1  ;;  %v4613_v26 = vpop.permute.xlu2 %1779 }
 0x269   : > { %v1701_v2 = vsel %vm1672_vm4, %v1699_v17, 0.0  ;;  %v1721_v16 = vmul.f32 %v1720_v35, %v1710_v18  ;;  %v1722_v54 = vmul.f32 %v1720_v35, %v1711_v62  ;;  %vm5269_vm4 = vnez %v5087_v25 }
 0x26a   : > { %v1702_v4 = vadd.f32 %v1701_v2, %v1670_v63  ;;  %vm1704_vm5 = vmand %vm1703_vm0, %vm5269_vm4  ;;  %vm5271_vm0 = vnez %v5101_v20 }
 0x26b   : > { %vm1735_vm4 = vmand %vm4497_vm12, %vm5271_vm0  ;;  %vm1806_vm12 = vcmp.lt.s32.totalorder %v2940_v21, 82 }
 0x26f   : > { %v1738_v29 = vpop.permute.xlu1 %1737  ;;  %v1715_v44 = vpop.permute.xlu0 %1714 }
 0x270   : > { %v1742_v52 = vsel %vm1741_vm9, %v1738_v29, %v1740_v46  ;;  %v1743_v9 = vsel %vm1741_vm9, %v1740_v46, %v1738_v29  ;;  %v1716_v39 = vsel %vm1709_vm15, %v4571_v51, %v1715_v44  ;;  %v1717_v15 = vsel %vm1709_vm15, %v1715_v44, %v4571_v51  ;;  %v4635_v57 = vpop.permute.xlu2 %1809 }
 0x271   : > { %v1724_v10 = vmul.f32 %v1723_v13, %v1716_v39  ;;  %v1725_v49 = vmul.f32 %v1723_v13, %v1717_v15  ;;  %vm5270_vm15 = vcmask 1041408   ;;  %v1754_v28 = vmul.f32 %v1752_v7, %v1743_v9 }
 0x272   : > { %v1753_v12 = vmul.f32 %v1752_v7, %v1742_v52  ;;  %v1788_v44 = vstv %s4659_s1  ;;  %v1785_v9 = vstv %s4661_s27 }
 0x273   : > { %v1726_v41 = vadd.f32 %v1724_v10, %v1721_v16  ;;  %v1727_v34 = vadd.f32 %v1725_v49, %v1722_v54  ;;  %v1820_v54 = vstv %s4669_s28  ;;  %s2032_s28 = scalar_lea.hbm %s4956_s4, %s2269_s16 }
 0x274   : > { %s2036_s20 = sshll.u32 %s2032_s28, 4  ;;  %s2037_s20 = int_to_ptr.hbm [resolvable:$true] %s2036_s20 }
 0x275   : > { %v1730_v46 = vrot.slane %v1727_v34, 6 }
 0x277   : > { %v1731_v51 = vsel %vm5270_vm15, %v1726_v41, %v1730_v46  ;;  %v1747_v27 = vpop.permute.xlu1 %1746  ;;  %v1745_v45 = vpop.permute.xlu0 %1744  ;;  %vm5272_vm15 = vnez %v5103_v14 }
 0x278   : > { %v1733_v38 = vsel %vm1704_vm5, %v1731_v51, 0.0  ;;  %v1748_v55 = vsel %vm1741_vm9, %v1745_v45, %v1747_v27  ;;  %v1749_v19 = vsel %vm1741_vm9, %v1747_v27, %v1745_v45  ;;  %vm1736_vm5 = vmand %vm1735_vm4, %vm5272_vm15  ;;  %v4649_v47 = vpop.permute.xlu2 %1836  ;;  %vm5020_vm9 = vcmp.lt.s32.totalorder %v2940_v21, 81 }
 0x279   : > { %v1734_v8 = vadd.f32 %v1733_v38, %v1702_v4  ;;  %v1756_v5 = vmul.f32 %v1755_v30, %v1748_v55  ;;  %v1757_v3 = vmul.f32 %v1755_v30, %v1749_v19  ;;  %v1817_v30 = vstv %s4671_s29  ;;  %s261_s29 = scalar_lea.vmem [#allocation12], %s2155_s15 }
 0x27a   : > { %v1849_v27 = vstv %s4673_s5  ;;  %v1852_v38 = vstv %s4676_s6  ;;  %vm5278_vm15 = vcmp.lt.s32.totalorder %v2940_v21, 80  ;;  %s2034_s5 = sshll.u32 %s261_s29, 4  ;;  %s2022_s6 = scalar_lea.sflag [#allocation7], %s2762_s9  ;;  %s2035_s5 = int_to_ptr.vmem [resolvable:$true] %s2034_s5 }
 0x27b   : > { %v1759_v63 = vadd.f32 %v1757_v3, %v1754_v28  ;;  %v1758_v33 = vadd.f32 %v1756_v5, %v1753_v12  ;;  %v1884_v3 = vstv %s4678_s7  ;;  %s2502_s7 = sshra.s32 %s2037_s20, 4  ;;  %s2503_s7 = int_to_ptr.hbm [resolvable:$true] %s2502_s7 }
 0x27c   : > { %p2509_p11 = scmp.lt.s32.totalorder %s2503_s7, %s4956_s4 }
 0x27d   : > { %v1762_v37 = vrot.slane %v1759_v63, 6 }
 0x27f   : > { %v1763_v48 = vsel %vm5273_vm8, %v1758_v33, %v1762_v37  ;;  %v1778_v43 = vpop.permute.xlu1 %1777  ;;  %v1773_v59 = vpop.permute.xlu0 %1772  ;;  %vm1774_vm8 = vcmp.lt.s32.totalorder %v2940_v21, 83  ;;  %v1881_v33 = vstv %s4688_s8  ;;  %s2504_s8 = scalar_lea.hbm %s2503_s7, 2 }
 0x280   : > { %v1765_v50 = vsel %vm1736_vm5, %v1763_v48, 0.0  ;;  %v4653_v40 = vpop.permute.xlu2 %1866  ;;  %v1782_v52 = vsel %vm1774_vm8, %v4613_v26, %v1778_v43  ;;  %v1776_v39 = vsel %vm1774_vm8, %v1773_v59, %v4599_v31  ;;  %v1781_v49 = vsel %vm1774_vm8, %v1778_v43, %v4613_v26  ;;  %p2505_p1 = scmp.ne.s32.totalorder %s2503_s7, %s2504_s8 }
 0x281   : > { %v4651_v56 = vadd.f32 %v1765_v50, %v1734_v8  ;;  %v1790_v41 = vmul.f32 %v1788_v44, %v1782_v52  ;;  %v1775_v34 = vsel %vm1774_vm8, %v4599_v31, %v1773_v59  ;;  %v1787_v46 = vmul.f32 %v1785_v9, %v1776_v39 }
 0x282   : > { %v1789_v55 = vmul.f32 %v1788_v44, %v1781_v49  ;;  %v1786_v19 = vmul.f32 %v1785_v9, %v1775_v34  ;;  %vm1902_vm5 = vcmp.lt.s32.totalorder %v2940_v21, 79  ;;  %vm5274_vm8 = vcmp.lt.s32.totalorder %v3278_v60, 16  ;;  %p2506_p3 = pnand %p2505_p1, %p2734_p2 }
 0x283   : > { %v1792_v28 = vadd.f32 %v1790_v41, %v1787_v46 }
 0x284   : > { %v1791_v23 = vadd.f32 %v1789_v55, %v1786_v19  ;;  %p2507_p7 = pneg %p2506_p3 }
 0x285   : > { %v1795_v52 = vrot.slane %v1792_v28, 6 }
 0x287   : > { %v1805_v11 = vpop.permute.xlu1 %1804  ;;  %v1803_v1 = vpop.permute.xlu0 %1802 }
 0x288   : > { %v4657_v62 = vpop.permute.xlu2 %1875  ;;  %v1808_v51 = vsel %vm1806_vm12, %v1805_v11, %v1803_v1  ;;  %v1807_v12 = vsel %vm1806_vm12, %v1803_v1, %v1805_v11 }
 0x289   : > { %v1819_v8 = vmul.f32 %v1817_v30, %v1808_v51  ;;  %v1818_v9 = vmul.f32 %v1817_v30, %v1807_v12  ;;  %v1945_v51 = vstv %s4724_s12  ;;  %s2508_s12 = scalar_lea.hbm %s4956_s4, 4 }
 0x28a   : > { %p2510_p12 = scmp.lt.s32.totalorder %s2508_s12, %s2504_s8 }
 0x28c   : > { %p2511_p13 = por %p2510_p12, %p2509_p11 }
 0x28e   : > { %p2512_p0 = pnand %p2511_p13, %p2507_p7 }
 0x28f   : > { %v4655_v17 = vpop.permute.xlu1 %1834  ;;  %v1812_v18 = vpop.permute.xlu0 %1811 }
 0x290   : > { %v4663_v35 = vpop.permute.xlu2 %1905  ;;  %v1814_v10 = vsel %vm1806_vm12, %v1812_v18, %v4635_v57  ;;  %v1840_v31 = vsel %vm5020_vm9, %v4649_v47, %v4655_v17  ;;  %v1813_v5 = vsel %vm1806_vm12, %v4635_v57, %v1812_v18  ;;  %vm5279_vm12 = vmmov %vm5278_vm15  ;;  %v1916_v18 = vstv %s4700_s30 }
 0x291   : > { %v1822_v45 = vmul.f32 %v1820_v54, %v1814_v10  ;;  %v1851_v57 = vmul.f32 %v1849_v27, %v1840_v31  ;;  %v1821_v1 = vmul.f32 %v1820_v54, %v1813_v5  ;;  %v1913_v10 = vstv %s4708_s10 }
 0x293   : > { %v1824_v48 = vadd.f32 %v1822_v45, %v1819_v8  ;;  %v1823_v30 = vadd.f32 %v1821_v1, %v1818_v9 }
 0x295   : > { %v1827_v41 = vrot.slane %v1824_v48, 6 }
 0x297   : > { %v1844_v2 = vpop.permute.xlu1 %1843  ;;  %v1842_v4 = vpop.permute.xlu0 %1841 }
 0x298   : > { %v4710_v7 = vpop.permute.xlu2 %1932  ;;  %v1846_v26 = vsel %vm5020_vm9, %v1844_v2, %v1842_v4  ;;  %vm5275_vm9 = vcmp.ge.s32.totalorder %v3278_v60, 0 }
 0x299   : > { %v1854_v63 = vmul.f32 %v1852_v38, %v1846_v26  ;;  %vm4740_vm4 = vmand %vm5275_vm9, %vm5274_vm8  ;;  %vm5280_vm9 = vcmp.lt.s32.totalorder %v2940_v21, 81 }
 0x29a   : > { %v1845_v60 = vsel %vm5280_vm9, %v1842_v4, %v1844_v2  ;;  %vm1768_vm8 = vmand %vm4740_vm4, %vm3027_vm13 }
 0x29b   : > { %v1856_v2 = vadd.f32 %v1854_v63, %v1851_v57  ;;  %v1853_v34 = vmul.f32 %v1852_v38, %v1845_v60  ;;  %vm4777_vm13 = vmand %vm1768_vm8, %vm3067_vm2  ;;  %vm5286_vm8 = vcmask 1041408  }
 0x29c   : > { %vm1800_vm2 = vmand %vm4740_vm4, %vm3074_vm7 }
 0x29d   : > { %v1859_v22 = vrot.slane %v1856_v2, 6  ;;  %v1980_v2 = vstv %s4800_s25 }
 0x29f   : > { %v4665_v13 = vpop.permute.xlu1 %1873  ;;  %v4667_v29 = vpop.permute.xlu0 %1868 }
 0x2a0   : > { %v1878_v43 = vsel %vm5278_vm15, %v4657_v62, %v4665_v13  ;;  %v1872_v59 = vsel %vm5279_vm12, %v4667_v29, %v4653_v40  ;;  %vm5281_vm15 = vmmov %vm5280_vm9  ;;  %vm1934_vm12 = vcmp.lt.s32.totalorder %v2940_v21, 78  ;;  %vm5284_vm9 = vcmp.lt.s32.totalorder %v2940_v21, 80 }
 0x2a1   : > { %v1839_v39 = vsel %vm5281_vm15, %v4655_v17, %v4649_v47  ;;  %v1886_v4 = vmul.f32 %v1884_v3, %v1878_v43  ;;  %v1883_v54 = vmul.f32 %v1881_v33, %v1872_v59  ;;  %v4772_v17 = vpop.permute.xlu2 %1962  ;;  %v1877_v38 = vsel %vm5284_vm9, %v4665_v13, %v4657_v62  ;;  %vm5285_vm15 = vmmov %vm5284_vm9 }
 0x2a2   : > { %v1850_v46 = vmul.f32 %v1849_v27, %v1839_v39  ;;  %v1871_v26 = vsel %vm5285_vm15, %v4653_v40, %v4667_v29  ;;  %v1948_v27 = vstv %s4730_s24  ;;  %v1796_v40 = vsel %vm5286_vm8, %v1791_v23, %v1795_v52  ;;  %vm5287_vm9 = vmmov %vm5286_vm8 }
 0x2a3   : > { %v1888_v19 = vadd.f32 %v1886_v4, %v1883_v54  ;;  %v1828_v13 = vsel %vm5287_vm9, %v1823_v30, %v1827_v41  ;;  %vm1832_vm15 = vmand %vm4740_vm4, %vm5206_vm3  ;;  %v1885_v12 = vmul.f32 %v1884_v3, %v1877_v38  ;;  %v1882_v63 = vmul.f32 %v1881_v33, %v1871_v26 }
 0x2a4   : > { %v1855_v29 = vadd.f32 %v1853_v34, %v1850_v46  ;;  %vm4823_vm8 = vmand %vm1800_vm2, %vm5142_vm6  ;;  %v1977_v41 = vstv %s4808_s14 }
 0x2a5   : > { %vm4838_vm7 = vmand %vm1832_vm15, %vm5238_vm10  ;;  %v1891_v59 = vrot.slane %v1888_v19, 6  ;;  %v1830_v60 = vsel %vm4823_vm8, %v1828_v13, 0.0  ;;  %vm1966_vm10 = vcmp.lt.s32.totalorder %v2940_v21, 77  ;;  %vm5298_vm15 = vnez %v5070_v6 }
 0x2a6   : > { %vm5292_vm6 = vmmov %vm5287_vm9 }
 0x2a7   : > { %v4691_v15 = vpop.permute.xlu1 %1900  ;;  %v4693_v16 = vpop.permute.xlu0 %1898  ;;  %v1860_v36 = vsel %vm5292_vm6, %v1855_v29, %v1859_v22  ;;  %vm1896_vm3 = vmand %vm4740_vm4, %vm3215_vm14  ;;  %vm5301_vm14 = vnez %v5087_v25 }
 0x2a8   : > { %v1904_v49 = vsel %vm1902_vm5, %v4691_v15, %v4693_v16  ;;  %v1862_v58 = vsel %vm4838_vm7, %v1860_v36, 0.0  ;;  %vm5297_vm2 = vmmov %vm5292_vm6 }
 0x2a9   : > { %v1915_v55 = vmul.f32 %v1913_v10, %v1904_v49  ;;  %vm1928_vm9 = vmand %vm4740_vm4, %vm5162_vm1 }
 0x2aa   : > { %vm4881_vm8 = vmand %vm1896_vm3, %vm5298_vm15 }
 0x2ab   : > { %vm1929_vm1 = vmand %vm1928_vm9, %vm5301_vm14 }
 0x2ac   : > { %vm5302_vm7 = vmmov %vm5297_vm2 }
 0x2ad   : > { %vm5306_vm9 = vmmov %vm5302_vm7 }
 0x2af   : > { %v1931_v50 = vpop.permute.xlu1 %1930  ;;  %v1908_v11 = vpop.permute.xlu0 %1907 }
 0x2b0   : > { %v1910_v44 = vsel %vm1902_vm5, %v1908_v11, %v4663_v35  ;;  %v1936_v31 = vsel %vm1934_vm12, %v4710_v7, %v1931_v50  ;;  %v1909_v62 = vsel %vm1902_vm5, %v4663_v35, %v1908_v11  ;;  %v1903_v35 = vsel %vm1902_vm5, %v4693_v16, %v4691_v15  ;;  %vm1864_vm5 = vmand %vm4740_vm4, %vm5240_vm11 }
 0x2b1   : > { %v1918_v47 = vmul.f32 %v1916_v18, %v1910_v44  ;;  %v1947_v3 = vmul.f32 %v1945_v51, %v1936_v31  ;;  %v1917_v33 = vmul.f32 %v1916_v18, %v1909_v62  ;;  %v1798_v16 = vsel %vm4777_vm13, %v1796_v40, 0.0  ;;  %vm5296_vm13 = vmmov %vm5292_vm6 }
 0x2b2   : > { %v1914_v11 = vmul.f32 %v1913_v10, %v1903_v35  ;;  %v1935_v61 = vsel %vm1934_vm12, %v1931_v50, %v4710_v7  ;;  %v1887_v18 = vadd.f32 %v1885_v12, %v1882_v63  ;;  %v1799_v52 = vadd.f32 %v1798_v16, %v4651_v56  ;;  %v1972_v50 = vpop.permute.xlu2 %1971  ;;  %vm1960_vm6 = vmand %vm4740_vm4, %vm5271_vm0 }
 0x2b3   : > { %v1920_v28 = vadd.f32 %v1918_v47, %v1915_v55  ;;  %vm5293_vm11 = vnez %v5067_v0  ;;  %v1946_v39 = vmul.f32 %v1945_v51, %v1935_v61 }
 0x2b4   : > { %v1919_v7 = vadd.f32 %v1917_v33, %v1914_v11  ;;  %v1892_v56 = vsel %vm5296_vm13, %v1887_v18, %v1891_v59  ;;  %v1831_v4 = vadd.f32 %v1830_v60, %v1799_v52  ;;  %vm2016_vm13 = vcmask 1042434   ;;  %v5307_v11 = vld [vmem:[#allocation17_spill] sm:$0xff] }
 0x2b5   : > { %v1923_v42 = vrot.slane %v1920_v28, 6  ;;  %vm5308_vm15 = vnez %v5307_v11 }
 0x2b6   : > { %v1863_v46 = vadd.f32 %v1862_v58, %v1831_v4 }
 0x2b7   : > { %v1940_v8 = vpop.permute.xlu1 %1939  ;;  %v1938_v5 = vpop.permute.xlu0 %1937  ;;  %v1924_v54 = vsel %vm5297_vm2, %v1919_v7, %v1923_v42 }
 0x2b8   : > { %v1942_v57 = vsel %vm1934_vm12, %v1940_v8, %v1938_v5  ;;  %v1941_v43 = vsel %vm1934_vm12, %v1938_v5, %v1940_v8  ;;  %vm4862_vm12 = vmand %vm1864_vm5, %vm5293_vm11  ;;  %vm5303_vm5 = vnez %v5103_v14 }
 0x2b9   : > { %v1950_v15 = vmul.f32 %v1948_v27, %v1942_v57  ;;  %v1949_v44 = vmul.f32 %v1948_v27, %v1941_v43  ;;  %v1894_v53 = vsel %vm4862_vm12, %v1892_v56, 0.0  ;;  %v1926_v27 = vsel %vm4881_vm8, %v1924_v54, 0.0  ;;  %vm1961_vm3 = vmand %vm1960_vm6, %vm5303_vm5 }
 0x2ba   : > { %v1895_v22 = vadd.f32 %v1894_v53, %v1863_v46 }
 0x2bb   : > { %v1952_v1 = vadd.f32 %v1950_v15, %v1947_v3  ;;  %v1951_v47 = vadd.f32 %v1949_v44, %v1946_v39 }
 0x2bd   : > { %v1955_v10 = vrot.slane %v1952_v1, 6 }
 0x2bf   : > { %v1970_v49 = vpop.permute.xlu1 %1969  ;;  %v1965_v0 = vpop.permute.xlu0 %1964  ;;  %v1956_v45 = vsel %vm5302_vm7, %v1951_v47, %v1955_v10 }
 0x2c0   : > { %v1973_v32 = vsel %vm1966_vm10, %v1970_v49, %v1972_v50  ;;  %v1974_v23 = vsel %vm1966_vm10, %v1972_v50, %v1970_v49  ;;  %v1967_v6 = vsel %vm1966_vm10, %v4772_v17, %v1965_v0  ;;  %v1968_v51 = vsel %vm1966_vm10, %v1965_v0, %v4772_v17  ;;  %vm5304_vm10 = vmmov %vm5297_vm2 }
 0x2c1   : > { %v1982_v30 = vmul.f32 %v1980_v2, %v1974_v23  ;;  %v1981_v38 = vmul.f32 %v1980_v2, %v1973_v32  ;;  %v1978_v26 = vmul.f32 %v1977_v41, %v1967_v6  ;;  %v1979_v55 = vmul.f32 %v1977_v41, %v1968_v51 }
 0x2c2   : > { %v1958_v21 = vsel %vm1929_vm1, %v1956_v45, 0.0  ;;  %v1927_v17 = vadd.f32 %v1926_v27, %v1895_v22  ;;  %vm5305_vm2 = vcmask 1040384  }
 0x2c3   : > { %v1984_v19 = vadd.f32 %v1982_v30, %v1979_v55  ;;  %v1983_v25 = vadd.f32 %v1981_v38, %v1978_v26 }
 0x2c4   : > { %v1959_v62 = vadd.f32 %v1958_v21, %v1927_v17 }
 0x2c5   : > { %v1987_v31 = vrot.slane %v1984_v19, 6 }
 0x2c7   : > { %v1988_v40 = vsel %vm5304_vm10, %v1983_v25, %v1987_v31 }
 0x2c8   : > { %v1990_v13 = vsel %vm1961_vm3, %v1988_v40, 0.0 }
 0x2c9   : > { %v1991_v29 = vadd.f32 %v1990_v13, %v1959_v62 }
 0x2cb   : > { %v2267_v20 = vmul.f32 -1.442695, %v1991_v29 }
 0x2cd   : > { %2408 = vpow2.f32 %v2267_v20 }
 0x2d3   : > { %v2409_v37 = vpop.eup %2408 }
 0x2d4   : > { %v1995_v28 = vadd.f32 1.0, %v2409_v37 }
 0x2d6   : > { %2410 = vrcp.f32 %v1995_v28  ;;  %v2007_v14 = vand.u32 2147483648, %v1995_v28  ;;  %v2005_v35 = vand.u32 2147483647, %v1995_v28  ;;  %vm2001_vm4 = vweird.f32 %v1995_v28 }
 0x2d8   : > { %v2008_v48 = vor.u32 1.1754944e-38, %v2007_v14  ;;  %vm2006_vm12 = vcmp.eq.f32.partialorder %v2005_v35, 8.507059e+37 }
 0x2dc   : > { %v2411_v8 = vpop.eup %2410 }
 0x2dd   : > { %v1997_v5 = vmul.f32 %v2411_v8, %v1995_v28  ;;  %vm2002_vm0 = vweird.f32 %v2411_v8 }
 0x2de   : > { %vm2003_vm11 = vmor %vm2001_vm4, %vm2002_vm0 }
 0x2df   : > { %v1998_v12 = vsub.f32 1.0, %v1997_v5 }
 0x2e1   : > { %v1999_v63 = vmul.f32 %v2411_v8, %v1998_v12 }
 0x2e3   : > { %v2000_v57 = vadd.f32 %v2411_v8, %v1999_v63 }
 0x2e5   : > { %v2004_v3 = vsel %vm2003_vm11, %v2411_v8, %v2000_v57 }
 0x2e6   : > { %v2009_v33 = vsel %vm2006_vm12, %v2008_v48, %v2004_v3 }
 0x2e7   : > { %v2012_v43 = vrot.slane %v2009_v33, 1  ;;  %v2013_v15 = vrot.slane %v2009_v33, 2  ;;  %v2014_v16 = vrot.slane %v2009_v33, 3 }
 0x2e9   : > { %v2015_v24 = vsel %vm5305_vm2, %v2009_v33, %v2012_v43  ;;  %v2017_v36 = vsel %vm2016_vm13, %v2013_v15, %v2014_v16 }
 0x2ea   : > { %v2018_v59 = vsel %vm5306_vm9, %v2015_v24, %v2017_v36 }
 0x2eb   : > { %2020 = vst.msk [vmem:[%s261_s29] sm:$0x3] %vm5308_vm15, %v2018_v59 }
 0x2ec   : > { %2515 = shalt.err (!%p2512_p0)
}
 0x2ed   : > { %2283 = dma.vmem_to_hbm [thread:$0]  (%p2734_p2), %s2035_s5, 32, %s2037_s20, %s2022_s6  }
 0x2ee PF: > { %s2048_s9 = sand.u32 1, %s2558_s17   ;;  %p2297_p4 = pnand %p2147_p8, %p2707_p5 }
 0x2ef   : > { %s2049_s14 = scalar_lea.sflag [#allocation7], %s2048_s9 }
 0x2f0   : > { %p2298_p6 = pneg %p2297_p4 }
 0x2f2   : > { %2553 = dma.done.wait (%p2298_p6), %s2049_s14, 32  }
 0x2f3   : > { %2555 = vsyncadd (%p2298_p6), %s2049_s14, 4294967264  ;;  %s23_s22 = sadd.s32 1, %s2578_s22   ;;  %s5309_s17 = smov %s2562_s18 }
 0x2f4   : > { %p20_p9 = scmp.ge.s32.totalorder %s23_s22, 4   ;;  %s5310_s18 = smov %s2566_s19 }
 0x2f5   : > { %s5311_s19 = smov %s2744_s23  ;;  %s5312_s20 = smov %s2574_s21 }
 0x2f6   : > { %s5313_s21 = smov %s5315_s11  ;;  %22 = sbr.rel (!%p20_p9) target bundleno = 10 (0xa), region = 99 }
 0x2fb   :  { %2055 = vsyncpa [#allocation6], 1 }
 0x2fc   :  { %2057 = vsyncpa [#allocation6 + $0x1], 1 }
 0x2fd   :  { %2058 = vsyncpa [#allocation11], 1 }
 0x2fe   :  { %2060 = vsyncpa [#allocation11 + $0x1], 1 }
 0x2ff   :  { %2061 = vsyncpa [#allocation7], 1 }
 0x300   :  { %2063 = vsyncpa [#allocation7 + $0x1], 1 }
 0x301   :  { %2064 = vsyncpa [#allocation8], 1 }
 0x302   :  { %2066 = vsyncpa [#allocation8 + $0x1], 1 }

</bundles_post_ra>
